<compile_context>
chip_gen: v7x
topology: tpu7x:2x2x1
jax: 0.10.0
libtpu: 0.0.40
codegen_flags: <defaults>
</compile_context>

<pallas_src>
import jax
import jax.numpy as jnp
from jax.experimental import pallas as pl
from jax.experimental.pallas import tpu as pltpu

EPS = 1e-5


# --------------------------------------------------------------------------
# Kernel 1: y1 = conv1(x) + b1  (lane-dense), per-sample BN1 partial stats.
# --------------------------------------------------------------------------
def conv1_kernel(xp_ref, w_ref, b_ref, y_ref, st_ref):
    # xp_ref: (1, H+2, W*Cin)  row-padded, lane-flattened input
    # w_ref : (3, W*Cin, W*Cout) banded (block-Toeplitz) conv1 weights
    # b_ref : (1, W*Cout) lane-dense bias
    # y_ref : (1, H, W*Cout) conv1 output (pre-BN), lane-dense
    # st_ref: (1, 2, W*Cout) per-sample [col-sum, col-sum-of-squares]
    H = y_ref.shape[1]
    acc = jnp.dot(xp_ref[0, 0:H, :], w_ref[0], preferred_element_type=jnp.float32)
    acc += jnp.dot(xp_ref[0, 1:H + 1, :], w_ref[1], preferred_element_type=jnp.float32)
    acc += jnp.dot(xp_ref[0, 2:H + 2, :], w_ref[2], preferred_element_type=jnp.float32)
    y = acc + b_ref[...]
    y_ref[0] = y
    st_ref[0] = jnp.concatenate(
        [jnp.sum(y, axis=0, keepdims=True),
         jnp.sum(y * y, axis=0, keepdims=True)], axis=0)


# --------------------------------------------------------------------------
# Kernel 2: a = relu(BN1(y1)); y2 = conv2(a) + b2 (lane-dense) + partial stats.
# --------------------------------------------------------------------------
def bn_relu_conv2_kernel(y1_ref, sc_ref, sh_ref, w_ref, b_ref,
                         y2_ref, st_ref, ap_ref):
    # y1_ref: (1, H, W*C); sc/sh: (1, W*C) lane-dense folded BN1 scale/shift
    # w_ref : (3, W*C, W*C) banded conv2 weights; b_ref: (1, W*C)
    # ap_ref: (H+2, W*C) VMEM scratch (row-padded activation)
    H = y1_ref.shape[1]
    WC = y1_ref.shape[2]
    # Only the two border rows need zeroing (cheap, parallel-safe); the interior
    # is fully overwritten every grid step.
    ap_ref[0:1, :] = jnp.zeros((1, WC), jnp.float32)
    ap_ref[H + 1:H + 2, :] = jnp.zeros((1, WC), jnp.float32)
    ap_ref[1:H + 1, :] = jnp.maximum(y1_ref[0] * sc_ref[...] + sh_ref[...], 0.0)

    acc = jnp.dot(ap_ref[0:H, :], w_ref[0], preferred_element_type=jnp.float32)
    acc += jnp.dot(ap_ref[1:H + 1, :], w_ref[1], preferred_element_type=jnp.float32)
    acc += jnp.dot(ap_ref[2:H + 2, :], w_ref[2], preferred_element_type=jnp.float32)
    y = acc + b_ref[...]
    y2_ref[0] = y
    st_ref[0] = jnp.concatenate(
        [jnp.sum(y, axis=0, keepdims=True),
         jnp.sum(y * y, axis=0, keepdims=True)], axis=0)


# --------------------------------------------------------------------------
# Kernel 3: a = relu(BN2(y2)); SE: mean-pool -> fc1 -> relu -> fc2 -> sigmoid -> scale.
# --------------------------------------------------------------------------
def bn_relu_se_kernel(y2_ref, sc_ref, sh_ref, pool_ref, fc1_ref, fc2_ref,
                      bcast_ref, out_ref):
    # y2_ref : (1, H, W*C); sc/sh: (1, W*C) folded BN2 scale/shift
    # pool_ref : (W*C, C)  mean-pooling matrix (1/(H*W) folded in)
    # fc1_ref  : (C, Cr); fc2_ref: (Cr, C)  SE MLP weights (pre-transposed)
    # bcast_ref: (C, W*C)  0/1 matrix broadcasting the per-channel gate to lanes
    a = jnp.maximum(y2_ref[0] * sc_ref[...] + sh_ref[...], 0.0)        # (H, W*C)
    colsum = jnp.sum(a, axis=0, keepdims=True)                         # (1, W*C)
    pooled = jnp.dot(colsum, pool_ref[...],
                     preferred_element_type=jnp.float32)               # (1, C)
    z = jnp.maximum(jnp.dot(pooled, fc1_ref[...],
                            preferred_element_type=jnp.float32), 0.0)  # (1, Cr)
    s = jax.nn.sigmoid(jnp.dot(z, fc2_ref[...],
                               preferred_element_type=jnp.float32))    # (1, C)
    s_dense = jnp.dot(s, bcast_ref[...],
                      preferred_element_type=jnp.float32)              # (1, W*C)
    out_ref[0] = a * s_dense


# --------------------------------------------------------------------------
# pallas_call wrappers
# --------------------------------------------------------------------------
def _conv1_call(xp, w_banded, b_dense, N, H, WCin, WCout):
    return pl.pallas_call(
        conv1_kernel,
        out_shape=(jax.ShapeDtypeStruct((N, H, WCout), jnp.float32),
                   jax.ShapeDtypeStruct((N, 2, WCout), jnp.float32)),
        grid_spec=pltpu.PrefetchScalarGridSpec(
            num_scalar_prefetch=0, grid=(N,),
            in_specs=[
                pl.BlockSpec((1, H + 2, WCin), lambda n: (n, 0, 0)),
                pl.BlockSpec((3, WCin, WCout), lambda n: (0, 0, 0)),
                pl.BlockSpec((1, WCout), lambda n: (0, 0)),
            ],
            out_specs=[
                pl.BlockSpec((1, H, WCout), lambda n: (n, 0, 0)),
                pl.BlockSpec((1, 2, WCout), lambda n: (n, 0, 0)),
            ]),
        compiler_params=pltpu.CompilerParams(
            dimension_semantics=("parallel",)),
    )(xp, w_banded, b_dense)


def _bn_conv2_call(y1, sc, sh, w_banded, b_dense, N, H, WC):
    return pl.pallas_call(
        bn_relu_conv2_kernel,
        out_shape=(jax.ShapeDtypeStruct((N, H, WC), jnp.float32),
                   jax.ShapeDtypeStruct((N, 2, WC), jnp.float32)),
        grid_spec=pltpu.PrefetchScalarGridSpec(
            num_scalar_prefetch=0, grid=(N,),
            in_specs=[
                pl.BlockSpec((1, H, WC), lambda n: (n, 0, 0)),
                pl.BlockSpec((1, WC), lambda n: (0, 0)),
                pl.BlockSpec((1, WC), lambda n: (0, 0)),
                pl.BlockSpec((3, WC, WC), lambda n: (0, 0, 0)),
                pl.BlockSpec((1, WC), lambda n: (0, 0)),
            ],
            out_specs=[
                pl.BlockSpec((1, H, WC), lambda n: (n, 0, 0)),
                pl.BlockSpec((1, 2, WC), lambda n: (n, 0, 0)),
            ],
            scratch_shapes=[pltpu.VMEM((H + 2, WC), jnp.float32)]),
        compiler_params=pltpu.CompilerParams(
            dimension_semantics=("parallel",)),
    )(y1, sc, sh, w_banded, b_dense)


def _bn_se_call(y2, sc, sh, pool_mat, fc1, fc2, bcast_mat, N, H, WC, C, Cr):
    return pl.pallas_call(
        bn_relu_se_kernel,
        out_shape=jax.ShapeDtypeStruct((N, H, WC), jnp.float32),
        grid_spec=pltpu.PrefetchScalarGridSpec(
            num_scalar_prefetch=0, grid=(N,),
            in_specs=[
                pl.BlockSpec((1, H, WC), lambda n: (n, 0, 0)),
                pl.BlockSpec((1, WC), lambda n: (0, 0)),
                pl.BlockSpec((1, WC), lambda n: (0, 0)),
                pl.BlockSpec((WC, C), lambda n: (0, 0)),
                pl.BlockSpec((C, Cr), lambda n: (0, 0)),
                pl.BlockSpec((Cr, C), lambda n: (0, 0)),
                pl.BlockSpec((C, WC), lambda n: (0, 0)),
            ],
            out_specs=pl.BlockSpec((1, H, WC), lambda n: (n, 0, 0))),
        compiler_params=pltpu.CompilerParams(
            dimension_semantics=("parallel",)),
    )(y2, sc, sh, pool_mat, fc1, fc2, bcast_mat)


# --------------------------------------------------------------------------
# Wrapper-side helpers (tiny XLA glue)
# --------------------------------------------------------------------------
def _make_banded(w_hwio, W):
    """(kh, kw, Ci, Co) conv weights -> (kh, W*Ci, W*Co) banded matmul weights."""
    kh, kw, ci, co = w_hwio.shape
    wi = jnp.arange(W)[:, None]
    wo = jnp.arange(W)[None, :]
    dx = wi - wo + (kw // 2)                       # "same" padding offset
    valid = (dx >= 0) & (dx < kw)
    dxc = jnp.clip(dx, 0, kw - 1)
    b = w_hwio[:, dxc, :, :]                       # (kh, W, W, ci, co) = [dy, wi, wo, ci, co]
    b = jnp.where(valid[None, :, :, None, None], b, 0.0)
    b = jnp.transpose(b, (0, 1, 3, 2, 4))          # (dy, wi, ci, wo, co)
    return b.reshape(kh, W * ci, W * co)


def _fold_bn_dense(stats_dense, gamma, beta, count, W, C):
    """Per-sample lane-dense partial stats -> lane-dense BN scale/shift (1, W*C)."""
    s = jnp.sum(stats_dense, axis=0)               # (2, W*C)
    s = jnp.sum(s.reshape(2, W, C), axis=1)        # (2, C)
    mean = s[0] / count
    var = jnp.maximum(s[1] / count - mean * mean, 0.0)   # biased var, clamped
    scale = gamma * jax.lax.rsqrt(var + EPS)
    shift = beta - mean * scale
    return jnp.tile(scale[None, :], (1, W)), jnp.tile(shift[None, :], (1, W))


@jax.jit
def decoder_block_forward(x_nchw, params):
    """DecoderBlock forward. x_nchw: (N, Cin, H, W) f32 -> (N, Cout, H, W) f32."""
    N, Cin, H, W = x_nchw.shape
    Cout = params["conv1_w"].shape[0]
    Cr = params["fc1_w"].shape[0]
    WCin, WCout = W * Cin, W * Cout

    # NCHW -> lane-flattened NHWC (N, H, W*Cin); zero-pad rows for 3x3 / pad=1.
    x = jnp.transpose(x_nchw, (0, 2, 3, 1)).reshape(N, H, WCin)
    xp = jnp.pad(x, ((0, 0), (1, 1), (0, 0)))

    # PyTorch conv weight (Cout, Cin, kh, kw) -> (kh, kw, Cin, Cout) -> banded.
    w1b = _make_banded(jnp.transpose(params["conv1_w"], (2, 3, 1, 0)), W)
    w2b = _make_banded(jnp.transpose(params["conv2_w"], (2, 3, 1, 0)), W)
    b1d = jnp.tile(params["conv1_b"][None, :], (1, W))     # (1, W*Cout)
    b2d = jnp.tile(params["conv2_b"][None, :], (1, W))     # (1, W*Cout)
    # PyTorch Linear weight (out, in): y = x @ W.T
    fc1 = jnp.transpose(params["fc1_w"])                   # (C, Cr)
    fc2 = jnp.transpose(params["fc2_w"])                   # (Cr, C)
    eye = jnp.eye(Cout, dtype=jnp.float32)
    pool_mat = jnp.tile(eye, (W, 1)) * (1.0 / (H * W))     # (W*C, C)
    bcast_mat = jnp.tile(eye, (1, W))                      # (C, W*C)

    count = jnp.float32(N * H * W)

    y1, st1 = _conv1_call(xp, w1b, b1d, N, H, WCin, WCout)
    sc1, sh1 = _fold_bn_dense(st1, params["bn1_g"], params["bn1_b"], count, W, Cout)

    y2, st2 = _bn_conv2_call(y1, sc1, sh1, w2b, b2d, N, H, WCout)
    sc2, sh2 = _fold_bn_dense(st2, params["bn2_g"], params["bn2_b"], count, W, Cout)

    out = _bn_se_call(y2, sc2, sh2, pool_mat, fc1, fc2, bcast_mat,
                      N, H, WCout, Cout, Cr)
    # lane-dense (N, H, W*Cout) -> NCHW
    return jnp.transpose(out.reshape(N, H, W, Cout), (0, 3, 1, 2))


# --------------------------------------------------------------------------
# Pure-JAX reference (matches PyTorch training-mode forward)
# --------------------------------------------------------------------------
def ref_forward(x, p):
    def conv(x, w, b):
        y = jax.lax.conv_general_dilated(
            x, w, (1, 1), ((1, 1), (1, 1)),
            dimension_numbers=("NCHW", "OIHW", "NCHW"))
        return y + b[None, :, None, None]

    def bn(x, g, b):
        mean = jnp.mean(x, axis=(0, 2, 3), keepdims=True)
        var = jnp.mean((x - mean) ** 2, axis=(0, 2, 3), keepdims=True)
        return (x - mean) / jnp.sqrt(var + EPS) * g[None, :, None, None] \
            + b[None, :, None, None]

    y = jax.nn.relu(bn(conv(x, p["conv1_w"], p["conv1_b"]), p["bn1_g"], p["bn1_b"]))
    y = jax.nn.relu(bn(conv(y, p["conv2_w"], p["conv2_b"]), p["bn2_g"], p["bn2_b"]))
    pooled = jnp.mean(y, axis=(2, 3))                    # (N, C)
    z = jax.nn.relu(pooled @ p["fc1_w"].T)               # (N, Cr)
    s = jax.nn.sigmoid(z @ p["fc2_w"].T)                 # (N, C)
    return y * s[:, :, None, None]


# --------------------------------------------------------------------------
if __name__ == "__main__":
    N, Cin, H, W = 2, 4, 16, 16
    Cout, reduction = 32, 16
    Cr = Cout // reduction

    key = jax.random.PRNGKey(0)
    ks = jax.random.split(key, 10)
    params = {
        "conv1_w": 0.1 * jax.random.normal(ks[0], (Cout, Cin, 3, 3), jnp.float32),
        "conv1_b": 0.1 * jax.random.normal(ks[1], (Cout,), jnp.float32),
        "bn1_g": 1.0 + 0.1 * jax.random.normal(ks[2], (Cout,), jnp.float32),
        "bn1_b": 0.1 * jax.random.normal(ks[3], (Cout,), jnp.float32),
        "conv2_w": 0.1 * jax.random.normal(ks[4], (Cout, Cout, 3, 3), jnp.float32),
        "conv2_b": 0.1 * jax.random.normal(ks[5], (Cout,), jnp.float32),
        "bn2_g": 1.0 + 0.1 * jax.random.normal(ks[6], (Cout,), jnp.float32),
        "bn2_b": 0.1 * jax.random.normal(ks[7], (Cout,), jnp.float32),
        "fc1_w": 0.2 * jax.random.normal(ks[8], (Cr, Cout), jnp.float32),
        "fc2_w": 0.2 * jax.random.normal(ks[9], (Cout, Cr), jnp.float32),
    }
    x = jax.random.normal(jax.random.PRNGKey(42), (N, Cin, H, W), jnp.float32)

    out = jax.block_until_ready(decoder_block_forward(x, params))
    ref = jax.block_until_ready(ref_forward(x, params))

    assert out.shape == (N, Cout, H, W), out.shape
    max_err = jnp.max(jnp.abs(out - ref))
    assert jnp.allclose(out, ref, rtol=1e-3, atol=1e-3), f"max abs err {max_err}"

    print("KERNEL_OK")
</pallas_src>

<mosaic_0001>
module attributes {stable_mosaic.version = 11 : i64} {
  func.func @conv1_kernel(%arg0: i32, %arg1: memref<1x18x64xf32, #tpu.memory_space<vmem>>, %arg2: memref<3x64x512xf32, #tpu.memory_space<vmem>>, %arg3: memref<1x512xf32, #tpu.memory_space<vmem>>, %arg4: memref<1x16x512xf32, #tpu.memory_space<vmem>>, %arg5: memref<1x2x512xf32, #tpu.memory_space<vmem>>) attributes {dimension_semantics = [#tpu.dimension_semantics<parallel>], iteration_bounds = array<i64: 2>, scalar_prefetch = 0 : i64, scratch_operands = 0 : i64, tpu.core_type = #tpu.core_type<tc>, window_params = [{transform_indices = @transform_0, window_bounds = array<i64: 1, 18, 64>}, {pipeline_mode = #tpu.pipeline_mode<synchronous>, transform_indices = @transform_1, window_bounds = array<i64: 3, 64, 512>}, {pipeline_mode = #tpu.pipeline_mode<synchronous>, transform_indices = @transform_2, window_bounds = array<i64: 1, 512>}, {transform_indices = @transform_3, window_bounds = array<i64: 1, 16, 512>}, {transform_indices = @transform_4, window_bounds = array<i64: 1, 2, 512>}]} {
    %c0 = arith.constant 0 : index
    %c0_0 = arith.constant 0 : index
    %c0_1 = arith.constant 0 : index
    %0 = vector.load %arg1[%c0, %c0_0, %c0_1] : memref<1x18x64xf32, #tpu.memory_space<vmem>>, vector<1x16x64xf32>
    %1 = vector.shape_cast %0 : vector<1x16x64xf32> to vector<16x64xf32>
    %c0_2 = arith.constant 0 : index
    %c0_3 = arith.constant 0 : index
    %c0_4 = arith.constant 0 : index
    %2 = vector.load %arg2[%c0_2, %c0_3, %c0_4] : memref<3x64x512xf32, #tpu.memory_space<vmem>>, vector<1x64x512xf32>
    %3 = vector.shape_cast %2 : vector<1x64x512xf32> to vector<64x512xf32>
    %cst = arith.constant dense<0.000000e+00> : vector<16x512xf32>
    %4 = tpu.matmul %1, %3, %cst {dimension_numbers = #tpu.dot_dimension_numbers<[1], [0], [0], [1], [0, 0, 1, 1], [], []>} : vector<16x64xf32>, vector<64x512xf32>, vector<16x512xf32> -> vector<16x512xf32>
    %c0_5 = arith.constant 0 : index
    %c1 = arith.constant 1 : index
    %c0_6 = arith.constant 0 : index
    %5 = vector.load %arg1[%c0_5, %c1, %c0_6] : memref<1x18x64xf32, #tpu.memory_space<vmem>>, vector<1x16x64xf32>
    %6 = vector.shape_cast %5 : vector<1x16x64xf32> to vector<16x64xf32>
    %c1_7 = arith.constant 1 : index
    %c0_8 = arith.constant 0 : index
    %c0_9 = arith.constant 0 : index
    %7 = vector.load %arg2[%c1_7, %c0_8, %c0_9] : memref<3x64x512xf32, #tpu.memory_space<vmem>>, vector<1x64x512xf32>
    %8 = vector.shape_cast %7 : vector<1x64x512xf32> to vector<64x512xf32>
    %cst_10 = arith.constant dense<0.000000e+00> : vector<16x512xf32>
    %9 = tpu.matmul %6, %8, %cst_10 {dimension_numbers = #tpu.dot_dimension_numbers<[1], [0], [0], [1], [0, 0, 1, 1], [], []>} : vector<16x64xf32>, vector<64x512xf32>, vector<16x512xf32> -> vector<16x512xf32>
    %10 = arith.addf %4, %9 : vector<16x512xf32>
    %c0_11 = arith.constant 0 : index
    %c2 = arith.constant 2 : index
    %c0_12 = arith.constant 0 : index
    %11 = vector.load %arg1[%c0_11, %c2, %c0_12] : memref<1x18x64xf32, #tpu.memory_space<vmem>>, vector<1x16x64xf32>
    %12 = vector.shape_cast %11 : vector<1x16x64xf32> to vector<16x64xf32>
    %c2_13 = arith.constant 2 : index
    %c0_14 = arith.constant 0 : index
    %c0_15 = arith.constant 0 : index
    %13 = vector.load %arg2[%c2_13, %c0_14, %c0_15] : memref<3x64x512xf32, #tpu.memory_space<vmem>>, vector<1x64x512xf32>
    %14 = vector.shape_cast %13 : vector<1x64x512xf32> to vector<64x512xf32>
    %cst_16 = arith.constant dense<0.000000e+00> : vector<16x512xf32>
    %15 = tpu.matmul %12, %14, %cst_16 {dimension_numbers = #tpu.dot_dimension_numbers<[1], [0], [0], [1], [0, 0, 1, 1], [], []>} : vector<16x64xf32>, vector<64x512xf32>, vector<16x512xf32> -> vector<16x512xf32>
    %16 = arith.addf %10, %15 : vector<16x512xf32>
    %c0_17 = arith.constant 0 : index
    %c0_18 = arith.constant 0 : index
    %17 = vector.load %arg3[%c0_17, %c0_18] : memref<1x512xf32, #tpu.memory_space<vmem>>, vector<1x512xf32>
    %18 = vector.broadcast %17 : vector<1x512xf32> to vector<16x512xf32>
    %19 = arith.addf %16, %18 : vector<16x512xf32>
    %c0_19 = arith.constant 0 : index
    %c0_20 = arith.constant 0 : index
    %c0_21 = arith.constant 0 : index
    %20 = vector.load %arg4[%c0_19, %c0_20, %c0_21] : memref<1x16x512xf32, #tpu.memory_space<vmem>>, vector<1x16x512xf32>
    %21 = vector.shape_cast %20 : vector<1x16x512xf32> to vector<16x512xf32>
    %22 = vector.shape_cast %19 : vector<16x512xf32> to vector<1x16x512xf32>
    tpu.vector_store %arg4[%c0_19, %c0_20, %c0_21], %22 {strides = array<i32>} : memref<1x16x512xf32, #tpu.memory_space<vmem>>, vector<1x16x512xf32>,
    %cst_22 = arith.constant dense<0.000000e+00> : vector<512xf32>
    %23 = vector.multi_reduction <add>, %19, %cst_22 [0] : vector<16x512xf32> to vector<512xf32>
    %24 = vector.shape_cast %23 : vector<512xf32> to vector<1x512xf32>
    %25 = arith.mulf %19, %19 : vector<16x512xf32>
    %cst_23 = arith.constant dense<0.000000e+00> : vector<512xf32>
    %26 = vector.multi_reduction <add>, %25, %cst_23 [0] : vector<16x512xf32> to vector<512xf32>
    %27 = vector.shape_cast %26 : vector<512xf32> to vector<1x512xf32>
    %28 = tpu.concatenate %24, %27 in 0 : vector<1x512xf32>, vector<1x512xf32> -> vector<2x512xf32>
    %c0_24 = arith.constant 0 : index
    %c0_25 = arith.constant 0 : index
    %c0_26 = arith.constant 0 : index
    %29 = vector.load %arg5[%c0_24, %c0_25, %c0_26] : memref<1x2x512xf32, #tpu.memory_space<vmem>>, vector<1x2x512xf32>
    %30 = vector.shape_cast %29 : vector<1x2x512xf32> to vector<2x512xf32>
    %31 = vector.shape_cast %28 : vector<2x512xf32> to vector<1x2x512xf32>
    tpu.vector_store %arg5[%c0_24, %c0_25, %c0_26], %31 {strides = array<i32>} : memref<1x2x512xf32, #tpu.memory_space<vmem>>, vector<1x2x512xf32>,
    return
  }
  func.func @transform_0(%arg0: i32) -> (i32, i32, i32) {
    %c0_i32 = arith.constant 0 : i32
    %c0_i32_0 = arith.constant 0 : i32
    %c0_i32_1 = arith.constant 0 : i32
    return %arg0, %c0_i32, %c0_i32_0 : i32, i32, i32
  }
  func.func @transform_1(%arg0: i32) -> (i32, i32, i32) {
    %c0_i32 = arith.constant 0 : i32
    %c0_i32_0 = arith.constant 0 : i32
    %c0_i32_1 = arith.constant 0 : i32
    %c0_i32_2 = arith.constant 0 : i32
    return %c0_i32, %c0_i32_0, %c0_i32_1 : i32, i32, i32
  }
  func.func @transform_2(%arg0: i32) -> (i32, i32) {
    %c0_i32 = arith.constant 0 : i32
    %c0_i32_0 = arith.constant 0 : i32
    %c0_i32_1 = arith.constant 0 : i32
    return %c0_i32, %c0_i32_0 : i32, i32
  }
  func.func @transform_3(%arg0: i32) -> (i32, i32, i32) {
    %c0_i32 = arith.constant 0 : i32
    %c0_i32_0 = arith.constant 0 : i32
    %c0_i32_1 = arith.constant 0 : i32
    return %arg0, %c0_i32, %c0_i32_0 : i32, i32, i32
  }
  func.func @transform_4(%arg0: i32) -> (i32, i32, i32) {
    %c0_i32 = arith.constant 0 : i32
    %c0_i32_0 = arith.constant 0 : i32
    %c0_i32_1 = arith.constant 0 : i32
    return %arg0, %c0_i32, %c0_i32_0 : i32, i32, i32
  }
}

module attributes {stable_mosaic.version = 11 : i64} {
  func.func @bn_relu_conv2_kernel(%arg0: i32, %arg1: memref<1x16x512xf32, #tpu.memory_space<vmem>>, %arg2: memref<1x512xf32, #tpu.memory_space<vmem>>, %arg3: memref<1x512xf32, #tpu.memory_space<vmem>>, %arg4: memref<3x512x512xf32, #tpu.memory_space<vmem>>, %arg5: memref<1x512xf32, #tpu.memory_space<vmem>>, %arg6: memref<1x16x512xf32, #tpu.memory_space<vmem>>, %arg7: memref<1x2x512xf32, #tpu.memory_space<vmem>>, %arg8: memref<18x512xf32, #tpu.memory_space<vmem>>) attributes {dimension_semantics = [#tpu.dimension_semantics<parallel>], iteration_bounds = array<i64: 2>, scalar_prefetch = 0 : i64, scratch_operands = 1 : i64, tpu.core_type = #tpu.core_type<tc>, window_params = [{transform_indices = @transform_0, window_bounds = array<i64: 1, 16, 512>}, {pipeline_mode = #tpu.pipeline_mode<synchronous>, transform_indices = @transform_1, window_bounds = array<i64: 1, 512>}, {pipeline_mode = #tpu.pipeline_mode<synchronous>, transform_indices = @transform_2, window_bounds = array<i64: 1, 512>}, {pipeline_mode = #tpu.pipeline_mode<synchronous>, transform_indices = @transform_3, window_bounds = array<i64: 3, 512, 512>}, {pipeline_mode = #tpu.pipeline_mode<synchronous>, transform_indices = @transform_4, window_bounds = array<i64: 1, 512>}, {transform_indices = @transform_5, window_bounds = array<i64: 1, 16, 512>}, {transform_indices = @transform_6, window_bounds = array<i64: 1, 2, 512>}]} {
    %cst = arith.constant 0.000000e+00 : f32
    %0 = vector.broadcast %cst : f32 to vector<1x512xf32>
    %c0 = arith.constant 0 : index
    %c0_0 = arith.constant 0 : index
    %1 = vector.load %arg8[%c0, %c0_0] : memref<18x512xf32, #tpu.memory_space<vmem>>, vector<1x512xf32>
    tpu.vector_store %arg8[%c0, %c0_0], %0 {strides = array<i32>} : memref<18x512xf32, #tpu.memory_space<vmem>>, vector<1x512xf32>,
    %cst_1 = arith.constant 0.000000e+00 : f32
    %2 = vector.broadcast %cst_1 : f32 to vector<1x512xf32>
    %c17 = arith.constant 17 : index
    %c0_2 = arith.constant 0 : index
    %3 = vector.load %arg8[%c17, %c0_2] : memref<18x512xf32, #tpu.memory_space<vmem>>, vector<1x512xf32>
    tpu.vector_store %arg8[%c17, %c0_2], %2 {strides = array<i32>} : memref<18x512xf32, #tpu.memory_space<vmem>>, vector<1x512xf32>,
    %c0_3 = arith.constant 0 : index
    %c0_4 = arith.constant 0 : index
    %c0_5 = arith.constant 0 : index
    %4 = vector.load %arg1[%c0_3, %c0_4, %c0_5] : memref<1x16x512xf32, #tpu.memory_space<vmem>>, vector<1x16x512xf32>
    %5 = vector.shape_cast %4 : vector<1x16x512xf32> to vector<16x512xf32>
    %c0_6 = arith.constant 0 : index
    %c0_7 = arith.constant 0 : index
    %6 = vector.load %arg2[%c0_6, %c0_7] : memref<1x512xf32, #tpu.memory_space<vmem>>, vector<1x512xf32>
    %7 = vector.broadcast %6 : vector<1x512xf32> to vector<16x512xf32>
    %8 = arith.mulf %5, %7 : vector<16x512xf32>
    %c0_8 = arith.constant 0 : index
    %c0_9 = arith.constant 0 : index
    %9 = vector.load %arg3[%c0_8, %c0_9] : memref<1x512xf32, #tpu.memory_space<vmem>>, vector<1x512xf32>
    %10 = vector.broadcast %9 : vector<1x512xf32> to vector<16x512xf32>
    %11 = arith.addf %8, %10 : vector<16x512xf32>
    %cst_10 = arith.constant 0.000000e+00 : f32
    %12 = vector.broadcast %cst_10 : f32 to vector<16x512xf32>
    %13 = arith.maximumf %11, %12 : vector<16x512xf32>
    %c1 = arith.constant 1 : index
    %c0_11 = arith.constant 0 : index
    %14 = vector.load %arg8[%c1, %c0_11] : memref<18x512xf32, #tpu.memory_space<vmem>>, vector<16x512xf32>
    tpu.vector_store %arg8[%c1, %c0_11], %13 {strides = array<i32>} : memref<18x512xf32, #tpu.memory_space<vmem>>, vector<16x512xf32>,
    %c0_12 = arith.constant 0 : index
    %c0_13 = arith.constant 0 : index
    %15 = vector.load %arg8[%c0_12, %c0_13] : memref<18x512xf32, #tpu.memory_space<vmem>>, vector<16x512xf32>
    %c0_14 = arith.constant 0 : index
    %c0_15 = arith.constant 0 : index
    %c0_16 = arith.constant 0 : index
    %16 = vector.load %arg4[%c0_14, %c0_15, %c0_16] : memref<3x512x512xf32, #tpu.memory_space<vmem>>, vector<1x512x512xf32>
    %17 = vector.shape_cast %16 : vector<1x512x512xf32> to vector<512x512xf32>
    %cst_17 = arith.constant dense<0.000000e+00> : vector<16x512xf32>
    %18 = tpu.matmul %15, %17, %cst_17 {dimension_numbers = #tpu.dot_dimension_numbers<[1], [0], [0], [1], [0, 0, 1, 1], [], []>} : vector<16x512xf32>, vector<512x512xf32>, vector<16x512xf32> -> vector<16x512xf32>
    %c1_18 = arith.constant 1 : index
    %c0_19 = arith.constant 0 : index
    %19 = vector.load %arg8[%c1_18, %c0_19] : memref<18x512xf32, #tpu.memory_space<vmem>>, vector<16x512xf32>
    %c1_20 = arith.constant 1 : index
    %c0_21 = arith.constant 0 : index
    %c0_22 = arith.constant 0 : index
    %20 = vector.load %arg4[%c1_20, %c0_21, %c0_22] : memref<3x512x512xf32, #tpu.memory_space<vmem>>, vector<1x512x512xf32>
    %21 = vector.shape_cast %20 : vector<1x512x512xf32> to vector<512x512xf32>
    %cst_23 = arith.constant dense<0.000000e+00> : vector<16x512xf32>
    %22 = tpu.matmul %19, %21, %cst_23 {dimension_numbers = #tpu.dot_dimension_numbers<[1], [0], [0], [1], [0, 0, 1, 1], [], []>} : vector<16x512xf32>, vector<512x512xf32>, vector<16x512xf32> -> vector<16x512xf32>
    %23 = arith.addf %18, %22 : vector<16x512xf32>
    %c2 = arith.constant 2 : index
    %c0_24 = arith.constant 0 : index
    %24 = vector.load %arg8[%c2, %c0_24] : memref<18x512xf32, #tpu.memory_space<vmem>>, vector<16x512xf32>
    %c2_25 = arith.constant 2 : index
    %c0_26 = arith.constant 0 : index
    %c0_27 = arith.constant 0 : index
    %25 = vector.load %arg4[%c2_25, %c0_26, %c0_27] : memref<3x512x512xf32, #tpu.memory_space<vmem>>, vector<1x512x512xf32>
    %26 = vector.shape_cast %25 : vector<1x512x512xf32> to vector<512x512xf32>
    %cst_28 = arith.constant dense<0.000000e+00> : vector<16x512xf32>
    %27 = tpu.matmul %24, %26, %cst_28 {dimension_numbers = #tpu.dot_dimension_numbers<[1], [0], [0], [1], [0, 0, 1, 1], [], []>} : vector<16x512xf32>, vector<512x512xf32>, vector<16x512xf32> -> vector<16x512xf32>
    %28 = arith.addf %23, %27 : vector<16x512xf32>
    %c0_29 = arith.constant 0 : index
    %c0_30 = arith.constant 0 : index
    %29 = vector.load %arg5[%c0_29, %c0_30] : memref<1x512xf32, #tpu.memory_space<vmem>>, vector<1x512xf32>
    %30 = vector.broadcast %29 : vector<1x512xf32> to vector<16x512xf32>
    %31 = arith.addf %28, %30 : vector<16x512xf32>
    %c0_31 = arith.constant 0 : index
    %c0_32 = arith.constant 0 : index
    %c0_33 = arith.constant 0 : index
    %32 = vector.load %arg6[%c0_31, %c0_32, %c0_33] : memref<1x16x512xf32, #tpu.memory_space<vmem>>, vector<1x16x512xf32>
    %33 = vector.shape_cast %32 : vector<1x16x512xf32> to vector<16x512xf32>
    %34 = vector.shape_cast %31 : vector<16x512xf32> to vector<1x16x512xf32>
    tpu.vector_store %arg6[%c0_31, %c0_32, %c0_33], %34 {strides = array<i32>} : memref<1x16x512xf32, #tpu.memory_space<vmem>>, vector<1x16x512xf32>,
    %cst_34 = arith.constant dense<0.000000e+00> : vector<512xf32>
    %35 = vector.multi_reduction <add>, %31, %cst_34 [0] : vector<16x512xf32> to vector<512xf32>
    %36 = vector.shape_cast %35 : vector<512xf32> to vector<1x512xf32>
    %37 = arith.mulf %31, %31 : vector<16x512xf32>
    %cst_35 = arith.constant dense<0.000000e+00> : vector<512xf32>
    %38 = vector.multi_reduction <add>, %37, %cst_35 [0] : vector<16x512xf32> to vector<512xf32>
    %39 = vector.shape_cast %38 : vector<512xf32> to vector<1x512xf32>
    %40 = tpu.concatenate %36, %39 in 0 : vector<1x512xf32>, vector<1x512xf32> -> vector<2x512xf32>
    %c0_36 = arith.constant 0 : index
    %c0_37 = arith.constant 0 : index
    %c0_38 = arith.constant 0 : index
    %41 = vector.load %arg7[%c0_36, %c0_37, %c0_38] : memref<1x2x512xf32, #tpu.memory_space<vmem>>, vector<1x2x512xf32>
    %42 = vector.shape_cast %41 : vector<1x2x512xf32> to vector<2x512xf32>
    %43 = vector.shape_cast %40 : vector<2x512xf32> to vector<1x2x512xf32>
    tpu.vector_store %arg7[%c0_36, %c0_37, %c0_38], %43 {strides = array<i32>} : memref<1x2x512xf32, #tpu.memory_space<vmem>>, vector<1x2x512xf32>,
    return
  }
  func.func @transform_0(%arg0: i32) -> (i32, i32, i32) {
    %c0_i32 = arith.constant 0 : i32
    %c0_i32_0 = arith.constant 0 : i32
    %c0_i32_1 = arith.constant 0 : i32
    return %arg0, %c0_i32, %c0_i32_0 : i32, i32, i32
  }
  func.func @transform_1(%arg0: i32) -> (i32, i32) {
    %c0_i32 = arith.constant 0 : i32
    %c0_i32_0 = arith.constant 0 : i32
    %c0_i32_1 = arith.constant 0 : i32
    return %c0_i32, %c0_i32_0 : i32, i32
  }
  func.func @transform_2(%arg0: i32) -> (i32, i32) {
    %c0_i32 = arith.constant 0 : i32
    %c0_i32_0 = arith.constant 0 : i32
    %c0_i32_1 = arith.constant 0 : i32
    return %c0_i32, %c0_i32_0 : i32, i32
  }
  func.func @transform_3(%arg0: i32) -> (i32, i32, i32) {
    %c0_i32 = arith.constant 0 : i32
    %c0_i32_0 = arith.constant 0 : i32
    %c0_i32_1 = arith.constant 0 : i32
    %c0_i32_2 = arith.constant 0 : i32
    return %c0_i32, %c0_i32_0, %c0_i32_1 : i32, i32, i32
  }
  func.func @transform_4(%arg0: i32) -> (i32, i32) {
    %c0_i32 = arith.constant 0 : i32
    %c0_i32_0 = arith.constant 0 : i32
    %c0_i32_1 = arith.constant 0 : i32
    return %c0_i32, %c0_i32_0 : i32, i32
  }
  func.func @transform_5(%arg0: i32) -> (i32, i32, i32) {
    %c0_i32 = arith.constant 0 : i32
    %c0_i32_0 = arith.constant 0 : i32
    %c0_i32_1 = arith.constant 0 : i32
    return %arg0, %c0_i32, %c0_i32_0 : i32, i32, i32
  }
  func.func @transform_6(%arg0: i32) -> (i32, i32, i32) {
    %c0_i32 = arith.constant 0 : i32
    %c0_i32_0 = arith.constant 0 : i32
    %c0_i32_1 = arith.constant 0 : i32
    return %arg0, %c0_i32, %c0_i32_0 : i32, i32, i32
  }
}

module attributes {stable_mosaic.version = 11 : i64} {
  func.func @bn_relu_se_kernel(%arg0: i32, %arg1: memref<1x16x512xf32, #tpu.memory_space<vmem>>, %arg2: memref<1x512xf32, #tpu.memory_space<vmem>>, %arg3: memref<1x512xf32, #tpu.memory_space<vmem>>, %arg4: memref<512x32xf32, #tpu.memory_space<vmem>>, %arg5: memref<32x2xf32, #tpu.memory_space<vmem>>, %arg6: memref<2x32xf32, #tpu.memory_space<vmem>>, %arg7: memref<32x512xf32, #tpu.memory_space<vmem>>, %arg8: memref<1x16x512xf32, #tpu.memory_space<vmem>>) attributes {dimension_semantics = [#tpu.dimension_semantics<parallel>], iteration_bounds = array<i64: 2>, scalar_prefetch = 0 : i64, scratch_operands = 0 : i64, tpu.core_type = #tpu.core_type<tc>, window_params = [{transform_indices = @transform_0, window_bounds = array<i64: 1, 16, 512>}, {pipeline_mode = #tpu.pipeline_mode<synchronous>, transform_indices = @transform_1, window_bounds = array<i64: 1, 512>}, {pipeline_mode = #tpu.pipeline_mode<synchronous>, transform_indices = @transform_2, window_bounds = array<i64: 1, 512>}, {pipeline_mode = #tpu.pipeline_mode<synchronous>, transform_indices = @transform_3, window_bounds = array<i64: 512, 32>}, {pipeline_mode = #tpu.pipeline_mode<synchronous>, transform_indices = @transform_4, window_bounds = array<i64: 32, 2>}, {pipeline_mode = #tpu.pipeline_mode<synchronous>, transform_indices = @transform_5, window_bounds = array<i64: 2, 32>}, {pipeline_mode = #tpu.pipeline_mode<synchronous>, transform_indices = @transform_6, window_bounds = array<i64: 32, 512>}, {transform_indices = @transform_7, window_bounds = array<i64: 1, 16, 512>}]} {
    %c0 = arith.constant 0 : index
    %c0_0 = arith.constant 0 : index
    %c0_1 = arith.constant 0 : index
    %0 = vector.load %arg1[%c0, %c0_0, %c0_1] : memref<1x16x512xf32, #tpu.memory_space<vmem>>, vector<1x16x512xf32>
    %1 = vector.shape_cast %0 : vector<1x16x512xf32> to vector<16x512xf32>
    %c0_2 = arith.constant 0 : index
    %c0_3 = arith.constant 0 : index
    %2 = vector.load %arg2[%c0_2, %c0_3] : memref<1x512xf32, #tpu.memory_space<vmem>>, vector<1x512xf32>
    %3 = vector.broadcast %2 : vector<1x512xf32> to vector<16x512xf32>
    %4 = arith.mulf %1, %3 : vector<16x512xf32>
    %c0_4 = arith.constant 0 : index
    %c0_5 = arith.constant 0 : index
    %5 = vector.load %arg3[%c0_4, %c0_5] : memref<1x512xf32, #tpu.memory_space<vmem>>, vector<1x512xf32>
    %6 = vector.broadcast %5 : vector<1x512xf32> to vector<16x512xf32>
    %7 = arith.addf %4, %6 : vector<16x512xf32>
    %cst = arith.constant 0.000000e+00 : f32
    %8 = vector.broadcast %cst : f32 to vector<16x512xf32>
    %9 = arith.maximumf %7, %8 : vector<16x512xf32>
    %cst_6 = arith.constant dense<0.000000e+00> : vector<512xf32>
    %10 = vector.multi_reduction <add>, %9, %cst_6 [0] : vector<16x512xf32> to vector<512xf32>
    %11 = vector.shape_cast %10 : vector<512xf32> to vector<1x512xf32>
    %c0_7 = arith.constant 0 : index
    %c0_8 = arith.constant 0 : index
    %12 = vector.load %arg4[%c0_7, %c0_8] : memref<512x32xf32, #tpu.memory_space<vmem>>, vector<512x32xf32>
    %cst_9 = arith.constant dense<0.000000e+00> : vector<1x32xf32>
    %13 = tpu.matmul %11, %12, %cst_9 {dimension_numbers = #tpu.dot_dimension_numbers<[1], [0], [0], [1], [0, 0, 1, 1], [], []>} : vector<1x512xf32>, vector<512x32xf32>, vector<1x32xf32> -> vector<1x32xf32>
    %c0_10 = arith.constant 0 : index
    %c0_11 = arith.constant 0 : index
    %14 = vector.load %arg5[%c0_10, %c0_11] : memref<32x2xf32, #tpu.memory_space<vmem>>, vector<32x2xf32>
    %cst_12 = arith.constant dense<0.000000e+00> : vector<1x2xf32>
    %15 = tpu.matmul %13, %14, %cst_12 {dimension_numbers = #tpu.dot_dimension_numbers<[1], [0], [0], [1], [0, 0, 1, 1], [], []>} : vector<1x32xf32>, vector<32x2xf32>, vector<1x2xf32> -> vector<1x2xf32>
    %cst_13 = arith.constant 0.000000e+00 : f32
    %16 = vector.broadcast %cst_13 : f32 to vector<1x2xf32>
    %17 = arith.maximumf %15, %16 : vector<1x2xf32>
    %c0_14 = arith.constant 0 : index
    %c0_15 = arith.constant 0 : index
    %18 = vector.load %arg6[%c0_14, %c0_15] : memref<2x32xf32, #tpu.memory_space<vmem>>, vector<2x32xf32>
    %cst_16 = arith.constant dense<0.000000e+00> : vector<1x32xf32>
    %19 = tpu.matmul %17, %18, %cst_16 {dimension_numbers = #tpu.dot_dimension_numbers<[1], [0], [0], [1], [0, 0, 1, 1], [], []>} : vector<1x2xf32>, vector<2x32xf32>, vector<1x32xf32> -> vector<1x32xf32>
    %20 = arith.negf %19 : vector<1x32xf32>
    %21 = math.exp %20 : vector<1x32xf32>
    %cst_17 = arith.constant 1.000000e+00 : f32
    %22 = vector.broadcast %cst_17 : f32 to vector<1x32xf32>
    %23 = arith.addf %22, %21 : vector<1x32xf32>
    %24 = arith.divf %22, %23 : vector<1x32xf32>
    %c0_18 = arith.constant 0 : index
    %c0_19 = arith.constant 0 : index
    %25 = vector.load %arg7[%c0_18, %c0_19] : memref<32x512xf32, #tpu.memory_space<vmem>>, vector<32x512xf32>
    %cst_20 = arith.constant dense<0.000000e+00> : vector<1x512xf32>
    %26 = tpu.matmul %24, %25, %cst_20 {dimension_numbers = #tpu.dot_dimension_numbers<[1], [0], [0], [1], [0, 0, 1, 1], [], []>} : vector<1x32xf32>, vector<32x512xf32>, vector<1x512xf32> -> vector<1x512xf32>
    %27 = vector.broadcast %26 : vector<1x512xf32> to vector<16x512xf32>
    %28 = arith.mulf %9, %27 : vector<16x512xf32>
    %c0_21 = arith.constant 0 : index
    %c0_22 = arith.constant 0 : index
    %c0_23 = arith.constant 0 : index
    %29 = vector.load %arg8[%c0_21, %c0_22, %c0_23] : memref<1x16x512xf32, #tpu.memory_space<vmem>>, vector<1x16x512xf32>
    %30 = vector.shape_cast %29 : vector<1x16x512xf32> to vector<16x512xf32>
    %31 = vector.shape_cast %28 : vector<16x512xf32> to vector<1x16x512xf32>
    tpu.vector_store %arg8[%c0_21, %c0_22, %c0_23], %31 {strides = array<i32>} : memref<1x16x512xf32, #tpu.memory_space<vmem>>, vector<1x16x512xf32>,
    return
  }
  func.func @transform_0(%arg0: i32) -> (i32, i32, i32) {
    %c0_i32 = arith.constant 0 : i32
    %c0_i32_0 = arith.constant 0 : i32
    %c0_i32_1 = arith.constant 0 : i32
    return %arg0, %c0_i32, %c0_i32_0 : i32, i32, i32
  }
  func.func @transform_1(%arg0: i32) -> (i32, i32) {
    %c0_i32 = arith.constant 0 : i32
    %c0_i32_0 = arith.constant 0 : i32
    %c0_i32_1 = arith.constant 0 : i32
    return %c0_i32, %c0_i32_0 : i32, i32
  }
  func.func @transform_2(%arg0: i32) -> (i32, i32) {
    %c0_i32 = arith.constant 0 : i32
    %c0_i32_0 = arith.constant 0 : i32
    %c0_i32_1 = arith.constant 0 : i32
    return %c0_i32, %c0_i32_0 : i32, i32
  }
  func.func @transform_3(%arg0: i32) -> (i32, i32) {
    %c0_i32 = arith.constant 0 : i32
    %c0_i32_0 = arith.constant 0 : i32
    %c0_i32_1 = arith.constant 0 : i32
    return %c0_i32, %c0_i32_0 : i32, i32
  }
  func.func @transform_4(%arg0: i32) -> (i32, i32) {
    %c0_i32 = arith.constant 0 : i32
    %c0_i32_0 = arith.constant 0 : i32
    %c0_i32_1 = arith.constant 0 : i32
    return %c0_i32, %c0_i32_0 : i32, i32
  }
  func.func @transform_5(%arg0: i32) -> (i32, i32) {
    %c0_i32 = arith.constant 0 : i32
    %c0_i32_0 = arith.constant 0 : i32
    %c0_i32_1 = arith.constant 0 : i32
    return %c0_i32, %c0_i32_0 : i32, i32
  }
  func.func @transform_6(%arg0: i32) -> (i32, i32) {
    %c0_i32 = arith.constant 0 : i32
    %c0_i32_0 = arith.constant 0 : i32
    %c0_i32_1 = arith.constant 0 : i32
    return %c0_i32, %c0_i32_0 : i32, i32
  }
  func.func @transform_7(%arg0: i32) -> (i32, i32, i32) {
    %c0_i32 = arith.constant 0 : i32
    %c0_i32_0 = arith.constant 0 : i32
    %c0_i32_1 = arith.constant 0 : i32
    return %arg0, %c0_i32, %c0_i32_0 : i32, i32, i32
  }
}

</mosaic_0001>

<bundles_post_ra>
// kernel: decoder_block_forward.3
= control target key start
LH: loop header
LB: loop body
LE: loop exit
PB: predicated region body
PF: predicated region fallthrough
CT: control target
= control target key end

     0   :  { %s1270_s15 = smov 0   ;;  %s1652_s0 = inlined_call_operand.vmem [shape: f32[2,18,64], index: 0, kind: input, shape index: {}]   ;;  %s1653_s1 = inlined_call_operand.vmem [shape: f32[3,64,512], index: 1, kind: input, shape index: {}]   ;;  %s1654_s2 = inlined_call_operand.vmem [shape: f32[1,512], index: 2, kind: input, shape index: {}]   ;;  %s1655_s3 = inlined_call_operand.vmem [shape: f32[2,16,512], index: 3, kind: output, shape index: {0}]   ;;  %s1656_s4 = inlined_call_operand.vmem [shape: f32[2,2,512], index: 4, kind: output, shape index: {1}]  }
   0x1 LB: > { %s1022_s16 = sadd.s32 4294967295, %s1241_s15   ;;  %p1026_p0 = scmp.ge.s32.totalorder %s1241_s15, 1  ;;  %s1241_s15 = sphi %s1270_s15, %s15_s15  }
   0x2   : > { %p165_p1 = scmp.lt.s32.totalorder %s1241_s15, 3 }
   0x4   : > { %p166_p2 = pnand %p1026_p0, %p165_p1 }
   0x5   : > { %v1033_v0 = vld [vmem:[%s1653_s1 + $0x108] sm:$0xff] (!%p166_p2)  ;;  %v1035_v2 = vld [vmem:[%s1653_s1 + $0x118] sm:$0xff] (!%p166_p2)  ;;  %v1032_v5 = vld [vmem:[%s1653_s1 + $0x100] sm:$0xff] (!%p166_p2)  ;;  %v1243_v7 = vmov (!%p166_p2), 0.0   ;;  %p1300_p3 = scmp.lt.s32.totalorder (!%p166_p2), %s1022_s16, 1  ;;  %vm280_vm0 = vcmask (!%p166_p2), 523264  }
   0x6   : > { %169 = sbr.rel (%p166_p2) target bundleno = 302 (0x12e), region = 32  ;;  %v1037_v1 = vld [vmem:[%s1653_s1 + $0x128] sm:$0xff] (!%p166_p2)  ;;  %v1039_v4 = vld [vmem:[%s1653_s1 + $0x138] sm:$0xff] (!%p166_p2)  ;;  %v1036_v6 = vld [vmem:[%s1653_s1 + $0x120] sm:$0xff] (!%p166_p2)  ;;  %351 = vmatprep.mubr.f32.mxu0 (!%p166_p2), %v1243_v7  ;;  %428 = vmatprep.mubr.f32.mxu1 (!%p166_p2), %v1243_v7  ;;  %vm906_vm1 = vcmask (!%p166_p2), 1040384  }
   0x7   : > { %v1112_v3 = vpack.c.bf16 (!%p166_p2), %v1037_v1, %v1033_v0  ;;  %v1128_v8 = vpack.c.bf16 (!%p166_p2), %v1039_v4, %v1035_v2  ;;  %v1114_v9 = vpack.c.bf16 (!%p166_p2), %v1036_v6, %v1032_v5  ;;  %v1034_v10 = vld [vmem:[%s1653_s1 + $0x110] sm:$0xff] (!%p166_p2)  ;;  %v1041_v12 = vld [vmem:[%s1653_s1 + $0x148] sm:$0xff] (!%p166_p2)  ;;  %v1043_v15 = vld [vmem:[%s1653_s1 + $0x158] sm:$0xff] (!%p166_p2) }
   0x8   : > { %v1038_v11 = vld [vmem:[%s1653_s1 + $0x130] sm:$0xff] (!%p166_p2)  ;;  %v1045_v14 = vld [vmem:[%s1653_s1 + $0x168] sm:$0xff] (!%p166_p2)  ;;  %v1047_v16 = vld [vmem:[%s1653_s1 + $0x178] sm:$0xff] (!%p166_p2) }
   0x9   : > { %1113 = vmatprep.subr.bf16.mxu0 (!%p166_p2), %v1112_v3  ;;  %v1130_v13 = vpack.c.bf16 (!%p166_p2), %v1038_v11, %v1034_v10  ;;  %1129 = vmatprep.subr.bf16.mxu1 (!%p166_p2), %v1128_v8  ;;  %v1116_v17 = vpack.c.bf16 (!%p166_p2), %v1045_v14, %v1041_v12  ;;  %v1132_v18 = vpack.c.bf16 (!%p166_p2), %v1047_v16, %v1043_v15  ;;  %v1040_v19 = vld [vmem:[%s1653_s1 + $0x140] sm:$0xff] (!%p166_p2)  ;;  %v1042_v21 = vld [vmem:[%s1653_s1 + $0x150] sm:$0xff] (!%p166_p2)  ;;  %v1049_v24 = vld [vmem:[%s1653_s1 + $0x188] sm:$0xff] (!%p166_p2) }
   0xa   : > { %1115 = vmatpush1.bf16.msra.mxu0 (!%p166_p2), %v1114_v9  ;;  %v1044_v20 = vld [vmem:[%s1653_s1 + $0x160] sm:$0xff] (!%p166_p2)  ;;  %v1046_v23 = vld [vmem:[%s1653_s1 + $0x170] sm:$0xff] (!%p166_p2)  ;;  %v1053_v25 = vld [vmem:[%s1653_s1 + $0x1a8] sm:$0xff] (!%p166_p2) }
   0xb   : > { %1131 = vmatpush1.bf16.msra.mxu1 (!%p166_p2), %v1130_v13  ;;  %v1118_v22 = vpack.c.bf16 (!%p166_p2), %v1044_v20, %v1040_v19  ;;  %1117 = vmatprep.subr.bf16.mxu0 (!%p166_p2), %v1116_v17  ;;  %v1134_v26 = vpack.c.bf16 (!%p166_p2), %v1046_v23, %v1042_v21  ;;  %v1120_v27 = vpack.c.bf16 (!%p166_p2), %v1053_v25, %v1049_v24  ;;  %v1051_v28 = vld [vmem:[%s1653_s1 + $0x198] sm:$0xff] (!%p166_p2)  ;;  %v1048_v30 = vld [vmem:[%s1653_s1 + $0x180] sm:$0xff] (!%p166_p2)  ;;  %v1050_v33 = vld [vmem:[%s1653_s1 + $0x190] sm:$0xff] (!%p166_p2) }
   0xc   : > { %1133 = vmatprep.subr.bf16.mxu1 (!%p166_p2), %v1132_v18  ;;  %v1055_v29 = vld [vmem:[%s1653_s1 + $0x1b8] sm:$0xff] (!%p166_p2)  ;;  %v1052_v32 = vld [vmem:[%s1653_s1 + $0x1a0] sm:$0xff] (!%p166_p2)  ;;  %v1054_v34 = vld [vmem:[%s1653_s1 + $0x1b0] sm:$0xff] (!%p166_p2) }
   0xd   : > { %s1659_s16 = smov (!%p1300_p3, %s1022_s16), 1  ;;  %v1136_v31 = vpack.c.bf16 %v1055_v29, %v1051_v28  ;;  %v1122_v35 = vpack.c.bf16 %v1052_v32, %v1048_v30  ;;  %v1057_v36 = vld [vmem:[%s1653_s1 + $0x1c8] sm:$0xff]  ;;  %v1059_v38 = vld [vmem:[%s1653_s1 + $0x1d8] sm:$0xff]  ;;  %v1138_v39 = vpack.c.bf16 %v1054_v34, %v1050_v33  ;;  %v1056_v42 = vld [vmem:[%s1653_s1 + $0x1c0] sm:$0xff] }
   0xe   : > { %1119 = vmatpush1.bf16.msra.mxu0 %v1118_v22  ;;  %v1061_v37 = vld [vmem:[%s1653_s1 + $0x1e8] sm:$0xff]  ;;  %v1063_v41 = vld [vmem:[%s1653_s1 + $0x1f8] sm:$0xff]  ;;  %v1060_v43 = vld [vmem:[%s1653_s1 + $0x1e0] sm:$0xff]  ;;  %s1224_s5 = smul.u32 24, %s1659_s16  ;;  %s1111_s7 = sshll.u32 %s1659_s16, 3 }
   0xf   : > { %1135 = vmatpush1.bf16.msra.mxu1 %v1134_v26  ;;  %1121 = vmatprep.subr.bf16.mxu0 %v1120_v27  ;;  %v1124_v40 = vpack.c.bf16 %v1061_v37, %v1057_v36  ;;  %v1140_v44 = vpack.c.bf16 %v1063_v41, %v1059_v38  ;;  %v1058_v45 = vld [vmem:[%s1653_s1 + $0x1d0] sm:$0xff]  ;;  %v214_v47 = vld [vmem:[%s1653_s1 + $0x8] sm:$0xff]  ;;  %v216_v49 = vld [vmem:[%s1653_s1 + $0x18] sm:$0xff]  ;;  %v1126_v51 = vpack.c.bf16 %v1060_v43, %v1056_v42  ;;  %s210_s10 = scalar_lea.vmem %s1656_s4, %s1111_s7 }
  0x10   : > { %1137 = vmatprep.subr.bf16.mxu1 %v1136_v31  ;;  %v1062_v46 = vld [vmem:[%s1653_s1 + $0x1f0] sm:$0xff]  ;;  %v218_v48 = vld [vmem:[%s1653_s1 + $0x28] sm:$0xff]  ;;  %v220_v50 = vld [vmem:[%s1653_s1 + $0x38] sm:$0xff]  ;;  %s1404_s21 = scalar_lea.vmem %s1652_s0, %s1224_s5 }
  0x11   : > { %v1142_v52 = vpack.c.bf16 %v1062_v46, %v1058_v45  ;;  %v1144_v53 = vpack.c.bf16 %v218_v48, %v214_v47  ;;  %v213_v54 = vld [vmem:[%s1653_s1] sm:$0xff]  ;;  %v215_v56 = vld [vmem:[%s1653_s1 + $0x10] sm:$0xff]  ;;  %v1160_v57 = vpack.c.bf16 %v220_v50, %v216_v49  ;;  %v222_v59 = vld [vmem:[%s1653_s1 + $0x48] sm:$0xff] }
  0x12   : > { %1123 = vmatpush1.bf16.msra.mxu0 %v1122_v35  ;;  %v217_v55 = vld [vmem:[%s1653_s1 + $0x20] sm:$0xff]  ;;  %v219_v58 = vld [vmem:[%s1653_s1 + $0x30] sm:$0xff]  ;;  %v226_v60 = vld [vmem:[%s1653_s1 + $0x68] sm:$0xff] }
  0x13   : > { %1139 = vmatpush1.bf16.msra.mxu1 %v1138_v39  ;;  %1125 = vmatprep.subr.bf16.mxu0 %v1124_v40  ;;  %v224_v61 = vld [vmem:[%s1653_s1 + $0x58] sm:$0xff]  ;;  %v245_v63 = vld [vmem:[%s1404_s21 + $0x1] sm:$0xff]  ;;  %v1146_v0 = vpack.c.bf16 %v217_v55, %v213_v54  ;;  %v1162_v1 = vpack.c.bf16 %v219_v58, %v215_v56  ;;  %v1148_v2 = vpack.c.bf16 %v226_v60, %v222_v59  ;;  %v223_v5 = vld [vmem:[%s1653_s1 + $0x50] sm:$0xff] }
  0x14   : > { %1141 = vmatprep.subr.bf16.mxu1 %v1140_v44  ;;  %v228_v62 = vld [vmem:[%s1653_s1 + $0x78] sm:$0xff]  ;;  %v221_v3 = vld [vmem:[%s1653_s1 + $0x40] sm:$0xff]  ;;  %v227_v8 = vld [vmem:[%s1653_s1 + $0x70] sm:$0xff] }
  0x15   : > { %v225_v4 = vld [vmem:[%s1653_s1 + $0x60] sm:$0xff]  ;;  %v1164_v6 = vpack.c.bf16 %v228_v62, %v224_v61  ;;  %v230_v9 = vld [vmem:[%s1653_s1 + $0x88] sm:$0xff]  ;;  %v232_v11 = vld [vmem:[%s1653_s1 + $0x98] sm:$0xff]  ;;  %v1166_v15 = vpack.c.bf16 %v227_v8, %v223_v5 }
  0x16   : > { %1127 = vmatpush1.bf16.msra.mxu0 %v1126_v51  ;;  %v234_v10 = vld [vmem:[%s1653_s1 + $0xa8] sm:$0xff]  ;;  %v236_v12 = vld [vmem:[%s1653_s1 + $0xb8] sm:$0xff]  ;;  %v1150_v13 = vpack.c.bf16 %v225_v4, %v221_v3  ;;  %v229_v17 = vld [vmem:[%s1653_s1 + $0x80] sm:$0xff] }
  0x17   : > { %1143 = vmatpush1.bf16.msra.mxu1 %v1142_v52  ;;  %1145 = vmatprep.subr.bf16.mxu0 %v1144_v53  ;;  %v246_v14 = vld [vmem:[%s1404_s21 + $0x9] sm:$0xff]  ;;  %v1152_v16 = vpack.c.bf16 %v234_v10, %v230_v9  ;;  %v233_v18 = vld [vmem:[%s1653_s1 + $0xa0] sm:$0xff]  ;;  %v1168_v20 = vpack.c.bf16 %v236_v12, %v232_v11  ;;  %v240_v24 = vld [vmem:[%s1653_s1 + $0xd8] sm:$0xff] }
  0x18   : > { %1161 = vmatprep.subr.bf16.mxu1 %v1160_v57  ;;  %v231_v19 = vld [vmem:[%s1653_s1 + $0x90] sm:$0xff]  ;;  %v238_v22 = vld [vmem:[%s1653_s1 + $0xc8] sm:$0xff]  ;;  %v244_v25 = vld [vmem:[%s1653_s1 + $0xf8] sm:$0xff]  ;;  %v1154_v26 = vpack.c.bf16 %v233_v18, %v229_v17 }
  0x19   : > { %1064 = vmatmul.mubr.msk.f32.vlgmr.msra.gmra.mrb[0].mxu0 %vm280_vm0, %v245_v63  ;;  %v235_v21 = vld [vmem:[%s1653_s1 + $0xb0] sm:$0xff]  ;;  %v242_v23 = vld [vmem:[%s1653_s1 + $0xe8] sm:$0xff]  ;;  %v237_v29 = vld [vmem:[%s1653_s1 + $0xc0] sm:$0xff]  ;;  %v1172_v32 = vpack.c.bf16 %v244_v25, %v240_v24  ;;  %v806_v25 = vlaneseq }
  0x1a   : > { %1066 = vmatmul.mubr.msk.f32.vlgmr.msra.gmra.mrb[0].mxu1 %vm280_vm0, %v245_v63  ;;  %1147 = vmatpush1.bf16.msra.mxu0 %v1146_v0  ;;  %v1170_v27 = vpack.c.bf16 %v235_v21, %v231_v19  ;;  %v1156_v28 = vpack.c.bf16 %v242_v23, %v238_v22  ;;  %v241_v30 = vld [vmem:[%s1653_s1 + $0xe0] sm:$0xff]  ;;  %v239_v31 = vld [vmem:[%s1653_s1 + $0xd0] sm:$0xff]  ;;  %v1073_v34 = vld [vmem:[%s1653_s1 + $0x208] sm:$0xff] }
  0x1b   : > { %1163 = vmatpush1.bf16.msra.mxu1 %v1162_v1  ;;  %1149 = vmatprep.subr.bf16.mxu0 %v1148_v2  ;;  %v243_v33 = vld [vmem:[%s1653_s1 + $0xf0] sm:$0xff]  ;;  %v1077_v35 = vld [vmem:[%s1653_s1 + $0x228] sm:$0xff]  ;;  %v1075_v36 = vld [vmem:[%s1653_s1 + $0x218] sm:$0xff]  ;;  %v1158_v38 = vpack.c.bf16 %v241_v30, %v237_v29 }
  0x1c   : > { %1165 = vmatprep.subr.bf16.mxu1 %v1164_v6  ;;  %357 = vmatprep.mubr.f32.mxu0 %v1243_v7  ;;  %v1079_v37 = vld [vmem:[%s1653_s1 + $0x238] sm:$0xff]  ;;  %v1174_v39 = vpack.c.bf16 %v243_v33, %v239_v31  ;;  %v1176_v40 = vpack.c.bf16 %v1077_v35, %v1073_v34  ;;  %v1072_v41 = vld [vmem:[%s1653_s1 + $0x200] sm:$0xff]  ;;  %v1074_v43 = vld [vmem:[%s1653_s1 + $0x210] sm:$0xff] }
  0x1d   : > { %434 = vmatprep.mubr.f32.mxu1 %v1243_v7  ;;  %1065 = vmatmul.mubr.msk.f32.gmra.mrb[2].mxu0 %vm280_vm0, %v246_v14  ;;  %v1076_v42 = vld [vmem:[%s1653_s1 + $0x220] sm:$0xff]  ;;  %v1192_v44 = vpack.c.bf16 %v1079_v37, %v1075_v36  ;;  %v1078_v45 = vld [vmem:[%s1653_s1 + $0x230] sm:$0xff]  ;;  %v1081_v46 = vld [vmem:[%s1653_s1 + $0x248] sm:$0xff] }
  0x1e   : > { %1151 = vmatpush1.bf16.msra.mxu0 %v1150_v13  ;;  %1067 = vmatmul.mubr.msk.f32.gmra.mrb[2].mxu1 %vm280_vm0, %v246_v14  ;;  %v1085_v47 = vld [vmem:[%s1653_s1 + $0x268] sm:$0xff]  ;;  %v1083_v48 = vld [vmem:[%s1653_s1 + $0x258] sm:$0xff]  ;;  %v211_v50 = vld [vmem:[%s1404_s21] sm:$0xff]  ;;  %v1178_v51 = vpack.c.bf16 %v1076_v42, %v1072_v41  ;;  %v1194_v52 = vpack.c.bf16 %v1078_v45, %v1074_v43 }
  0x1f   : > { %1167 = vmatpush1.bf16.msra.mxu1 %v1166_v15  ;;  %1153 = vmatprep.subr.bf16.mxu0 %v1152_v16  ;;  %v1087_v49 = vld [vmem:[%s1653_s1 + $0x278] sm:$0xff]  ;;  %v1180_v53 = vpack.c.bf16 %v1085_v47, %v1081_v46  ;;  %v1080_v54 = vld [vmem:[%s1653_s1 + $0x240] sm:$0xff]  ;;  %v1082_v56 = vld [vmem:[%s1653_s1 + $0x250] sm:$0xff] }
  0x20   : > { %1169 = vmatprep.subr.bf16.mxu1 %v1168_v20  ;;  %511 = vmatprep.mubr.f32.mxu0 %v1243_v7  ;;  %v1084_v55 = vld [vmem:[%s1653_s1 + $0x260] sm:$0xff]  ;;  %v1196_v57 = vpack.c.bf16 %v1087_v49, %v1083_v48  ;;  %v1086_v58 = vld [vmem:[%s1653_s1 + $0x270] sm:$0xff]  ;;  %v1089_v59 = vld [vmem:[%s1653_s1 + $0x288] sm:$0xff]  ;;  %v1244_v48 = vmov 1983009808  }
  0x21   : > { %588 = vmatprep.mubr.f32.mxu1 %v1243_v7  ;;  %v1093_v60 = vld [vmem:[%s1653_s1 + $0x2a8] sm:$0xff]  ;;  %v1091_v61 = vld [vmem:[%s1653_s1 + $0x298] sm:$0xff]  ;;  %v1182_v63 = vpack.c.bf16 %v1084_v55, %v1080_v54  ;;  %v1198_v1 = vpack.c.bf16 %v1086_v58, %v1082_v56  ;;  %v1088_v3 = vld [vmem:[%s1653_s1 + $0x280] sm:$0xff]  ;;  %v1633_v49 = vunpack.c.l.s4 %v1244_v48 }
  0x22   : > { %1155 = vmatpush1.bf16.msra.mxu0 %v1154_v26  ;;  %v1095_v62 = vld [vmem:[%s1653_s1 + $0x2b8] sm:$0xff]  ;;  %v212_v0 = vld [vmem:[%s1404_s21 + $0x8] sm:$0xff]  ;;  %v1184_v2 = vpack.c.bf16 %v1093_v60, %v1089_v59  ;;  %v1092_v4 = vld [vmem:[%s1653_s1 + $0x2a0] sm:$0xff]  ;;  %v1614_v26 = vshrl.u32 %v806_v25, 7 }
  0x23   : > { %1171 = vmatpush1.bf16.msra.mxu1 %v1170_v27  ;;  %1157 = vmatprep.subr.bf16.mxu0 %v1156_v28  ;;  %v1090_v5 = vld [vmem:[%s1653_s1 + $0x290] sm:$0xff]  ;;  %v1200_v6 = vpack.c.bf16 %v1095_v62, %v1091_v61  ;;  %v1097_v9 = vld [vmem:[%s1653_s1 + $0x2c8] sm:$0xff]  ;;  %v1099_v11 = vld [vmem:[%s1653_s1 + $0x2d8] sm:$0xff]  ;;  %v1186_v13 = vpack.c.bf16 %v1092_v4, %v1088_v3 }
  0x24   : > { %1173 = vmatprep.subr.bf16.mxu1 %v1172_v32  ;;  %v1094_v8 = vld [vmem:[%s1653_s1 + $0x2b0] sm:$0xff]  ;;  %v1101_v10 = vld [vmem:[%s1653_s1 + $0x2e8] sm:$0xff]  ;;  %v1103_v12 = vld [vmem:[%s1653_s1 + $0x2f8] sm:$0xff]  ;;  %v808_v27 = vsub.s32 0, %v1614_v26  ;;  %v816_v29 = vsub.s32 2, %v1614_v26  ;;  %v812_v30 = vsub.s32 1, %v1614_v26 }
  0x25   : > { %v1202_v14 = vpack.c.bf16 %v1094_v8, %v1090_v5  ;;  %v1188_v15 = vpack.c.bf16 %v1101_v10, %v1097_v9  ;;  %v1096_v16 = vld [vmem:[%s1653_s1 + $0x2c0] sm:$0xff]  ;;  %v1204_v18 = vpack.c.bf16 %v1103_v12, %v1099_v11  ;;  %v1098_v19 = vld [vmem:[%s1653_s1 + $0x2d0] sm:$0xff]  ;;  %v820_v31 = vsub.s32 3, %v1614_v26 }
  0x26   : > { %1159 = vmatpush1.bf16.msra.mxu0 %v1158_v38  ;;  %v1100_v17 = vld [vmem:[%s1653_s1 + $0x2e0] sm:$0xff]  ;;  %v1102_v20 = vld [vmem:[%s1653_s1 + $0x2f0] sm:$0xff] }
  0x27   : > { %1175 = vmatpush1.bf16.msra.mxu1 %v1174_v39  ;;  %1177 = vmatprep.subr.bf16.mxu0 %v1176_v40  ;;  %v1190_v21 = vpack.c.bf16 %v1100_v17, %v1096_v16  ;;  %v1206_v22 = vpack.c.bf16 %v1102_v20, %v1098_v19  ;;  %v601_v23 = vld [vmem:[%s1404_s21 + $0x2] sm:$0xff]  ;;  %v602_v24 = vld [vmem:[%s1404_s21 + $0xa] sm:$0xff]  ;;  %s1110_s21 = sshll.u32 %s1659_s16, 6 }
  0x28   : > { %1193 = vmatprep.subr.bf16.mxu1 %v1192_v44  ;;  %v804_v28 = vld [vmem:[%s1654_s2] sm:$0xf]  ;;  %s1627_s6 = scalar_lea.vmem %s1655_s3, %s1110_s21 }
  0x29   : > { %1068 = vmatmul.mubr.msk.f32.vlgmr.msra.gmra.mrb[0].mxu0 %vm280_vm0, %v211_v50  ;;  %v817_v32 = vrot.slane %v804_v28, %v816_v29  ;;  %v813_v33 = vrot.slane %v804_v28, %v812_v30  ;;  %v821_v34 = vrot.slane %v804_v28, %v820_v31 }
  0x2a   : > { %1070 = vmatmul.mubr.msk.f32.vlgmr.msra.gmra.mrb[0].mxu1 %vm280_vm0, %v211_v50  ;;  %1179 = vmatpush1.bf16.msra.mxu0 %v1178_v51 }
  0x2b   : > { %1195 = vmatpush1.bf16.msra.mxu1 %v1194_v52  ;;  %1181 = vmatprep.subr.bf16.mxu0 %v1180_v53 }
  0x2c   : > { %1197 = vmatprep.subr.bf16.mxu1 %v1196_v57  ;;  %517 = vmatprep.mubr.f32.mxu0 %v1243_v7 }
  0x2d   : > { %594 = vmatprep.mubr.f32.mxu1 %v1243_v7  ;;  %1069 = vmatmul.mubr.msk.f32.gmra.mrb[2].mxu0 %vm280_vm0, %v212_v0 }
  0x2e   : > { %1183 = vmatpush1.bf16.msra.mxu0 %v1182_v63  ;;  %1071 = vmatmul.mubr.msk.f32.gmra.mrb[2].mxu1 %vm280_vm0, %v212_v0 }
  0x2f   : > { %1199 = vmatpush1.bf16.msra.mxu1 %v1198_v1  ;;  %1185 = vmatprep.subr.bf16.mxu0 %v1184_v2 }
  0x30   : > { %1201 = vmatprep.subr.bf16.mxu1 %v1200_v6  ;;  %706 = vmatprep.mubr.f32.mxu0 %v1243_v7 }
  0x31   : > { %783 = vmatprep.mubr.f32.mxu1 %v1243_v7 }
  0x32   : > { %1187 = vmatpush1.bf16.msra.mxu0 %v1186_v13 }
  0x33   : > { %1203 = vmatpush1.bf16.msra.mxu1 %v1202_v14  ;;  %1189 = vmatprep.subr.bf16.mxu0 %v1188_v15 }
  0x34   : > { %1205 = vmatprep.subr.bf16.mxu1 %v1204_v18 }
  0x36   : > { %1191 = vmatpush1.bf16.msra.mxu0 %v1190_v21 }
  0x37   : > { %1207 = vmatpush1.bf16.msra.mxu1 %v1206_v22 }
  0x39   : > { %1104 = vmatmul.mubr.msk.f32.vlgmr.msra.gmra.mrb[0].mxu0 %vm280_vm0, %v601_v23 }
  0x3a   : > { %1106 = vmatmul.mubr.msk.f32.vlgmr.msra.gmra.mrb[0].mxu1 %vm280_vm0, %v601_v23  ;;  %712 = vmatprep.mubr.f32.mxu0 %v1243_v7 }
  0x3b   : > { %789 = vmatprep.mubr.f32.mxu1 %v1243_v7  ;;  %v809_v7 = vrot.slane %v804_v28, %v808_v27 }
  0x3d   : > { %1105 = vmatmul.mubr.msk.f32.gmra.mrb[2].mxu0 %vm280_vm0, %v602_v24 }
  0x3e   : > { %1107 = vmatmul.mubr.msk.f32.gmra.mrb[2].mxu1 %vm280_vm0, %v602_v24 }
 0x10c   : > { %v708_v35 = vpop.f32.mrb[0].mxu0 }
 0x10d   : > { %v826_v36 = vadd.f32 %v809_v7, %v708_v35  ;;  %v785_v37 = vpop.f32.mrb[0].mxu1  ;;  %v710_v38 = vpop.f32.mrb[1].mxu0 }
 0x10e   : > { %v828_v39 = vadd.f32 %v817_v32, %v785_v37  ;;  %v827_v40 = vadd.f32 %v813_v33, %v710_v38  ;;  %v787_v41 = vpop.f32.mrb[1].mxu1 }
 0x10f   : > { %834 = vst [vmem:[%s1627_s6] sm:$0xff] %v826_v36  ;;  %v829_v42 = vadd.f32 %v821_v34, %v787_v41  ;;  %v870_v44 = vmul.f32 %v826_v36, %v826_v36  ;;  %v919_v41 = vunpack.c.0.s8 %v1633_v49 }
 0x110   : > { %836 = vst [vmem:[%s1627_s6 + $0x10] sm:$0xff] %v828_v39  ;;  %835 = vst [vmem:[%s1627_s6 + $0x8] sm:$0xff] %v827_v40  ;;  %v714_v43 = vpop.f32.mrb[2].mxu0  ;;  %v872_v50 = vmul.f32 %v828_v39, %v828_v39  ;;  %v871_v51 = vmul.f32 %v827_v40, %v827_v40 }
 0x111   : > { %837 = vst [vmem:[%s1627_s6 + $0x18] sm:$0xff] %v829_v42  ;;  %v830_v45 = vadd.f32 %v809_v7, %v714_v43  ;;  %v791_v46 = vpop.f32.mrb[2].mxu1  ;;  %v716_v47 = vpop.f32.mrb[3].mxu0  ;;  %v873_v55 = vmul.f32 %v829_v42, %v829_v42 }
 0x112   : > { %v832_v52 = vadd.f32 %v817_v32, %v791_v46  ;;  %v831_v53 = vadd.f32 %v813_v33, %v716_v47  ;;  %v793_v54 = vpop.f32.mrb[3].mxu1 }
 0x113   : > { %838 = vst [vmem:[%s1627_s6 + $0x20] sm:$0xff] %v830_v45  ;;  %v842_v56 = vadd.f32 %v830_v45, %v826_v36  ;;  %v874_v57 = vmul.f32 %v830_v45, %v830_v45  ;;  %v833_v58 = vadd.f32 %v821_v34, %v793_v54 }
 0x114   : > { %840 = vst [vmem:[%s1627_s6 + $0x30] sm:$0xff] %v832_v52  ;;  %v856_v59 = vadd.f32 %v832_v52, %v828_v39  ;;  %v876_v60 = vmul.f32 %v832_v52, %v832_v52  ;;  %839 = vst [vmem:[%s1627_s6 + $0x28] sm:$0xff] %v831_v53  ;;  %v849_v61 = vadd.f32 %v831_v53, %v827_v40 }
 0x115   : > { %v875_v62 = vmul.f32 %v831_v53, %v831_v53  ;;  %v843_v63 = vrot.slane %v842_v56, 4  ;;  %v878_v0 = vadd.f32 %v874_v57, %v870_v44  ;;  %841 = vst [vmem:[%s1627_s6 + $0x38] sm:$0xff] %v833_v58  ;;  %v863_v1 = vadd.f32 %v833_v58, %v829_v42 }
 0x116   : > { %v877_v2 = vmul.f32 %v833_v58, %v833_v58  ;;  %v857_v3 = vrot.slane %v856_v59, 4  ;;  %v892_v4 = vadd.f32 %v876_v60, %v872_v50  ;;  %v850_v5 = vrot.slane %v849_v61, 4 }
 0x117   : > { %v885_v6 = vadd.f32 %v875_v62, %v871_v51  ;;  %v844_v8 = vadd.f32 %v843_v63, %v842_v56  ;;  %v879_v9 = vrot.slane %v878_v0, 4  ;;  %v864_v10 = vrot.slane %v863_v1, 4 }
 0x118   : > { %v899_v11 = vadd.f32 %v877_v2, %v873_v55  ;;  %v858_v12 = vadd.f32 %v857_v3, %v856_v59  ;;  %v893_v13 = vrot.slane %v892_v4, 4  ;;  %v851_v14 = vadd.f32 %v850_v5, %v849_v61 }
 0x119   : > { %v886_v15 = vrot.slane %v885_v6, 4  ;;  %v845_v16 = vrot.slane %v844_v8, 2  ;;  %v880_v17 = vadd.f32 %v879_v9, %v878_v0  ;;  %v865_v18 = vadd.f32 %v864_v10, %v863_v1 }
 0x11a   : > { %v900_v19 = vrot.slane %v899_v11, 4  ;;  %v859_v20 = vrot.slane %v858_v12, 2  ;;  %v894_v21 = vadd.f32 %v893_v13, %v892_v4  ;;  %v852_v22 = vrot.slane %v851_v14, 2 }
 0x11b   : > { %v887_v23 = vadd.f32 %v886_v15, %v885_v6  ;;  %v846_v24 = vadd.f32 %v845_v16, %v844_v8  ;;  %v881_v25 = vrot.slane %v880_v17, 2  ;;  %v866_v27 = vrot.slane %v865_v18, 2 }
 0x11c   : > { %v901_v28 = vadd.f32 %v900_v19, %v899_v11  ;;  %v860_v29 = vadd.f32 %v859_v20, %v858_v12  ;;  %v895_v30 = vrot.slane %v894_v21, 2  ;;  %v853_v31 = vadd.f32 %v852_v22, %v851_v14 }
 0x11d   : > { %v888_v7 = vrot.slane %v887_v23, 2  ;;  %v847_v32 = vrot.slane %v846_v24, 1  ;;  %v882_v33 = vadd.f32 %v881_v25, %v880_v17  ;;  %v867_v34 = vadd.f32 %v866_v27, %v865_v18 }
 0x11e   : > { %v902_v35 = vrot.slane %v901_v28, 2  ;;  %v861_v36 = vrot.slane %v860_v29, 1  ;;  %v896_v37 = vadd.f32 %v895_v30, %v894_v21  ;;  %v854_v38 = vrot.slane %v853_v31, 1 }
 0x11f   : > { %v889_v39 = vadd.f32 %v888_v7, %v887_v23  ;;  %v883_v40 = vrot.slane %v882_v33, 1  ;;  %v868_v42 = vrot.slane %v867_v34, 1  ;;  %v848_v46 = vadd.f32 %v847_v32, %v846_v24 }
 0x120   : > { %v903_v43 = vadd.f32 %v902_v35, %v901_v28  ;;  %v897_v44 = vrot.slane %v896_v37, 1  ;;  %v862_v50 = vadd.f32 %v861_v36, %v860_v29  ;;  %v855_v52 = vadd.f32 %v854_v38, %v853_v31 }
 0x121   : > { %v890_v45 = vrot.slane %v889_v39, 1  ;;  %v884_v47 = vadd.f32 %v883_v40, %v882_v33  ;;  %v922_v55 = vsub.s32 %v919_v41, %v1614_v26  ;;  %v869_v56 = vadd.f32 %v868_v42, %v867_v34 }
 0x122   : > { %v904_v48 = vrot.slane %v903_v43, 1  ;;  %v898_v51 = vadd.f32 %v897_v44, %v896_v37 }
 0x123   : > { %v891_v53 = vadd.f32 %v890_v45, %v889_v39  ;;  %v907_v54 = vsel %vm906_vm1, %v848_v46, %v884_v47 }
 0x124   : > { %v905_v57 = vadd.f32 %v904_v48, %v903_v43  ;;  %v909_v49 = vsel %vm906_vm1, %v862_v50, %v898_v51 }
 0x125   : > { %v908_v58 = vsel %vm906_vm1, %v855_v52, %v891_v53 }
 0x126   : > { %v915_v59 = vcombine.low %v907_v54, %v908_v58  ;;  %v910_v60 = vsel %vm906_vm1, %v869_v56, %v905_v57 }
 0x127   : > { %v916_v61 = vcombine.low %v909_v49, %v910_v60 }
 0x128   : > { %v923_v62 = vrot.slane %v915_v59, %v922_v55 }
 0x129   : > { %v930_v63 = vrot.slane %v916_v61, %v922_v55 }
 0x12b   : > { %v931_v0 = vcombine.low %v923_v62, %v930_v63 }
 0x12d   : > { %933 = vst [vmem:[%s210_s10] sm:$0xff] %v931_v0 }
 0x12e PF: > { %s15_s15 = sadd.s32 1, %s1241_s15  }
 0x12f   : > { %p12_p4 = scmp.ge.s32.totalorder %s15_s15, 4  }
 0x131   :  { %14 = sbr.rel (!%p12_p4) target bundleno = 1 (0x1), region = 76 }

// kernel: tile.51
= control target key start
LH: loop header
LB: loop body
LE: loop exit
PB: predicated region body
PF: predicated region fallthrough
CT: control target
= control target key end

     0   :  { %vm118_vm0 = vcmask 1043458   ;;  %s158_s6 = smov 3  ;;  %vm123_vm1 = vcmask 1045508   ;;  %vm128_vm2 = vcmask 1047558   ;;  %s161_s9 = smov 12  ;;  %vm3_vm3 = vcmask 261120   ;;  %s2648_s0 = inlined_call_operand.vmem [shape: f32[32,16,32], index: 0, kind: input, shape index: {}]   ;;  %s2649_s1 = inlined_call_operand.vmem [shape: f32[32,512], index: 1, kind: output, shape index: {}]  }
   0x1   :  { %v1268_v0 = vld [vmem:[%s2648_s0 + $0x103] ss:$16 sm:%s158_s6]   ;;  %s166_s10 = smov 48  ;;  %s171_s15 = smov 192  ;;  %v1223_v54 = vld [vmem:[%s2648_s0 + $0x80] ss:$4 sm:$0xff]  }
   0x2   :  { %v1269_v1 = vld [vmem:[%s2648_s0 + $0x103] ss:$16 sm:%s161_s9]   ;;  %s113_s16 = smov 3  ;;  %s116_s21 = smov 12  ;;  %vm132_vm4 = vcmask 1048320   ;;  %vm499_vm5 = vcmask 785920  }
   0x3   :  { %v1270_v2 = vld [vmem:[%s2648_s0 + $0x103] ss:$16 sm:%s166_s10]   ;;  %v164_v3 = vsel %vm118_vm0, %v1269_v1, %v1268_v0  ;;  %s121_s22 = smov 48  ;;  %s126_s27 = smov 192  ;;  %v1226_v0 = vld [vmem:[%s2648_s0 + $0xa0] ss:$4 sm:$0xff]  }
   0x4   :  { %v1271_v4 = vld [vmem:[%s2648_s0 + $0x103] ss:$16 sm:%s171_s15]   ;;  %v169_v6 = vsel %vm123_vm1, %v1270_v2, %v164_v3  ;;  %s181_s28 = smov 3  ;;  %s184_s4 = smov 12  ;;  %vm866_vm6 = vcmask 523520  }
   0x5   :  { %v1259_v5 = vld [vmem:[%s2648_s0 + $0x3] ss:$16 sm:%s113_s16]   ;;  %v174_v9 = vsel %vm128_vm2, %v1271_v4, %v169_v6  ;;  %s189_s5 = smov 48  ;;  %s1499_s6 = smov 96   ;;  %v1229_v6 = vld [vmem:[%s2648_s0 + $0xc0] ss:$4 sm:$0xff]  }
   0x6   :  { %v1260_v7 = vld [vmem:[%s2648_s0 + $0x3] ss:$16 sm:%s116_s21]   ;;  %175 = vrot.lane.b32.xlu1 %v174_v9, %s1499_s6  ;;  %s194_s9 = smov 192  ;;  %s135_s10 = smov 3 }
   0x7   :  { %v1261_v8 = vld [vmem:[%s2648_s0 + $0x3] ss:$16 sm:%s121_s22]   ;;  %v119_v10 = vsel %vm118_vm0, %v1260_v7, %v1259_v5  ;;  %s138_s15 = smov 12  ;;  %s143_s16 = smov 48 }
   0x8   :  { %v1262_v11 = vld [vmem:[%s2648_s0 + $0x3] ss:$16 sm:%s126_s27]   ;;  %v124_v13 = vsel %vm123_vm1, %v1261_v8, %v119_v10  ;;  %s148_s19 = smov 192  ;;  %s227_s20 = smov 3 }
   0x9   :  { %v1273_v12 = vld [vmem:[%s2648_s0 + $0x183] ss:$16 sm:%s181_s28]   ;;  %v129_v15 = vsel %vm128_vm2, %v1262_v11, %v124_v13  ;;  %s230_s25 = smov 12  ;;  %s235_s26 = smov 48  ;;  %v1283_v27 = vld [vmem:[%s2648_s0 + $0x87] ss:$16 sm:%s227_s20]  }
   0xa   :  { %v1274_v14 = vld [vmem:[%s2648_s0 + $0x183] ss:$16 sm:%s184_s4]   ;;  %130 = vrot.lane.b32.xlu0 %v129_v15, %s1499_s6  ;;  %s240_s29 = smov 192  ;;  %s204_s30 = smov 3 }
   0xb   :  { %v187_v16 = vsel %vm118_vm0, %v1274_v14, %v1273_v12  ;;  %v1275_v17 = vld [vmem:[%s2648_s0 + $0x183] ss:$16 sm:%s189_s5]   ;;  %v1284_v28 = vld [vmem:[%s2648_s0 + $0x87] ss:$16 sm:%s230_s25]   ;;  %s207_s7 = smov 12  ;;  %s212_s8 = smov 48 }
   0xc   :  { %v1276_v18 = vld [vmem:[%s2648_s0 + $0x183] ss:$16 sm:%s194_s9]   ;;  %v192_v19 = vsel %vm123_vm1, %v1275_v17, %v187_v16  ;;  %v233_v30 = vsel %vm118_vm0, %v1284_v28, %v1283_v27  ;;  %v1285_v31 = vld [vmem:[%s2648_s0 + $0x87] ss:$16 sm:%s235_s26]   ;;  %s217_s13 = smov 192  ;;  %s276_s17 = smov 12 }
   0xd   :  { %v1263_v20 = vld [vmem:[%s2648_s0 + $0x83] ss:$16 sm:%s135_s10]   ;;  %v197_v21 = vsel %vm128_vm2, %v1276_v18, %v192_v19  ;;  %v1286_v32 = vld [vmem:[%s2648_s0 + $0x87] ss:$16 sm:%s240_s29]   ;;  %v238_v33 = vsel %vm123_vm1, %v1285_v31, %v233_v30  ;;  %s281_s22 = smov 48  ;;  %s286_s23 = smov 192 }
   0xe   :  { %v1264_v22 = vld [vmem:[%s2648_s0 + $0x83] ss:$16 sm:%s138_s15]   ;;  %198 = vrot.lane.b32.xlu1 %v197_v21, %s1499_s6  ;;  %v243_v35 = vsel %vm128_vm2, %v1286_v32, %v238_v33  ;;  %s250_s26 = smov 3  ;;  %s253_s2 = smov 12  ;;  %v1232_v16 = vld [vmem:[%s2648_s0 + $0xe0] ss:$4 sm:$0xff]  }
   0xf   :  { %v1265_v23 = vld [vmem:[%s2648_s0 + $0x83] ss:$16 sm:%s143_s16]   ;;  %v141_v24 = vsel %vm118_vm0, %v1264_v22, %v1263_v20  ;;  %v1278_v34 = vld [vmem:[%s2648_s0 + $0x7] ss:$16 sm:%s204_s30]   ;;  %s273_s16 = smov 3  ;;  %s258_s3 = smov 48 }
  0x10   :  { %v1266_v25 = vld [vmem:[%s2648_s0 + $0x83] ss:$16 sm:%s148_s19]   ;;  %v146_v26 = vsel %vm123_vm1, %v1265_v23, %v141_v24  ;;  %v1279_v36 = vld [vmem:[%s2648_s0 + $0x7] ss:$16 sm:%s207_s7]   ;;  %s263_s9 = smov 192  ;;  %s319_s12 = smov 3 }
  0x11   :  { %v151_v29 = vsel %vm128_vm2, %v1266_v25, %v146_v26  ;;  %v1280_v37 = vld [vmem:[%s2648_s0 + $0x7] ss:$16 sm:%s212_s8]   ;;  %v210_v38 = vsel %vm118_vm0, %v1279_v36, %v1278_v34  ;;  %s327_s18 = smov 48  ;;  %s332_s19 = smov 192  ;;  %v1303_v56 = vld [vmem:[%s2648_s0 + $0x8b] ss:$16 sm:%s319_s12]  }
  0x12   :  { %152 = vrot.lane.b32.xlu0 %v151_v29, %s1499_s6  ;;  %244 = vrot.lane.b32.xlu1 %v243_v35, %s1499_s6  ;;  %v1281_v39 = vld [vmem:[%s2648_s0 + $0x7] ss:$16 sm:%s217_s13]   ;;  %v215_v40 = vsel %vm123_vm1, %v1280_v37, %v210_v38  ;;  %s322_s13 = smov 12  ;;  %s299_s29 = smov 12 }
  0x13   :  { %v1293_v41 = vld [vmem:[%s2648_s0 + $0x187] ss:$16 sm:%s273_s16]   ;;  %v220_v43 = vsel %vm128_vm2, %v1281_v39, %v215_v40  ;;  %v1304_v57 = vld [vmem:[%s2648_s0 + $0x8b] ss:$16 sm:%s322_s13]   ;;  %s304_s30 = smov 48  ;;  %s309_s11 = smov 192 }
  0x14   :  { %v1294_v42 = vld [vmem:[%s2648_s0 + $0x187] ss:$16 sm:%s276_s17]   ;;  %1224 = vst.msk [vmem:[%s2649_s1 + $0x20] ss:$8 sm:$0xf] %vm3_vm3, %v1223_v54   ;;  %v325_v59 = vsel %vm118_vm0, %v1304_v57, %v1303_v56  ;;  %s365_s14 = smov 3 }
  0x15   :  { %v279_v44 = vsel %vm118_vm0, %v1294_v42, %v1293_v41  ;;  %v1295_v45 = vld [vmem:[%s2648_s0 + $0x187] ss:$16 sm:%s281_s22]   ;;  %s296_s22 = smov 3  ;;  %1225 = vst.msk [vmem:[%s2649_s1 + $0x1] ss:$8 sm:$0xf0] %vm3_vm3, %v1223_v54  }
  0x16   :  { %v1296_v46 = vld [vmem:[%s2648_s0 + $0x187] ss:$16 sm:%s286_s23]   ;;  %221 = vrot.lane.b32.xlu0 %v220_v43, %s1499_s6  ;;  %v284_v47 = vsel %vm123_vm1, %v1295_v45, %v279_v44  ;;  %s368_s15 = smov 12  ;;  %s378_s23 = smov 192  ;;  %v2_v31 = vld [vmem:[%s2648_s0] ss:$4 sm:$0xff]  }
  0x17   :  { %v1288_v48 = vld [vmem:[%s2648_s0 + $0x107] ss:$16 sm:%s250_s26]   ;;  %v289_v49 = vsel %vm128_vm2, %v1296_v46, %v284_v47  ;;  %v1305_v60 = vld [vmem:[%s2648_s0 + $0x8b] ss:$16 sm:%s327_s18]   ;;  %s350_s10 = smov 48  ;;  %s396_s16 = smov 48 }
  0x18   :  { %v1289_v50 = vld [vmem:[%s2648_s0 + $0x107] ss:$16 sm:%s253_s2]   ;;  %290 = vrot.lane.b32.xlu1 %v289_v49, %s1499_s6  ;;  %v330_v62 = vsel %vm123_vm1, %v1305_v60, %v325_v59  ;;  %1227 = vst.msk [vmem:[%s2649_s1 + $0x22] ss:$8 sm:$0xf] %vm3_vm3, %v1226_v0   ;;  %s424_s2 = smov 192 }
  0x19   :  { %v1290_v51 = vld [vmem:[%s2648_s0 + $0x107] ss:$16 sm:%s258_s3]   ;;  %v256_v52 = vsel %vm118_vm0, %v1289_v50, %v1288_v48  ;;  %v1306_v61 = vld [vmem:[%s2648_s0 + $0x8b] ss:$16 sm:%s332_s19]   ;;  %s355_s19 = smov 192  ;;  %s401_s21 = smov 192 }
  0x1a   :  { %v1291_v53 = vld [vmem:[%s2648_s0 + $0x107] ss:$16 sm:%s263_s9]   ;;  %v261_v55 = vsel %vm123_vm1, %v1290_v51, %v256_v52  ;;  %v1298_v63 = vld [vmem:[%s2648_s0 + $0xb] ss:$16 sm:%s296_s22]   ;;  %v335_v1 = vsel %vm128_vm2, %v1306_v61, %v330_v62  ;;  %s373_s22 = smov 48  ;;  %s345_s9 = smov 12 }
  0x1b   :  { %v266_v58 = vsel %vm128_vm2, %v1291_v53, %v261_v55  ;;  %v1299_v2 = vld [vmem:[%s2648_s0 + $0xb] ss:$16 sm:%s299_s29]   ;;  %1228 = vst.msk [vmem:[%s2649_s1 + $0x3] ss:$8 sm:$0xf0] %vm3_vm3, %v1226_v0   ;;  %s457_s24 = smov 3 }
  0x1c   :  { %267 = vrot.lane.b32.xlu0 %v266_v58, %s1499_s6  ;;  %v1300_v3 = vld [vmem:[%s2648_s0 + $0xb] ss:$16 sm:%s304_s30]   ;;  %336 = vrot.lane.b32.xlu1 %v335_v1, %s1499_s6  ;;  %v302_v4 = vsel %vm118_vm0, %v1299_v2, %v1298_v63  ;;  %s342_s30 = smov 3  ;;  %s460_s25 = smov 12 }
  0x1d   :  { %v1301_v5 = vld [vmem:[%s2648_s0 + $0xb] ss:$16 sm:%s309_s11]   ;;  %v307_v7 = vsel %vm123_vm1, %v1300_v3, %v302_v4  ;;  %1230 = vst.msk [vmem:[%s2649_s1 + $0x24] ss:$8 sm:$0xf] %vm3_vm3, %v1229_v6   ;;  %s465_s3 = smov 48 }
  0x1e   :  { %v1313_v8 = vld [vmem:[%s2648_s0 + $0x18b] ss:$16 sm:%s365_s14]   ;;  %1231 = vst.msk [vmem:[%s2649_s1 + $0x5] ss:$8 sm:$0xf0] %vm3_vm3, %v1229_v6   ;;  %v312_v10 = vsel %vm128_vm2, %v1301_v5, %v307_v7  ;;  %s470_s4 = smov 192 }
  0x1f   :  { %v1314_v9 = vld [vmem:[%s2648_s0 + $0x18b] ss:$16 sm:%s368_s15]   ;;  %1233 = vst.msk [vmem:[%s2649_s1 + $0x26] ss:$8 sm:$0xf] %vm3_vm3, %v1232_v16   ;;  %s391_s15 = smov 12 }
  0x20   :  { %v371_v11 = vsel %vm118_vm0, %v1314_v9, %v1313_v8  ;;  %v1315_v12 = vld [vmem:[%s2648_s0 + $0x18b] ss:$16 sm:%s373_s22]   ;;  %313 = vrot.lane.b32.xlu0 %v312_v10, %s1499_s6  ;;  %s411_s22 = smov 3  ;;  %1234 = vst.msk [vmem:[%s2649_s1 + $0x7] ss:$8 sm:$0xf0] %vm3_vm3, %v1232_v16  }
  0x21   :  { %v1316_v13 = vld [vmem:[%s2648_s0 + $0x18b] ss:$16 sm:%s378_s23]   ;;  %v376_v14 = vsel %vm123_vm1, %v1315_v12, %v371_v11  ;;  %s414_s23 = smov 12  ;;  %v1323_v23 = vld [vmem:[%s2648_s0 + $0x8f] ss:$16 sm:%s411_s22]   ;;  %s434_s12 = smov 3 }
  0x22   :  { %v1308_v15 = vld [vmem:[%s2648_s0 + $0x10b] ss:$16 sm:%s342_s30]   ;;  %v381_v17 = vsel %vm128_vm2, %v1316_v13, %v376_v14  ;;  %s419_s30 = smov 48  ;;  %v1324_v24 = vld [vmem:[%s2648_s0 + $0x8f] ss:$16 sm:%s414_s23]   ;;  %s442_s20 = smov 48 }
  0x23   :  { %v1309_v18 = vld [vmem:[%s2648_s0 + $0x10b] ss:$16 sm:%s345_s9]   ;;  %382 = vrot.lane.b32.xlu1 %v381_v17, %s1499_s6  ;;  %v417_v26 = vsel %vm118_vm0, %v1324_v24, %v1323_v23  ;;  %4 = vst.msk [vmem:[%s2649_s1] ss:$8 sm:$0xf] %vm3_vm3, %v2_v31   ;;  %s447_s29 = smov 192 }
  0x24   :  { %v1310_v19 = vld [vmem:[%s2648_s0 + $0x10b] ss:$16 sm:%s350_s10]   ;;  %v348_v20 = vsel %vm118_vm0, %v1309_v18, %v1308_v15  ;;  %s388_s10 = smov 3  ;;  %v1325_v27 = vld [vmem:[%s2648_s0 + $0x8f] ss:$16 sm:%s419_s30]   ;;  %s515_s13 = smov 192 }
  0x25   :  { %v1311_v21 = vld [vmem:[%s2648_s0 + $0x10b] ss:$16 sm:%s355_s19]   ;;  %v353_v22 = vsel %vm123_vm1, %v1310_v19, %v348_v20  ;;  %v1326_v28 = vld [vmem:[%s2648_s0 + $0x8f] ss:$16 sm:%s424_s2]   ;;  %v422_v29 = vsel %vm123_vm1, %v1325_v27, %v417_v26  ;;  %s437_s19 = smov 12  ;;  %s483_s27 = smov 12 }
  0x26   :  { %v358_v25 = vsel %vm128_vm2, %v1311_v21, %v353_v22  ;;  %v1318_v30 = vld [vmem:[%s2648_s0 + $0xf] ss:$16 sm:%s388_s10]   ;;  %v427_v32 = vsel %vm128_vm2, %v1326_v28, %v422_v29  ;;  %1213 = vst.msk [vmem:[%s2649_s1 - $0x1f] ss:$8 sm:$0xf0] %vm3_vm3, %v2_v31   ;;  %s488_s28 = smov 48 }
  0x27   :  { %359 = vrot.lane.b32.xlu0 %v358_v25, %s1499_s6  ;;  %v1319_v33 = vld [vmem:[%s2648_s0 + $0xf] ss:$16 sm:%s391_s15]   ;;  %428 = vrot.lane.b32.xlu1 %v427_v32, %s1499_s6  ;;  %s493_s9 = smov 192  ;;  %s548_s11 = smov 3 }
  0x28   :  { %v1320_v34 = vld [vmem:[%s2648_s0 + $0xf] ss:$16 sm:%s396_s16]   ;;  %v394_v35 = vsel %vm118_vm0, %v1319_v33, %v1318_v30  ;;  %v1214_v37 = vld [vmem:[%s2648_s0 + $0x20] ss:$4 sm:$0xff]   ;;  %s528_s7 = smov 12  ;;  %s533_s8 = smov 48 }
  0x29   :  { %v1321_v36 = vld [vmem:[%s2648_s0 + $0xf] ss:$16 sm:%s401_s21]   ;;  %v399_v38 = vsel %vm123_vm1, %v1320_v34, %v394_v35  ;;  %1215 = vst.msk [vmem:[%s2649_s1 + $0x2] ss:$8 sm:$0xf] %vm3_vm3, %v1214_v37   ;;  %s538_s16 = smov 192 }
  0x2a   :  { %v1333_v39 = vld [vmem:[%s2648_s0 + $0x18f] ss:$16 sm:%s457_s24]   ;;  %1216 = vst.msk [vmem:[%s2649_s1 - $0x1d] ss:$8 sm:$0xf0] %vm3_vm3, %v1214_v37   ;;  %v404_v41 = vsel %vm128_vm2, %v1321_v36, %v399_v38  ;;  %s574_s14 = smov 12 }
  0x2b   :  { %v1334_v40 = vld [vmem:[%s2648_s0 + $0x18f] ss:$16 sm:%s460_s25]   ;;  %405 = vrot.lane.b32.xlu0 %v404_v41, %s1499_s6  ;;  %v1217_v47 = vld [vmem:[%s2648_s0 + $0x40] ss:$4 sm:$0xff]   ;;  %s1500_s25 = smov 64   ;;  %s579_s15 = smov 48 }
  0x2c   :  { %v463_v42 = vsel %vm118_vm0, %v1334_v40, %v1333_v39  ;;  %v1335_v43 = vld [vmem:[%s2648_s0 + $0x18f] ss:$16 sm:%s465_s3]   ;;  %s502_s3 = smov 3  ;;  %1218 = vst.msk [vmem:[%s2649_s1 + $0x4] ss:$8 sm:$0xf] %vm3_vm3, %v1217_v47  }
  0x2d   :  { %v1336_v44 = vld [vmem:[%s2648_s0 + $0x18f] ss:$16 sm:%s470_s4]   ;;  %v468_v45 = vsel %vm123_vm1, %v1335_v43, %v463_v42  ;;  %s505_s4 = smov 12  ;;  %1219 = vst.msk [vmem:[%s2649_s1 - $0x1b] ss:$8 sm:$0xf0] %vm3_vm3, %v1217_v47  }
  0x2e   :  { %v1328_v46 = vld [vmem:[%s2648_s0 + $0x10f] ss:$16 sm:%s434_s12]   ;;  %v473_v48 = vsel %vm128_vm2, %v1336_v44, %v468_v45  ;;  %s510_s12 = smov 48  ;;  %v1220_v53 = vld [vmem:[%s2648_s0 + $0x60] ss:$4 sm:$0xff]   ;;  %s584_s24 = smov 192 }
  0x2f   :  { %v1329_v49 = vld [vmem:[%s2648_s0 + $0x10f] ss:$16 sm:%s437_s19]   ;;  %474 = vrot.lane.b32.xlu1 %v473_v48, %s1499_s6  ;;  %1221 = vst.msk [vmem:[%s2649_s1 + $0x6] ss:$8 sm:$0xf] %vm3_vm3, %v1220_v53   ;;  %s556_s19 = smov 48 }
  0x30   :  { %v1330_v50 = vld [vmem:[%s2648_s0 + $0x10f] ss:$16 sm:%s442_s20]   ;;  %v440_v51 = vsel %vm118_vm0, %v1329_v49, %v1328_v46  ;;  %s480_s20 = smov 3  ;;  %v1342_v55 = vld [vmem:[%s2648_s0 + $0x82] ss:$16 sm:%s502_s3]   ;;  %s620_s22 = smov 12 }
  0x31   :  { %v1331_v52 = vld [vmem:[%s2648_s0 + $0x10f] ss:$16 sm:%s447_s29]   ;;  %v445_v54 = vsel %vm123_vm1, %v1330_v50, %v440_v51  ;;  %v1343_v56 = vld [vmem:[%s2648_s0 + $0x82] ss:$16 sm:%s505_s4]   ;;  %s607_s29 = smov 192  ;;  %s625_s23 = smov 48 }
  0x32   :  { %1222 = vst.msk [vmem:[%s2649_s1 - $0x19] ss:$8 sm:$0xf0] %vm3_vm3, %v1220_v53   ;;  %v450_v57 = vsel %vm128_vm2, %v1331_v52, %v445_v54  ;;  %v508_v58 = vsel %vm118_vm0, %v1343_v56, %v1342_v55  ;;  %v1344_v59 = vld [vmem:[%s2648_s0 + $0x82] ss:$16 sm:%s510_s12]   ;;  %s551_s12 = smov 12 }
  0x33   :  { %v1345_v60 = vld [vmem:[%s2648_s0 + $0x82] ss:$16 sm:%s515_s13]   ;;  %451 = vrot.lane.b32.xlu0 %v450_v57, %s1499_s6  ;;  %v513_v61 = vsel %vm123_vm1, %v1344_v59, %v508_v58  ;;  %v1247_v63 = vld [vmem:[%s2648_s0 + $0x180] ss:$4 sm:$0xff]   ;;  %s630_s4 = smov 192  ;;  %s666_s2 = smov 12 }
  0x34   :  { %v1338_v62 = vld [vmem:[%s2648_s0 + $0x2] ss:$16 sm:%s480_s20]   ;;  %v518_v0 = vsel %vm128_vm2, %v1345_v60, %v513_v61  ;;  %s561_s20 = smov 192  ;;  %1248 = vst.msk [vmem:[%s2649_s1 + $0x60] ss:$8 sm:$0xf] %vm3_vm3, %v1247_v63  }
  0x35   :  { %v1339_v1 = vld [vmem:[%s2648_s0 + $0x2] ss:$16 sm:%s483_s27]   ;;  %1249 = vst.msk [vmem:[%s2649_s1 + $0x41] ss:$8 sm:$0xf0] %vm3_vm3, %v1247_v63   ;;  %519 = vrot.lane.b32.xlu1 %v518_v0, %s1500_s25  ;;  %s671_s3 = smov 48 }
  0x36   :  { %v1340_v2 = vld [vmem:[%s2648_s0 + $0x2] ss:$16 sm:%s488_s28]   ;;  %v486_v3 = vsel %vm118_vm0, %v1339_v1, %v1338_v62  ;;  %s525_s28 = smov 3  ;;  %v1250_v5 = vld [vmem:[%s2648_s0 + $0x1a0] ss:$4 sm:$0xff]   ;;  %s740_s21 = smov 48 }
  0x37   :  { %v1341_v4 = vld [vmem:[%s2648_s0 + $0x2] ss:$16 sm:%s493_s9]   ;;  %v491_v6 = vsel %vm123_vm1, %v1340_v2, %v486_v3  ;;  %1251 = vst.msk [vmem:[%s2649_s1 + $0x62] ss:$8 sm:$0xf] %vm3_vm3, %v1250_v5   ;;  %s653_s9 = smov 192 }
  0x38   :  { %v1352_v7 = vld [vmem:[%s2648_s0 + $0x182] ss:$16 sm:%s548_s11]   ;;  %1252 = vst.msk [vmem:[%s2649_s1 + $0x43] ss:$8 sm:$0xf0] %vm3_vm3, %v1250_v5   ;;  %v496_v9 = vsel %vm128_vm2, %v1341_v4, %v491_v6  ;;  %s709_s26 = smov 3 }
  0x39   :  { %v1353_v8 = vld [vmem:[%s2648_s0 + $0x182] ss:$16 sm:%s551_s12]   ;;  %497 = vrot.lane.b32.xlu0 %v496_v9, %s1500_s25  ;;  %v1253_v15 = vld [vmem:[%s2648_s0 + $0x1c0] ss:$4 sm:$0xff]   ;;  %s676_s12 = smov 192  ;;  %s778_s11 = smov 3 }
  0x3a   :  { %v554_v10 = vsel %vm118_vm0, %v1353_v8, %v1352_v7  ;;  %v1354_v11 = vld [vmem:[%s2648_s0 + $0x182] ss:$16 sm:%s556_s19]   ;;  %s594_s19 = smov 3  ;;  %1254 = vst.msk [vmem:[%s2649_s1 + $0x64] ss:$8 sm:$0xf] %vm3_vm3, %v1253_v15  }
  0x3b   :  { %v1355_v12 = vld [vmem:[%s2648_s0 + $0x182] ss:$16 sm:%s561_s20]   ;;  %v559_v13 = vsel %vm123_vm1, %v1354_v11, %v554_v10  ;;  %s597_s20 = smov 12  ;;  %1255 = vst.msk [vmem:[%s2649_s1 + $0x45] ss:$8 sm:$0xf0] %vm3_vm3, %v1253_v15  }
  0x3c   :  { %v1347_v14 = vld [vmem:[%s2648_s0 + $0x102] ss:$16 sm:%s525_s28]   ;;  %v564_v16 = vsel %vm128_vm2, %v1355_v12, %v559_v13  ;;  %s602_s28 = smov 48  ;;  %v1256_v21 = vld [vmem:[%s2648_s0 + $0x1e0] ss:$4 sm:$0xff]   ;;  %s786_s17 = smov 48 }
  0x3d   :  { %v1348_v17 = vld [vmem:[%s2648_s0 + $0x102] ss:$16 sm:%s528_s7]   ;;  %565 = vrot.lane.b32.xlu1 %v564_v16, %s1500_s25  ;;  %1257 = vst.msk [vmem:[%s2649_s1 + $0x66] ss:$8 sm:$0xf] %vm3_vm3, %v1256_v21   ;;  %s791_s18 = smov 192 }
  0x3e   :  { %v1349_v18 = vld [vmem:[%s2648_s0 + $0x102] ss:$16 sm:%s533_s8]   ;;  %v531_v19 = vsel %vm118_vm0, %v1348_v17, %v1347_v14  ;;  %s571_s8 = smov 3  ;;  %v1362_v23 = vld [vmem:[%s2648_s0 + $0x86] ss:$16 sm:%s594_s19]   ;;  %s758_s27 = smov 12 }
  0x3f   :  { %v1350_v20 = vld [vmem:[%s2648_s0 + $0x102] ss:$16 sm:%s538_s16]   ;;  %v536_v22 = vsel %vm123_vm1, %v1349_v18, %v531_v19  ;;  %v1363_v24 = vld [vmem:[%s2648_s0 + $0x86] ss:$16 sm:%s597_s20]   ;;  %s699_s16 = smov 192  ;;  %s832_s13 = smov 48 }
  0x40   :  { %1258 = vst.msk [vmem:[%s2649_s1 + $0x47] ss:$8 sm:$0xf0] %vm3_vm3, %v1256_v21   ;;  %v541_v25 = vsel %vm128_vm2, %v1350_v20, %v536_v22  ;;  %v600_v26 = vsel %vm118_vm0, %v1363_v24, %v1362_v23  ;;  %v1364_v27 = vld [vmem:[%s2648_s0 + $0x86] ss:$16 sm:%s602_s28]   ;;  %s640_s28 = smov 3 }
  0x41   :  { %v1365_v28 = vld [vmem:[%s2648_s0 + $0x86] ss:$16 sm:%s607_s29]   ;;  %542 = vrot.lane.b32.xlu0 %v541_v25, %s1500_s25  ;;  %v605_v29 = vsel %vm123_vm1, %v1364_v27, %v600_v26  ;;  %s643_s29 = smov 12  ;;  %v1235_v31 = vld [vmem:[%s2648_s0 + $0x100] ss:$4 sm:$0xff]   ;;  %s877_s6 = smov 48 }
  0x42   :  { %v1357_v30 = vld [vmem:[%s2648_s0 + $0x6] ss:$16 sm:%s571_s8]   ;;  %v610_v32 = vsel %vm128_vm2, %v1365_v28, %v605_v29  ;;  %s648_s8 = smov 48  ;;  %1236 = vst.msk [vmem:[%s2649_s1 + $0x40] ss:$8 sm:$0xf] %vm3_vm3, %v1235_v31  }
  0x43   :  { %v1358_v33 = vld [vmem:[%s2648_s0 + $0x6] ss:$16 sm:%s574_s14]   ;;  %1237 = vst.msk [vmem:[%s2649_s1 + $0x21] ss:$8 sm:$0xf0] %vm3_vm3, %v1235_v31   ;;  %611 = vrot.lane.b32.xlu1 %v610_v32, %s1500_s25  ;;  %s837_s14 = smov 192 }
  0x44   :  { %v1359_v34 = vld [vmem:[%s2648_s0 + $0x6] ss:$16 sm:%s579_s15]   ;;  %v577_v35 = vsel %vm118_vm0, %v1358_v33, %v1357_v30  ;;  %s617_s15 = smov 3  ;;  %v1238_v37 = vld [vmem:[%s2648_s0 + $0x120] ss:$4 sm:$0xff]   ;;  %s882_s10 = smov 192 }
  0x45   :  { %v1360_v36 = vld [vmem:[%s2648_s0 + $0x6] ss:$16 sm:%s584_s24]   ;;  %v582_v38 = vsel %vm123_vm1, %v1359_v34, %v577_v35  ;;  %1239 = vst.msk [vmem:[%s2649_s1 + $0x42] ss:$8 sm:$0xf] %vm3_vm3, %v1238_v37   ;;  %s855_s19 = smov 48 }
  0x46   :  { %v1372_v39 = vld [vmem:[%s2648_s0 + $0x186] ss:$16 sm:%s640_s28]   ;;  %1240 = vst.msk [vmem:[%s2649_s1 + $0x23] ss:$8 sm:$0xf0] %vm3_vm3, %v1238_v37   ;;  %v587_v41 = vsel %vm128_vm2, %v1360_v36, %v582_v38  ;;  %s763_s28 = smov 48 }
  0x47   :  { %v1373_v40 = vld [vmem:[%s2648_s0 + $0x186] ss:$16 sm:%s643_s29]   ;;  %588 = vrot.lane.b32.xlu0 %v587_v41, %s1500_s25  ;;  %v1241_v47 = vld [vmem:[%s2648_s0 + $0x140] ss:$4 sm:$0xff]   ;;  %s814_s29 = smov 192  ;;  %s860_s24 = smov 192 }
  0x48   :  { %v646_v42 = vsel %vm118_vm0, %v1373_v40, %v1372_v39  ;;  %v1374_v43 = vld [vmem:[%s2648_s0 + $0x186] ss:$16 sm:%s648_s8]   ;;  %s686_s8 = smov 3  ;;  %1242 = vst.msk [vmem:[%s2649_s1 + $0x44] ss:$8 sm:$0xf] %vm3_vm3, %v1241_v47  }
  0x49   :  { %v1375_v44 = vld [vmem:[%s2648_s0 + $0x186] ss:$16 sm:%s653_s9]   ;;  %v651_v45 = vsel %vm123_vm1, %v1374_v43, %v646_v42  ;;  %s689_s9 = smov 12  ;;  %1243 = vst.msk [vmem:[%s2649_s1 + $0x25] ss:$8 sm:$0xf0] %vm3_vm3, %v1241_v47  }
  0x4a   :  { %v1367_v46 = vld [vmem:[%s2648_s0 + $0x106] ss:$16 sm:%s617_s15]   ;;  %v656_v48 = vsel %vm128_vm2, %v1375_v44, %v651_v45  ;;  %s694_s15 = smov 48  ;;  %v1244_v53 = vld [vmem:[%s2648_s0 + $0x160] ss:$4 sm:$0xff]   ;;  %s928_s5 = smov 192 }
  0x4b   :  { %v1368_v49 = vld [vmem:[%s2648_s0 + $0x106] ss:$16 sm:%s620_s22]   ;;  %657 = vrot.lane.b32.xlu1 %v656_v48, %s1500_s25  ;;  %1245 = vst.msk [vmem:[%s2649_s1 + $0x46] ss:$8 sm:$0xf] %vm3_vm3, %v1244_v53   ;;  %s745_s22 = smov 192 }
  0x4c   :  { %v1369_v50 = vld [vmem:[%s2648_s0 + $0x106] ss:$16 sm:%s625_s23]   ;;  %v623_v51 = vsel %vm118_vm0, %v1368_v49, %v1367_v46  ;;  %s663_s23 = smov 3  ;;  %v1382_v55 = vld [vmem:[%s2648_s0 + $0x8a] ss:$16 sm:%s686_s8]   ;;  %s824_s8 = smov 3 }
  0x4d   :  { %v1370_v52 = vld [vmem:[%s2648_s0 + $0x106] ss:$16 sm:%s630_s4]   ;;  %v628_v54 = vsel %vm123_vm1, %v1369_v50, %v623_v51  ;;  %v1383_v56 = vld [vmem:[%s2648_s0 + $0x8a] ss:$16 sm:%s689_s9]   ;;  %s722_s9 = smov 192  ;;  %s768_s4 = smov 192 }
  0x4e   :  { %1246 = vst.msk [vmem:[%s2649_s1 + $0x27] ss:$8 sm:$0xf0] %vm3_vm3, %v1244_v53   ;;  %v633_v57 = vsel %vm128_vm2, %v1370_v52, %v628_v54  ;;  %v692_v58 = vsel %vm118_vm0, %v1383_v56, %v1382_v55  ;;  %v1384_v59 = vld [vmem:[%s2648_s0 + $0x8a] ss:$16 sm:%s694_s15]   ;;  %s732_s15 = smov 3 }
  0x4f   :  { %v1385_v60 = vld [vmem:[%s2648_s0 + $0x8a] ss:$16 sm:%s699_s16]   ;;  %634 = vrot.lane.b32.xlu0 %v633_v57, %s1500_s25  ;;  %v697_v61 = vsel %vm123_vm1, %v1384_v59, %v692_v58  ;;  %s735_s16 = smov 12  ;;  %s1501_s7 = smov 32  }
  0x50   :  { %v1377_v62 = vld [vmem:[%s2648_s0 + $0xa] ss:$16 sm:%s663_s23]   ;;  %v702_v63 = vsel %vm128_vm2, %v1385_v60, %v697_v61  ;;  %v1402_v19 = vld [vmem:[%s2648_s0 + $0x8e] ss:$16 sm:%s778_s11]   ;;  %s809_s23 = smov 48  ;;  %s905_s20 = smov 192 }
  0x51   :  { %v1378_v0 = vld [vmem:[%s2648_s0 + $0xa] ss:$16 sm:%s666_s2]   ;;  %703 = vrot.lane.b32.xlu1 %v702_v63, %s1500_s25  ;;  %s712_s2 = smov 12  ;;  %s974_s30 = smov 192 }
  0x52   :  { %v1379_v1 = vld [vmem:[%s2648_s0 + $0xa] ss:$16 sm:%s671_s3]   ;;  %v669_v2 = vsel %vm118_vm0, %v1378_v0, %v1377_v62  ;;  %s717_s3 = smov 48  ;;  %v1404_v23 = vld [vmem:[%s2648_s0 + $0x8e] ss:$16 sm:%s786_s17]   ;;  %s801_s17 = smov 3 }
  0x53   :  { %v1380_v3 = vld [vmem:[%s2648_s0 + $0xa] ss:$16 sm:%s676_s12]   ;;  %v674_v4 = vsel %vm123_vm1, %v1379_v1, %v669_v2  ;;  %s781_s12 = smov 12  ;;  %v1405_v24 = vld [vmem:[%s2648_s0 + $0x8e] ss:$16 sm:%s791_s18]   ;;  %s850_s18 = smov 12 }
  0x54   :  { %v1392_v5 = vld [vmem:[%s2648_s0 + $0x18a] ss:$16 sm:%s732_s15]   ;;  %v679_v7 = vsel %vm128_vm2, %v1380_v3, %v674_v4  ;;  %v1403_v20 = vld [vmem:[%s2648_s0 + $0x8e] ss:$16 sm:%s781_s12]   ;;  %s900_s15 = smov 48  ;;  %s946_s11 = smov 48 }
  0x55   :  { %v1393_v6 = vld [vmem:[%s2648_s0 + $0x18a] ss:$16 sm:%s735_s16]   ;;  %680 = vrot.lane.b32.xlu0 %v679_v7, %s1500_s25  ;;  %v784_v22 = vsel %vm118_vm0, %v1403_v20, %v1402_v19  ;;  %s951_s16 = smov 192  ;;  %s997_s12 = smov 192 }
  0x56   :  { %v738_v8 = vsel %vm118_vm0, %v1393_v6, %v1392_v5  ;;  %v1394_v9 = vld [vmem:[%s2648_s0 + $0x18a] ss:$16 sm:%s740_s21]   ;;  %s755_s21 = smov 3  ;;  %v789_v25 = vsel %vm123_vm1, %v1404_v23, %v784_v22  ;;  %v1398_v28 = vld [vmem:[%s2648_s0 + $0xe] ss:$16 sm:%s758_s27]   ;;  %s915_s27 = smov 3 }
  0x57   :  { %v1395_v10 = vld [vmem:[%s2648_s0 + $0x18a] ss:$16 sm:%s745_s22]   ;;  %v743_v11 = vsel %vm123_vm1, %v1394_v9, %v738_v8  ;;  %v1397_v26 = vld [vmem:[%s2648_s0 + $0xe] ss:$16 sm:%s755_s21]   ;;  %v794_v27 = vsel %vm128_vm2, %v1405_v24, %v789_v25  ;;  %s804_s22 = smov 12  ;;  %s1061_s21 = smov 48 }
  0x58   :  { %v1387_v12 = vld [vmem:[%s2648_s0 + $0x10a] ss:$16 sm:%s709_s26]   ;;  %v748_v13 = vsel %vm128_vm2, %v1395_v10, %v743_v11  ;;  %v1399_v29 = vld [vmem:[%s2648_s0 + $0xe] ss:$16 sm:%s763_s28]   ;;  %v761_v30 = vsel %vm118_vm0, %v1398_v28, %v1397_v26  ;;  %s918_s28 = smov 12  ;;  %s1020_s26 = smov 192 }
  0x59   :  { %v1388_v14 = vld [vmem:[%s2648_s0 + $0x10a] ss:$16 sm:%s712_s2]   ;;  %749 = vrot.lane.b32.xlu1 %v748_v13, %s1500_s25  ;;  %v766_v32 = vsel %vm123_vm1, %v1399_v29, %v761_v30  ;;  %s1038_s2 = smov 48 }
  0x5a   :  { %v1389_v15 = vld [vmem:[%s2648_s0 + $0x10a] ss:$16 sm:%s717_s3]   ;;  %v715_v16 = vsel %vm118_vm0, %v1388_v14, %v1387_v12  ;;  %v1400_v31 = vld [vmem:[%s2648_s0 + $0xe] ss:$16 sm:%s768_s4]   ;;  %s869_s3 = smov 3  ;;  %s872_s4 = smov 12 }
  0x5b   :  { %v1390_v17 = vld [vmem:[%s2648_s0 + $0x10a] ss:$16 sm:%s722_s9]   ;;  %v720_v18 = vsel %vm123_vm1, %v1389_v15, %v715_v16  ;;  %s827_s9 = smov 12  ;;  %v1412_v33 = vld [vmem:[%s2648_s0 + $0x18e] ss:$16 sm:%s824_s8]   ;;  %v771_v35 = vsel %vm128_vm2, %v1400_v31, %v766_v32  ;;  %s992_s8 = smov 48 }
  0x5c   :  { %v725_v21 = vsel %vm128_vm2, %v1390_v17, %v720_v18  ;;  %v1413_v34 = vld [vmem:[%s2648_s0 + $0x18e] ss:$16 sm:%s827_s9]   ;;  %v1421_v47 = vld [vmem:[%s2648_s0 + $0x81] ss:$16 sm:%s869_s3]   ;;  %s1043_s9 = smov 192  ;;  %s1089_s3 = smov 192 }
  0x5d   :  { %726 = vrot.lane.b32.xlu0 %v725_v21, %s1500_s25  ;;  %795 = vrot.lane.b32.xlu1 %v794_v27, %s1500_s25  ;;  %v830_v36 = vsel %vm118_vm0, %v1413_v34, %v1412_v33  ;;  %v1414_v37 = vld [vmem:[%s2648_s0 + $0x18e] ss:$16 sm:%s832_s13]   ;;  %s847_s13 = smov 3 }
  0x5e   :  { %v1415_v38 = vld [vmem:[%s2648_s0 + $0x18e] ss:$16 sm:%s837_s14]   ;;  %v835_v39 = vsel %vm123_vm1, %v1414_v37, %v830_v36  ;;  %v1422_v48 = vld [vmem:[%s2648_s0 + $0x81] ss:$16 sm:%s872_s4]   ;;  %s923_s4 = smov 48  ;;  %s895_s14 = smov 12 }
  0x5f   :  { %v1407_v40 = vld [vmem:[%s2648_s0 + $0x10e] ss:$16 sm:%s801_s17]   ;;  %v840_v41 = vsel %vm128_vm2, %v1415_v38, %v835_v39  ;;  %v875_v50 = vsel %vm118_vm0, %v1422_v48, %v1421_v47  ;;  %v1423_v51 = vld [vmem:[%s2648_s0 + $0x81] ss:$16 sm:%s877_s6]   ;;  %s892_s6 = smov 3  ;;  %s1107_s17 = smov 48 }
  0x60   :  { %v1408_v42 = vld [vmem:[%s2648_s0 + $0x10e] ss:$16 sm:%s804_s22]   ;;  %v1424_v52 = vld [vmem:[%s2648_s0 + $0x81] ss:$16 sm:%s882_s10]   ;;  %v880_v53 = vsel %vm123_vm1, %v1423_v51, %v875_v50  ;;  %s941_s10 = smov 12  ;;  %s1066_s22 = smov 192 }
  0x61   :  { %772 = vrot.lane.b32.xlu0 %v771_v35, %s1500_s25  ;;  %v1409_v43 = vld [vmem:[%s2648_s0 + $0x10e] ss:$16 sm:%s809_s23]   ;;  %841 = vrot.lane.b32.xlu1 %v840_v41, %s1500_s25  ;;  %v807_v44 = vsel %vm118_vm0, %v1408_v42, %v1407_v40  ;;  %v885_v55 = vsel %vm128_vm2, %v1424_v52, %v880_v53  ;;  %s961_s23 = smov 3 }
  0x62   :  { %v1410_v45 = vld [vmem:[%s2648_s0 + $0x10e] ss:$16 sm:%s814_s29]   ;;  %v812_v46 = vsel %vm123_vm1, %v1409_v43, %v807_v44  ;;  %v1417_v54 = vld [vmem:[%s2648_s0 + $0x1] ss:$16 sm:%s847_s13]   ;;  %s969_s29 = smov 48  ;;  %s1153_s13 = smov 48 }
  0x63   :  { %v817_v49 = vsel %vm128_vm2, %v1410_v45, %v812_v46  ;;  %v1418_v56 = vld [vmem:[%s2648_s0 + $0x1] ss:$16 sm:%s850_s18]   ;;  %v1441_v11 = vld [vmem:[%s2648_s0 + $0x85] ss:$16 sm:%s961_s23]   ;;  %s1112_s18 = smov 192  ;;  %s1130_s23 = smov 48 }
  0x64   :  { %v1419_v57 = vld [vmem:[%s2648_s0 + $0x1] ss:$16 sm:%s855_s19]   ;;  %v853_v58 = vsel %vm118_vm0, %v1418_v56, %v1417_v54  ;;  %v1443_v15 = vld [vmem:[%s2648_s0 + $0x85] ss:$16 sm:%s969_s29]   ;;  %s1007_s19 = smov 3  ;;  %s984_s29 = smov 3 }
  0x65   :  { %818 = vrot.lane.b32.xlu0 %v817_v49, %s1500_s25  ;;  %886 = vrot.lane.b32.xlu1 %v885_v55, %s1501_s7  ;;  %v1420_v59 = vld [vmem:[%s2648_s0 + $0x1] ss:$16 sm:%s860_s24]   ;;  %v858_v60 = vsel %vm123_vm1, %v1419_v57, %v853_v58  ;;  %s964_s24 = smov 12  ;;  %s1015_s25 = smov 48 }
  0x66   :  { %v1431_v61 = vld [vmem:[%s2648_s0 + $0x181] ss:$16 sm:%s915_s27]   ;;  %v863_v63 = vsel %vm128_vm2, %v1420_v59, %v858_v60  ;;  %v1442_v12 = vld [vmem:[%s2648_s0 + $0x85] ss:$16 sm:%s964_s24]   ;;  %s1084_s27 = smov 48  ;;  %s1181_s24 = smov 192 }
  0x67   :  { %v1432_v62 = vld [vmem:[%s2648_s0 + $0x181] ss:$16 sm:%s918_s28]   ;;  %v967_v14 = vsel %vm118_vm0, %v1442_v12, %v1441_v11  ;;  %v1444_v16 = vld [vmem:[%s2648_s0 + $0x85] ss:$16 sm:%s974_s30]   ;;  %s1033_s30 = smov 12  ;;  %s1135_s28 = smov 192 }
  0x68   :  { %v921_v0 = vsel %vm118_vm0, %v1432_v62, %v1431_v61  ;;  %v1433_v1 = vld [vmem:[%s2648_s0 + $0x181] ss:$16 sm:%s923_s4]   ;;  %s938_s4 = smov 3  ;;  %v972_v17 = vsel %vm123_vm1, %v1443_v15, %v967_v14  ;;  %v1437_v20 = vld [vmem:[%s2648_s0 + $0x5] ss:$16 sm:%s941_s10]   ;;  %s1204_s10 = smov 192 }
  0x69   :  { %v1434_v2 = vld [vmem:[%s2648_s0 + $0x181] ss:$16 sm:%s928_s5]   ;;  %864 = vrot.lane.b32.xlu0 %v863_v63, %s1501_s7  ;;  %v926_v3 = vsel %vm123_vm1, %v1433_v1, %v921_v0  ;;  %v977_v19 = vsel %vm128_vm2, %v1444_v16, %v972_v17  ;;  %s987_s5 = smov 12 }
  0x6a   :  { %v1426_v4 = vld [vmem:[%s2648_s0 + $0x101] ss:$16 sm:%s892_s6]   ;;  %v931_v5 = vsel %vm128_vm2, %v1434_v2, %v926_v3  ;;  %v1436_v18 = vld [vmem:[%s2648_s0 + $0x5] ss:$16 sm:%s938_s4]   ;;  %s1199_s6 = smov 48 }
  0x6b   :  { %v1427_v6 = vld [vmem:[%s2648_s0 + $0x101] ss:$16 sm:%s895_s14]   ;;  %932 = vrot.lane.b32.xlu1 %v931_v5, %s1501_s7  ;;  %v944_v22 = vsel %vm118_vm0, %v1437_v20, %v1436_v18  ;;  %s1158_s14 = smov 192 }
  0x6c   :  { %v1428_v7 = vld [vmem:[%s2648_s0 + $0x101] ss:$16 sm:%s900_s15]   ;;  %v898_v8 = vsel %vm118_vm0, %v1427_v6, %v1426_v4  ;;  %v1438_v21 = vld [vmem:[%s2648_s0 + $0x5] ss:$16 sm:%s946_s11]   ;;  %s1053_s15 = smov 3  ;;  %s1099_s11 = smov 3 }
  0x6d   :  { %v1429_v9 = vld [vmem:[%s2648_s0 + $0x101] ss:$16 sm:%s905_s20]   ;;  %v903_v10 = vsel %vm123_vm1, %v1428_v7, %v898_v8  ;;  %s1010_s20 = smov 12  ;;  %v1439_v23 = vld [vmem:[%s2648_s0 + $0x5] ss:$16 sm:%s951_s16]   ;;  %v949_v24 = vsel %vm123_vm1, %v1438_v21, %v944_v22  ;;  %s1056_s16 = smov 12 }
  0x6e   :  { %v908_v13 = vsel %vm128_vm2, %v1429_v9, %v903_v10  ;;  %v1451_v25 = vld [vmem:[%s2648_s0 + $0x185] ss:$16 sm:%s1007_s19]   ;;  %v954_v27 = vsel %vm128_vm2, %v1439_v23, %v949_v24  ;;  %v1461_v39 = vld [vmem:[%s2648_s0 + $0x89] ss:$16 sm:%s1053_s15]   ;;  %s1176_s19 = smov 48 }
  0x6f   :  { %909 = vrot.lane.b32.xlu0 %v908_v13, %s1501_s7  ;;  %978 = vrot.lane.b32.xlu1 %v977_v19, %s1501_s7  ;;  %v1452_v26 = vld [vmem:[%s2648_s0 + $0x185] ss:$16 sm:%s1010_s20]  }
  0x70   :  { %v1013_v28 = vsel %vm118_vm0, %v1452_v26, %v1451_v25  ;;  %v1453_v29 = vld [vmem:[%s2648_s0 + $0x185] ss:$16 sm:%s1015_s25]   ;;  %s1030_s25 = smov 3  ;;  %v1462_v40 = vld [vmem:[%s2648_s0 + $0x89] ss:$16 sm:%s1056_s16]  }
  0x71   :  { %v1454_v30 = vld [vmem:[%s2648_s0 + $0x185] ss:$16 sm:%s1020_s26]   ;;  %v1018_v31 = vsel %vm123_vm1, %v1453_v29, %v1013_v28  ;;  %v1059_v42 = vsel %vm118_vm0, %v1462_v40, %v1461_v39  ;;  %v1463_v43 = vld [vmem:[%s2648_s0 + $0x89] ss:$16 sm:%s1061_s21]   ;;  %s1076_s21 = smov 3  ;;  %s1079_s26 = smov 12 }
  0x72   :  { %v1446_v32 = vld [vmem:[%s2648_s0 + $0x105] ss:$16 sm:%s984_s29]   ;;  %v1023_v33 = vsel %vm128_vm2, %v1454_v30, %v1018_v31  ;;  %v1464_v44 = vld [vmem:[%s2648_s0 + $0x89] ss:$16 sm:%s1066_s22]   ;;  %v1064_v45 = vsel %vm123_vm1, %v1463_v43, %v1059_v42  ;;  %s1125_s22 = smov 12 }
  0x73   :  { %955 = vrot.lane.b32.xlu0 %v954_v27, %s1501_s7  ;;  %v1447_v34 = vld [vmem:[%s2648_s0 + $0x105] ss:$16 sm:%s987_s5]   ;;  %1024 = vrot.lane.b32.xlu1 %v1023_v33, %s1501_s7  ;;  %v1069_v47 = vsel %vm128_vm2, %v1464_v44, %v1064_v45 }
  0x74   :  { %v1448_v35 = vld [vmem:[%s2648_s0 + $0x105] ss:$16 sm:%s992_s8]   ;;  %v990_v36 = vsel %vm118_vm0, %v1447_v34, %v1446_v32  ;;  %v1456_v46 = vld [vmem:[%s2648_s0 + $0x9] ss:$16 sm:%s1030_s25]   ;;  %s1145_s8 = smov 3 }
  0x75   :  { %v1449_v37 = vld [vmem:[%s2648_s0 + $0x105] ss:$16 sm:%s997_s12]   ;;  %v995_v38 = vsel %vm123_vm1, %v1448_v35, %v990_v36  ;;  %s1102_s12 = smov 12  ;;  %v1457_v48 = vld [vmem:[%s2648_s0 + $0x9] ss:$16 sm:%s1033_s30]  }
  0x76   :  { %v1000_v41 = vsel %vm128_vm2, %v1449_v37, %v995_v38  ;;  %v1458_v49 = vld [vmem:[%s2648_s0 + $0x9] ss:$16 sm:%s1038_s2]   ;;  %v1036_v50 = vsel %vm118_vm0, %v1457_v48, %v1456_v46  ;;  %v1481_v3 = vld [vmem:[%s2648_s0 + $0x8d] ss:$16 sm:%s1145_s8]   ;;  %s1191_s2 = smov 3 }
  0x77   :  { %1001 = vrot.lane.b32.xlu0 %v1000_v41, %s1501_s7  ;;  %1070 = vrot.lane.b32.xlu1 %v1069_v47, %s1501_s7  ;;  %v1459_v51 = vld [vmem:[%s2648_s0 + $0x9] ss:$16 sm:%s1043_s9]   ;;  %v1041_v52 = vsel %vm123_vm1, %v1458_v49, %v1036_v50  ;;  %s1148_s9 = smov 12 }
  0x78   :  { %v1471_v53 = vld [vmem:[%s2648_s0 + $0x189] ss:$16 sm:%s1099_s11]   ;;  %v1046_v55 = vsel %vm128_vm2, %v1459_v51, %v1041_v52  ;;  %v1482_v4 = vld [vmem:[%s2648_s0 + $0x8d] ss:$16 sm:%s1148_s9]   ;;  %v176_v30 = vpop.permute.xlu1 %175  }
  0x79   :  { %v1472_v54 = vld [vmem:[%s2648_s0 + $0x189] ss:$16 sm:%s1102_s12]   ;;  %v1151_v6 = vsel %vm118_vm0, %v1482_v4, %v1481_v3  ;;  %v1483_v7 = vld [vmem:[%s2648_s0 + $0x8d] ss:$16 sm:%s1153_s13]   ;;  %s1168_s13 = smov 3 }
  0x7a   :  { %v1105_v56 = vsel %vm118_vm0, %v1472_v54, %v1471_v53  ;;  %v1473_v57 = vld [vmem:[%s2648_s0 + $0x189] ss:$16 sm:%s1107_s17]   ;;  %s1122_s17 = smov 3  ;;  %v1484_v8 = vld [vmem:[%s2648_s0 + $0x8d] ss:$16 sm:%s1158_s14]   ;;  %v1156_v9 = vsel %vm123_vm1, %v1483_v7, %v1151_v6 }
  0x7b   :  { %v1474_v58 = vld [vmem:[%s2648_s0 + $0x189] ss:$16 sm:%s1112_s18]   ;;  %1047 = vrot.lane.b32.xlu0 %v1046_v55, %s1501_s7  ;;  %v1110_v59 = vsel %vm123_vm1, %v1473_v57, %v1105_v56  ;;  %v1161_v11 = vsel %vm128_vm2, %v1484_v8, %v1156_v9  ;;  %s1171_s18 = smov 12  ;;  %1272 = vst.msk [vmem:[%s2649_s1 + $0x40] sm:$0xff] %vm132_vm4, %v176_v30  }
  0x7c   :  { %v1466_v60 = vld [vmem:[%s2648_s0 + $0x109] ss:$16 sm:%s1076_s21]   ;;  %v1115_v61 = vsel %vm128_vm2, %v1474_v58, %v1110_v59  ;;  %v1476_v10 = vld [vmem:[%s2648_s0 + $0xd] ss:$16 sm:%s1122_s17]   ;;  %v131_v33 = vpop.permute.xlu0 %130  }
  0x7d   :  { %v1467_v62 = vld [vmem:[%s2648_s0 + $0x109] ss:$16 sm:%s1079_s26]   ;;  %1116 = vrot.lane.b32.xlu1 %v1115_v61, %s1501_s7  ;;  %133 = vst.msk [vmem:[%s2649_s1] sm:$0xff] %vm132_vm4, %v131_v33  }
  0x7e   :  { %v1468_v63 = vld [vmem:[%s2648_s0 + $0x109] ss:$16 sm:%s1084_s27]   ;;  %v1082_v0 = vsel %vm118_vm0, %v1467_v62, %v1466_v60  ;;  %v1477_v12 = vld [vmem:[%s2648_s0 + $0xd] ss:$16 sm:%s1125_s22]  }
  0x7f   :  { %v1469_v1 = vld [vmem:[%s2648_s0 + $0x109] ss:$16 sm:%s1089_s3]   ;;  %v1087_v2 = vsel %vm123_vm1, %v1468_v63, %v1082_v0  ;;  %s1194_s3 = smov 12  ;;  %v1478_v13 = vld [vmem:[%s2648_s0 + $0xd] ss:$16 sm:%s1130_s23]   ;;  %v1128_v14 = vsel %vm118_vm0, %v1477_v12, %v1476_v10 }
  0x80   :  { %v1092_v5 = vsel %vm128_vm2, %v1469_v1, %v1087_v2  ;;  %v1479_v15 = vld [vmem:[%s2648_s0 + $0xd] ss:$16 sm:%s1135_s28]   ;;  %v1133_v16 = vsel %vm123_vm1, %v1478_v13, %v1128_v14  ;;  %v199_v34 = vpop.permute.xlu1 %198  }
  0x81   :  { %1093 = vrot.lane.b32.xlu0 %v1092_v5, %s1501_s7  ;;  %1162 = vrot.lane.b32.xlu1 %v1161_v11, %s1501_s7  ;;  %v1491_v17 = vld [vmem:[%s2648_s0 + $0x18d] ss:$16 sm:%s1191_s2]   ;;  %v1138_v19 = vsel %vm128_vm2, %v1479_v15, %v1133_v16 }
  0x82   :  { %v1492_v18 = vld [vmem:[%s2648_s0 + $0x18d] ss:$16 sm:%s1194_s3]   ;;  %1277 = vst.msk [vmem:[%s2649_s1 + $0x60] sm:$0xff] %vm132_vm4, %v199_v34  }
  0x83   :  { %v1197_v20 = vsel %vm118_vm0, %v1492_v18, %v1491_v17  ;;  %v1493_v21 = vld [vmem:[%s2648_s0 + $0x18d] ss:$16 sm:%s1199_s6]  }
  0x84   :  { %v1494_v22 = vld [vmem:[%s2648_s0 + $0x18d] ss:$16 sm:%s1204_s10]   ;;  %v1202_v23 = vsel %vm123_vm1, %v1493_v21, %v1197_v20  ;;  %v153_v35 = vpop.permute.xlu0 %152   ;;  %v245_v36 = vpop.permute.xlu1 %244  }
  0x85   :  { %1139 = vrot.lane.b32.xlu0 %v1138_v19, %s1501_s7  ;;  %v1486_v24 = vld [vmem:[%s2648_s0 + $0x10d] ss:$16 sm:%s1168_s13]   ;;  %v1207_v25 = vsel %vm128_vm2, %v1494_v22, %v1202_v23  ;;  %1267 = vst.msk [vmem:[%s2649_s1 + $0x20] sm:$0xff] %vm132_vm4, %v153_v35  }
  0x86   :  { %v1487_v26 = vld [vmem:[%s2648_s0 + $0x10d] ss:$16 sm:%s1171_s18]   ;;  %1208 = vrot.lane.b32.xlu1 %v1207_v25, %s1501_s7  ;;  %1287 = vst.msk [vmem:[%s2649_s1 + $0x28] sm:$0xff] %vm132_vm4, %v245_v36  }
  0x87   :  { %v1488_v27 = vld [vmem:[%s2648_s0 + $0x10d] ss:$16 sm:%s1176_s19]   ;;  %v1174_v28 = vsel %vm118_vm0, %v1487_v26, %v1486_v24 }
  0x88   :  { %v1489_v29 = vld [vmem:[%s2648_s0 + $0x10d] ss:$16 sm:%s1181_s24]   ;;  %v1179_v31 = vsel %vm123_vm1, %v1488_v27, %v1174_v28  ;;  %v222_v37 = vpop.permute.xlu0 %221  }
  0x89   :  { %v1184_v32 = vsel %vm128_vm2, %v1489_v29, %v1179_v31  ;;  %1282 = vst.msk [vmem:[%s2649_s1 + $0x8] sm:$0xff] %vm132_vm4, %v222_v37  }
  0x8a   :  { %1185 = vrot.lane.b32.xlu0 %v1184_v32, %s1501_s7  ;;  %v291_v38 = vpop.permute.xlu1 %290  }
  0x8b   :  { %1297 = vst.msk [vmem:[%s2649_s1 + $0x68] sm:$0xff] %vm132_vm4, %v291_v38  }
  0x8e   :  { %v268_v39 = vpop.permute.xlu0 %267   ;;  %v337_v40 = vpop.permute.xlu1 %336  }
  0x8f   :  { %1292 = vst.msk [vmem:[%s2649_s1 + $0x48] sm:$0xff] %vm132_vm4, %v268_v39   ;;  %1307 = vst.msk [vmem:[%s2649_s1 + $0x30] sm:$0xff] %vm132_vm4, %v337_v40  }
  0x92   :  { %v314_v41 = vpop.permute.xlu0 %313  }
  0x93   :  { %1302 = vst.msk [vmem:[%s2649_s1 + $0x10] sm:$0xff] %vm132_vm4, %v314_v41  }
  0x95   :  { %v383_v42 = vpop.permute.xlu1 %382  }
  0x96   :  { %1317 = vst.msk [vmem:[%s2649_s1 + $0x70] sm:$0xff] %vm132_vm4, %v383_v42  }
  0x99   :  { %v360_v43 = vpop.permute.xlu0 %359   ;;  %v429_v44 = vpop.permute.xlu1 %428  }
  0x9a   :  { %1312 = vst.msk [vmem:[%s2649_s1 + $0x50] sm:$0xff] %vm132_vm4, %v360_v43   ;;  %1327 = vst.msk [vmem:[%s2649_s1 + $0x38] sm:$0xff] %vm132_vm4, %v429_v44  }
  0x9d   :  { %v406_v45 = vpop.permute.xlu0 %405  }
  0x9e   :  { %1322 = vst.msk [vmem:[%s2649_s1 + $0x18] sm:$0xff] %vm132_vm4, %v406_v45  }
  0xa1   :  { %v475_v46 = vpop.permute.xlu1 %474  }
  0xa2   :  { %1337 = vst.msk [vmem:[%s2649_s1 + $0x78] sm:$0xff] %vm132_vm4, %v475_v46  }
  0xa5   :  { %v452_v47 = vpop.permute.xlu0 %451  }
  0xa6   :  { %1332 = vst.msk [vmem:[%s2649_s1 + $0x58] sm:$0xff] %vm132_vm4, %v452_v47  }
  0xa7   :  { %v520_v48 = vpop.permute.xlu1 %519  }
  0xa8   :  { %1346 = vst.msk [vmem:[%s2649_s1 + $0x20] sm:$0xff] %vm499_vm5, %v520_v48  }
  0xab   :  { %v498_v49 = vpop.permute.xlu0 %497  }
  0xac   :  { %500 = vst.msk [vmem:[%s2649_s1] sm:$0xff] %vm499_vm5, %v498_v49  }
  0xaf   :  { %v566_v50 = vpop.permute.xlu1 %565  }
  0xb0   :  { %1356 = vst.msk [vmem:[%s2649_s1 + $0x60] sm:$0xff] %vm499_vm5, %v566_v50  }
  0xb3   :  { %v543_v51 = vpop.permute.xlu0 %542  }
  0xb4   :  { %1351 = vst.msk [vmem:[%s2649_s1 + $0x40] sm:$0xff] %vm499_vm5, %v543_v51  }
  0xb5   :  { %v612_v52 = vpop.permute.xlu1 %611  }
  0xb6   :  { %1366 = vst.msk [vmem:[%s2649_s1 + $0x28] sm:$0xff] %vm499_vm5, %v612_v52  }
  0xb9   :  { %v589_v53 = vpop.permute.xlu0 %588  }
  0xba   :  { %1361 = vst.msk [vmem:[%s2649_s1 + $0x8] sm:$0xff] %vm499_vm5, %v589_v53  }
  0xbd   :  { %v658_v54 = vpop.permute.xlu1 %657  }
  0xbe   :  { %1376 = vst.msk [vmem:[%s2649_s1 + $0x68] sm:$0xff] %vm499_vm5, %v658_v54  }
  0xc1   :  { %v635_v55 = vpop.permute.xlu0 %634  }
  0xc2   :  { %1371 = vst.msk [vmem:[%s2649_s1 + $0x48] sm:$0xff] %vm499_vm5, %v635_v55  }
  0xc3   :  { %v704_v56 = vpop.permute.xlu1 %703  }
  0xc4   :  { %1386 = vst.msk [vmem:[%s2649_s1 + $0x30] sm:$0xff] %vm499_vm5, %v704_v56  }
  0xc7   :  { %v681_v57 = vpop.permute.xlu0 %680  }
  0xc8   :  { %1381 = vst.msk [vmem:[%s2649_s1 + $0x10] sm:$0xff] %vm499_vm5, %v681_v57  }
  0xcb   :  { %v750_v58 = vpop.permute.xlu1 %749  }
  0xcc   :  { %1396 = vst.msk [vmem:[%s2649_s1 + $0x70] sm:$0xff] %vm499_vm5, %v750_v58  }
  0xcf   :  { %v727_v59 = vpop.permute.xlu0 %726   ;;  %v796_v60 = vpop.permute.xlu1 %795  }
  0xd0   :  { %1391 = vst.msk [vmem:[%s2649_s1 + $0x50] sm:$0xff] %vm499_vm5, %v727_v59   ;;  %1406 = vst.msk [vmem:[%s2649_s1 + $0x38] sm:$0xff] %vm499_vm5, %v796_v60  }
  0xd3   :  { %v773_v61 = vpop.permute.xlu0 %772   ;;  %v842_v62 = vpop.permute.xlu1 %841  }
  0xd4   :  { %1401 = vst.msk [vmem:[%s2649_s1 + $0x18] sm:$0xff] %vm499_vm5, %v773_v61   ;;  %1416 = vst.msk [vmem:[%s2649_s1 + $0x78] sm:$0xff] %vm499_vm5, %v842_v62  }
  0xd7   :  { %v819_v63 = vpop.permute.xlu0 %818   ;;  %v887_v0 = vpop.permute.xlu1 %886  }
  0xd8   :  { %1411 = vst.msk [vmem:[%s2649_s1 + $0x58] sm:$0xff] %vm499_vm5, %v819_v63  }
  0xd9   :  { %1425 = vst.msk [vmem:[%s2649_s1 + $0x20] sm:$0xff] %vm866_vm6, %v887_v0  }
  0xdb   :  { %v865_v1 = vpop.permute.xlu0 %864  }
  0xdc   :  { %867 = vst.msk [vmem:[%s2649_s1] sm:$0xff] %vm866_vm6, %v865_v1  }
  0xdd   :  { %v933_v2 = vpop.permute.xlu1 %932  }
  0xde   :  { %1435 = vst.msk [vmem:[%s2649_s1 + $0x60] sm:$0xff] %vm866_vm6, %v933_v2  }
  0xe1   :  { %v910_v3 = vpop.permute.xlu0 %909   ;;  %v979_v4 = vpop.permute.xlu1 %978  }
  0xe2   :  { %1430 = vst.msk [vmem:[%s2649_s1 + $0x40] sm:$0xff] %vm866_vm6, %v910_v3   ;;  %1445 = vst.msk [vmem:[%s2649_s1 + $0x28] sm:$0xff] %vm866_vm6, %v979_v4  }
  0xe5   :  { %v956_v5 = vpop.permute.xlu0 %955   ;;  %v1025_v6 = vpop.permute.xlu1 %1024  }
  0xe6   :  { %1440 = vst.msk [vmem:[%s2649_s1 + $0x8] sm:$0xff] %vm866_vm6, %v956_v5   ;;  %1455 = vst.msk [vmem:[%s2649_s1 + $0x68] sm:$0xff] %vm866_vm6, %v1025_v6  }
  0xe9   :  { %v1002_v7 = vpop.permute.xlu0 %1001   ;;  %v1071_v8 = vpop.permute.xlu1 %1070  }
  0xea   :  { %1450 = vst.msk [vmem:[%s2649_s1 + $0x48] sm:$0xff] %vm866_vm6, %v1002_v7   ;;  %1465 = vst.msk [vmem:[%s2649_s1 + $0x30] sm:$0xff] %vm866_vm6, %v1071_v8  }
  0xed   :  { %v1048_v9 = vpop.permute.xlu0 %1047  }
  0xee   :  { %1460 = vst.msk [vmem:[%s2649_s1 + $0x10] sm:$0xff] %vm866_vm6, %v1048_v9  }
  0xef   :  { %v1117_v10 = vpop.permute.xlu1 %1116  }
  0xf0   :  { %1475 = vst.msk [vmem:[%s2649_s1 + $0x70] sm:$0xff] %vm866_vm6, %v1117_v10  }
  0xf3   :  { %v1094_v11 = vpop.permute.xlu0 %1093   ;;  %v1163_v12 = vpop.permute.xlu1 %1162  }
  0xf4   :  { %1470 = vst.msk [vmem:[%s2649_s1 + $0x50] sm:$0xff] %vm866_vm6, %v1094_v11   ;;  %1485 = vst.msk [vmem:[%s2649_s1 + $0x38] sm:$0xff] %vm866_vm6, %v1163_v12  }
  0xf7   :  { %v1140_v13 = vpop.permute.xlu0 %1139  }
  0xf8   :  { %1480 = vst.msk [vmem:[%s2649_s1 + $0x18] sm:$0xff] %vm866_vm6, %v1140_v13   ;;  %v1209_v14 = vpop.permute.xlu1 %1208  }
  0xf9   :  { %1495 = vst.msk [vmem:[%s2649_s1 + $0x78] sm:$0xff] %vm866_vm6, %v1209_v14  }
  0xfc   :  { %v1186_v15 = vpop.permute.xlu0 %1185  }
  0xfd   :  { %1490 = vst.msk [vmem:[%s2649_s1 + $0x58] sm:$0xff] %vm866_vm6, %v1186_v15  }

// kernel: decoder_block_forward.4
= control target key start
LH: loop header
LB: loop body
LE: loop exit
PB: predicated region body
PF: predicated region fallthrough
CT: control target
= control target key end

     0   :  { %s3811_s21 = smov 0   ;;  %s6306_s0 = inlined_call_operand.vmem [shape: f32[2,16,512], index: 0, kind: input, shape index: {}]   ;;  %s6307_s1 = inlined_call_operand.vmem [shape: f32[1,512], index: 1, kind: input, shape index: {}]   ;;  %s6308_s2 = inlined_call_operand.vmem [shape: f32[1,512], index: 2, kind: input, shape index: {}]   ;;  %s6309_s3 = inlined_call_operand.vmem [shape: f32[3,512,512], index: 3, kind: input, shape index: {}]   ;;  %s6310_s4 = inlined_call_operand.vmem [shape: f32[1,512], index: 4, kind: input, shape index: {}]   ;;  %s6311_s5 = inlined_call_operand.vmem [shape: f32[2,16,512], index: 5, kind: output, shape index: {0}]   ;;  %s6312_s6 = inlined_call_operand.vmem [shape: f32[2,2,512], index: 6, kind: output, shape index: {1}]  }
   0x1 LB: > { %s2416_s22 = sadd.s32 4294967295, %s3772_s21   ;;  %p2420_p0 = scmp.ge.s32.totalorder %s3772_s21, 1  ;;  %s3772_s21 = sphi %s3811_s21, %s17_s21  }
   0x2   : > { %p215_p1 = scmp.lt.s32.totalorder %s3772_s21, 3 }
   0x4   : > { %p216_p2 = pnand %p2420_p0, %p215_p1 }
   0x5   : > { %v2428_v0 = vld [vmem:[%s6309_s3 + $0x808] sm:$0xff] (!%p216_p2)  ;;  %v2430_v2 = vld [vmem:[%s6309_s3 + $0x818] sm:$0xff] (!%p216_p2)  ;;  %v2427_v5 = vld [vmem:[%s6309_s3 + $0x800] sm:$0xff] (!%p216_p2)  ;;  %p4025_p3 = scmp.lt.s32.totalorder (!%p216_p2), %s2416_s22, 1  ;;  %vm358_vm0 = vcmask (!%p216_p2), 1040384   ;;  %vm936_vm2 = vcmask (!%p216_p2), 1046528  }
   0x6   : > { %219 = sbr.rel (%p216_p2) target bundleno = 638 (0x27e), region = 40  ;;  %v2432_v1 = vld [vmem:[%s6309_s3 + $0x828] sm:$0xff] (!%p216_p2)  ;;  %v2434_v4 = vld [vmem:[%s6309_s3 + $0x838] sm:$0xff] (!%p216_p2)  ;;  %v2431_v6 = vld [vmem:[%s6309_s3 + $0x820] sm:$0xff] (!%p216_p2)  ;;  %vm1854_vm3 = vcmask (!%p216_p2), 1045504  }
   0x7   : > { %v2944_v3 = vpack.c.bf16 (!%p216_p2), %v2432_v1, %v2428_v0  ;;  %v3072_v7 = vpack.c.bf16 (!%p216_p2), %v2434_v4, %v2430_v2  ;;  %v2946_v8 = vpack.c.bf16 (!%p216_p2), %v2431_v6, %v2427_v5  ;;  %v2429_v9 = vld [vmem:[%s6309_s3 + $0x810] sm:$0xff] (!%p216_p2)  ;;  %v2436_v11 = vld [vmem:[%s6309_s3 + $0x848] sm:$0xff] (!%p216_p2)  ;;  %v2438_v14 = vld [vmem:[%s6309_s3 + $0x858] sm:$0xff] (!%p216_p2) }
   0x8   : > { %v2433_v10 = vld [vmem:[%s6309_s3 + $0x830] sm:$0xff] (!%p216_p2)  ;;  %v2440_v13 = vld [vmem:[%s6309_s3 + $0x868] sm:$0xff] (!%p216_p2)  ;;  %v2442_v15 = vld [vmem:[%s6309_s3 + $0x878] sm:$0xff] (!%p216_p2) }
   0x9   : > { %2945 = vmatprep.subr.bf16.mxu0 (!%p216_p2), %v2944_v3  ;;  %v3074_v12 = vpack.c.bf16 (!%p216_p2), %v2433_v10, %v2429_v9  ;;  %3073 = vmatprep.subr.bf16.mxu1 (!%p216_p2), %v3072_v7  ;;  %v2948_v16 = vpack.c.bf16 (!%p216_p2), %v2440_v13, %v2436_v11  ;;  %v3076_v17 = vpack.c.bf16 (!%p216_p2), %v2442_v15, %v2438_v14  ;;  %v2435_v18 = vld [vmem:[%s6309_s3 + $0x840] sm:$0xff] (!%p216_p2)  ;;  %v2437_v20 = vld [vmem:[%s6309_s3 + $0x850] sm:$0xff] (!%p216_p2)  ;;  %v2444_v23 = vld [vmem:[%s6309_s3 + $0x888] sm:$0xff] (!%p216_p2) }
   0xa   : > { %2947 = vmatpush1.bf16.msra.mxu0 (!%p216_p2), %v2946_v8  ;;  %v2439_v19 = vld [vmem:[%s6309_s3 + $0x860] sm:$0xff] (!%p216_p2)  ;;  %v2441_v22 = vld [vmem:[%s6309_s3 + $0x870] sm:$0xff] (!%p216_p2)  ;;  %v2448_v24 = vld [vmem:[%s6309_s3 + $0x8a8] sm:$0xff] (!%p216_p2) }
   0xb   : > { %3075 = vmatpush1.bf16.msra.mxu1 (!%p216_p2), %v3074_v12  ;;  %v2950_v21 = vpack.c.bf16 (!%p216_p2), %v2439_v19, %v2435_v18  ;;  %2949 = vmatprep.subr.bf16.mxu0 (!%p216_p2), %v2948_v16  ;;  %v3078_v25 = vpack.c.bf16 (!%p216_p2), %v2441_v22, %v2437_v20  ;;  %v2952_v26 = vpack.c.bf16 (!%p216_p2), %v2448_v24, %v2444_v23  ;;  %v2446_v27 = vld [vmem:[%s6309_s3 + $0x898] sm:$0xff] (!%p216_p2)  ;;  %v2443_v29 = vld [vmem:[%s6309_s3 + $0x880] sm:$0xff] (!%p216_p2)  ;;  %v2445_v32 = vld [vmem:[%s6309_s3 + $0x890] sm:$0xff] (!%p216_p2) }
   0xc   : > { %3077 = vmatprep.subr.bf16.mxu1 (!%p216_p2), %v3076_v17  ;;  %v2450_v28 = vld [vmem:[%s6309_s3 + $0x8b8] sm:$0xff] (!%p216_p2)  ;;  %v2447_v31 = vld [vmem:[%s6309_s3 + $0x8a0] sm:$0xff] (!%p216_p2)  ;;  %v2449_v33 = vld [vmem:[%s6309_s3 + $0x8b0] sm:$0xff] (!%p216_p2) }
   0xd   : > { %v3080_v30 = vpack.c.bf16 %v2450_v28, %v2446_v27  ;;  %v2954_v34 = vpack.c.bf16 %v2447_v31, %v2443_v29  ;;  %v2452_v35 = vld [vmem:[%s6309_s3 + $0x8c8] sm:$0xff]  ;;  %v2454_v37 = vld [vmem:[%s6309_s3 + $0x8d8] sm:$0xff]  ;;  %v3082_v38 = vpack.c.bf16 %v2449_v33, %v2445_v32  ;;  %v2451_v41 = vld [vmem:[%s6309_s3 + $0x8c0] sm:$0xff]  ;;  %s6315_s22 = smov (!%p4025_p3, %s2416_s22), 1 }
   0xe   : > { %2951 = vmatpush1.bf16.msra.mxu0 %v2950_v21  ;;  %v2456_v36 = vld [vmem:[%s6309_s3 + $0x8e8] sm:$0xff]  ;;  %v2458_v40 = vld [vmem:[%s6309_s3 + $0x8f8] sm:$0xff]  ;;  %v2455_v42 = vld [vmem:[%s6309_s3 + $0x8e0] sm:$0xff]  ;;  %s2941_s14 = sshll.u32 %s6315_s22, 6 }
   0xf   : > { %3079 = vmatpush1.bf16.msra.mxu1 %v3078_v25  ;;  %2953 = vmatprep.subr.bf16.mxu0 %v2952_v26  ;;  %v2956_v39 = vpack.c.bf16 %v2456_v36, %v2452_v35  ;;  %v3084_v43 = vpack.c.bf16 %v2458_v40, %v2454_v37  ;;  %v2453_v44 = vld [vmem:[%s6309_s3 + $0x8d0] sm:$0xff]  ;;  %v2460_v46 = vld [vmem:[%s6309_s3 + $0x908] sm:$0xff]  ;;  %v2462_v48 = vld [vmem:[%s6309_s3 + $0x918] sm:$0xff]  ;;  %v2958_v50 = vpack.c.bf16 %v2455_v42, %v2451_v41  ;;  %s4116_s11 = scalar_lea.vmem %s6306_s0, %s2941_s14  ;;  %s6281_s18 = scalar_lea.vmem %s6311_s5, %s2941_s14 }
  0x10   : > { %3081 = vmatprep.subr.bf16.mxu1 %v3080_v30  ;;  %v2457_v45 = vld [vmem:[%s6309_s3 + $0x8f0] sm:$0xff]  ;;  %v2464_v47 = vld [vmem:[%s6309_s3 + $0x928] sm:$0xff]  ;;  %v2466_v49 = vld [vmem:[%s6309_s3 + $0x938] sm:$0xff]  ;;  %s2943_s14 = sshll.u32 %s6315_s22, 3 }
  0x11   : > { %v3086_v51 = vpack.c.bf16 %v2457_v45, %v2453_v44  ;;  %v2960_v52 = vpack.c.bf16 %v2464_v47, %v2460_v46  ;;  %v2459_v53 = vld [vmem:[%s6309_s3 + $0x900] sm:$0xff]  ;;  %v2461_v55 = vld [vmem:[%s6309_s3 + $0x910] sm:$0xff]  ;;  %v3088_v56 = vpack.c.bf16 %v2466_v49, %v2462_v48  ;;  %v2468_v58 = vld [vmem:[%s6309_s3 + $0x948] sm:$0xff]  ;;  %v265_v47 = vlaneseq  ;;  %s264_s23 = scalar_lea.vmem %s6312_s6, %s2943_s14 }
  0x12   : > { %2955 = vmatpush1.bf16.msra.mxu0 %v2954_v34  ;;  %v2463_v54 = vld [vmem:[%s6309_s3 + $0x920] sm:$0xff]  ;;  %v2465_v57 = vld [vmem:[%s6309_s3 + $0x930] sm:$0xff]  ;;  %v2472_v59 = vld [vmem:[%s6309_s3 + $0x968] sm:$0xff] }
  0x13   : > { %3083 = vmatpush1.bf16.msra.mxu1 %v3082_v38  ;;  %2957 = vmatprep.subr.bf16.mxu0 %v2956_v39  ;;  %v2470_v60 = vld [vmem:[%s6309_s3 + $0x958] sm:$0xff]  ;;  %v2962_v62 = vpack.c.bf16 %v2463_v54, %v2459_v53  ;;  %v3090_v63 = vpack.c.bf16 %v2465_v57, %v2461_v55  ;;  %v2964_v0 = vpack.c.bf16 %v2472_v59, %v2468_v58  ;;  %v2467_v1 = vld [vmem:[%s6309_s3 + $0x940] sm:$0xff]  ;;  %v2469_v3 = vld [vmem:[%s6309_s3 + $0x950] sm:$0xff]  ;;  %vm267_vm1 = vcmp.lt.s32.totalorder %v265_v47, 512 }
  0x14   : > { %3085 = vmatprep.subr.bf16.mxu1 %v3084_v43  ;;  %v2474_v61 = vld [vmem:[%s6309_s3 + $0x978] sm:$0xff]  ;;  %v2471_v2 = vld [vmem:[%s6309_s3 + $0x960] sm:$0xff]  ;;  %v2473_v5 = vld [vmem:[%s6309_s3 + $0x970] sm:$0xff] }
  0x15   : > { %v3092_v4 = vpack.c.bf16 %v2474_v61, %v2470_v60  ;;  %v2476_v6 = vld [vmem:[%s6309_s3 + $0x988] sm:$0xff]  ;;  %v2478_v8 = vld [vmem:[%s6309_s3 + $0x998] sm:$0xff]  ;;  %v2966_v10 = vpack.c.bf16 %v2471_v2, %v2467_v1  ;;  %v3094_v11 = vpack.c.bf16 %v2473_v5, %v2469_v3  ;;  %v2475_v13 = vld [vmem:[%s6309_s3 + $0x980] sm:$0xff]  ;;  %v4085_v60 = vshrl.u32 %v265_v47, 7 }
  0x16   : > { %2959 = vmatpush1.bf16.msra.mxu0 %v2958_v50  ;;  %v2480_v7 = vld [vmem:[%s6309_s3 + $0x9a8] sm:$0xff]  ;;  %v2482_v9 = vld [vmem:[%s6309_s3 + $0x9b8] sm:$0xff]  ;;  %v2479_v14 = vld [vmem:[%s6309_s3 + $0x9a0] sm:$0xff] }
  0x17   : > { %3087 = vmatpush1.bf16.msra.mxu1 %v3086_v51  ;;  %2961 = vmatprep.subr.bf16.mxu0 %v2960_v52  ;;  %v2968_v12 = vpack.c.bf16 %v2480_v7, %v2476_v6  ;;  %v2477_v15 = vld [vmem:[%s6309_s3 + $0x990] sm:$0xff]  ;;  %v3096_v16 = vpack.c.bf16 %v2482_v9, %v2478_v8  ;;  %v2484_v18 = vld [vmem:[%s6309_s3 + $0x9c8] sm:$0xff]  ;;  %v2486_v20 = vld [vmem:[%s6309_s3 + $0x9d8] sm:$0xff]  ;;  %v2970_v22 = vpack.c.bf16 %v2479_v14, %v2475_v13  ;;  %v4131_v13 = vsub.s32 0, %v4085_v60 }
  0x18   : > { %3089 = vmatprep.subr.bf16.mxu1 %v3088_v56  ;;  %v2481_v17 = vld [vmem:[%s6309_s3 + $0x9b0] sm:$0xff]  ;;  %v2488_v19 = vld [vmem:[%s6309_s3 + $0x9e8] sm:$0xff]  ;;  %v2490_v21 = vld [vmem:[%s6309_s3 + $0x9f8] sm:$0xff] }
  0x19   : > { %v3098_v23 = vpack.c.bf16 %v2481_v17, %v2477_v15  ;;  %v2972_v24 = vpack.c.bf16 %v2488_v19, %v2484_v18  ;;  %v2483_v25 = vld [vmem:[%s6309_s3 + $0x9c0] sm:$0xff]  ;;  %v2485_v27 = vld [vmem:[%s6309_s3 + $0x9d0] sm:$0xff]  ;;  %v3100_v28 = vpack.c.bf16 %v2490_v21, %v2486_v20  ;;  %v2492_v30 = vld [vmem:[%s6309_s3 + $0xa08] sm:$0xff] }
  0x1a   : > { %2963 = vmatpush1.bf16.msra.mxu0 %v2962_v62  ;;  %v2487_v26 = vld [vmem:[%s6309_s3 + $0x9e0] sm:$0xff]  ;;  %v2489_v29 = vld [vmem:[%s6309_s3 + $0x9f0] sm:$0xff]  ;;  %v2496_v31 = vld [vmem:[%s6309_s3 + $0xa28] sm:$0xff] }
  0x1b   : > { %3091 = vmatpush1.bf16.msra.mxu1 %v3090_v63  ;;  %2965 = vmatprep.subr.bf16.mxu0 %v2964_v0  ;;  %v2494_v32 = vld [vmem:[%s6309_s3 + $0xa18] sm:$0xff]  ;;  %v2974_v34 = vpack.c.bf16 %v2487_v26, %v2483_v25  ;;  %v3102_v35 = vpack.c.bf16 %v2489_v29, %v2485_v27  ;;  %v2976_v36 = vpack.c.bf16 %v2496_v31, %v2492_v30  ;;  %v2491_v37 = vld [vmem:[%s6309_s3 + $0xa00] sm:$0xff]  ;;  %v2493_v39 = vld [vmem:[%s6309_s3 + $0xa10] sm:$0xff] }
  0x1c   : > { %3093 = vmatprep.subr.bf16.mxu1 %v3092_v4  ;;  %v2498_v33 = vld [vmem:[%s6309_s3 + $0xa38] sm:$0xff]  ;;  %v2495_v38 = vld [vmem:[%s6309_s3 + $0xa20] sm:$0xff]  ;;  %v2497_v41 = vld [vmem:[%s6309_s3 + $0xa30] sm:$0xff] }
  0x1d   : > { %v3104_v40 = vpack.c.bf16 %v2498_v33, %v2494_v32  ;;  %v2500_v42 = vld [vmem:[%s6309_s3 + $0xa48] sm:$0xff]  ;;  %v2502_v44 = vld [vmem:[%s6309_s3 + $0xa58] sm:$0xff]  ;;  %v2978_v46 = vpack.c.bf16 %v2495_v38, %v2491_v37  ;;  %v3106_v48 = vpack.c.bf16 %v2497_v41, %v2493_v39  ;;  %v2499_v50 = vld [vmem:[%s6309_s3 + $0xa40] sm:$0xff] }
  0x1e   : > { %2967 = vmatpush1.bf16.msra.mxu0 %v2966_v10  ;;  %v2504_v43 = vld [vmem:[%s6309_s3 + $0xa68] sm:$0xff]  ;;  %v2506_v45 = vld [vmem:[%s6309_s3 + $0xa78] sm:$0xff]  ;;  %v2503_v51 = vld [vmem:[%s6309_s3 + $0xa60] sm:$0xff] }
  0x1f   : > { %3095 = vmatpush1.bf16.msra.mxu1 %v3094_v11  ;;  %2969 = vmatprep.subr.bf16.mxu0 %v2968_v12  ;;  %v2980_v49 = vpack.c.bf16 %v2504_v43, %v2500_v42  ;;  %v2501_v52 = vld [vmem:[%s6309_s3 + $0xa50] sm:$0xff]  ;;  %v3108_v53 = vpack.c.bf16 %v2506_v45, %v2502_v44  ;;  %v2508_v55 = vld [vmem:[%s6309_s3 + $0xa88] sm:$0xff]  ;;  %v2510_v57 = vld [vmem:[%s6309_s3 + $0xa98] sm:$0xff]  ;;  %v2982_v59 = vpack.c.bf16 %v2503_v51, %v2499_v50  ;;  %v4128_v12 = vsub.s32 1, %v4085_v60 }
  0x20   : > { %3097 = vmatprep.subr.bf16.mxu1 %v3096_v16  ;;  %v2505_v54 = vld [vmem:[%s6309_s3 + $0xa70] sm:$0xff]  ;;  %v2512_v56 = vld [vmem:[%s6309_s3 + $0xaa8] sm:$0xff]  ;;  %v2514_v58 = vld [vmem:[%s6309_s3 + $0xab8] sm:$0xff] }
  0x21   : > { %v3110_v61 = vpack.c.bf16 %v2505_v54, %v2501_v52  ;;  %v2984_v62 = vpack.c.bf16 %v2512_v56, %v2508_v55  ;;  %v2507_v63 = vld [vmem:[%s6309_s3 + $0xa80] sm:$0xff]  ;;  %v2509_v1 = vld [vmem:[%s6309_s3 + $0xa90] sm:$0xff]  ;;  %v3112_v2 = vpack.c.bf16 %v2514_v58, %v2510_v57  ;;  %v2516_v4 = vld [vmem:[%s6309_s3 + $0xac8] sm:$0xff] }
  0x22   : > { %2971 = vmatpush1.bf16.msra.mxu0 %v2970_v22  ;;  %v2511_v0 = vld [vmem:[%s6309_s3 + $0xaa0] sm:$0xff]  ;;  %v2513_v3 = vld [vmem:[%s6309_s3 + $0xab0] sm:$0xff]  ;;  %v2520_v5 = vld [vmem:[%s6309_s3 + $0xae8] sm:$0xff] }
  0x23   : > { %3099 = vmatpush1.bf16.msra.mxu1 %v3098_v23  ;;  %2973 = vmatprep.subr.bf16.mxu0 %v2972_v24  ;;  %v2518_v6 = vld [vmem:[%s6309_s3 + $0xad8] sm:$0xff]  ;;  %v2986_v8 = vpack.c.bf16 %v2511_v0, %v2507_v63  ;;  %v2515_v9 = vld [vmem:[%s6309_s3 + $0xac0] sm:$0xff]  ;;  %v2517_v11 = vld [vmem:[%s6309_s3 + $0xad0] sm:$0xff]  ;;  %v3114_v14 = vpack.c.bf16 %v2513_v3, %v2509_v1  ;;  %v2988_v15 = vpack.c.bf16 %v2520_v5, %v2516_v4 }
  0x24   : > { %3101 = vmatprep.subr.bf16.mxu1 %v3100_v28  ;;  %v2522_v7 = vld [vmem:[%s6309_s3 + $0xaf8] sm:$0xff]  ;;  %v2519_v10 = vld [vmem:[%s6309_s3 + $0xae0] sm:$0xff]  ;;  %v2521_v16 = vld [vmem:[%s6309_s3 + $0xaf0] sm:$0xff] }
  0x25   : > { %v2524_v17 = vld [vmem:[%s6309_s3 + $0xb08] sm:$0xff]  ;;  %v3116_v19 = vpack.c.bf16 %v2522_v7, %v2518_v6  ;;  %v2526_v20 = vld [vmem:[%s6309_s3 + $0xb18] sm:$0xff]  ;;  %v2990_v23 = vpack.c.bf16 %v2519_v10, %v2515_v9  ;;  %v4153_v25 = vld [vmem:[%s6307_s1] sm:$0xf]  ;;  %v3118_v33 = vpack.c.bf16 %v2521_v16, %v2517_v11 }
  0x26   : > { %2975 = vmatpush1.bf16.msra.mxu0 %v2974_v34  ;;  %v2528_v18 = vld [vmem:[%s6309_s3 + $0xb28] sm:$0xff]  ;;  %v2530_v21 = vld [vmem:[%s6309_s3 + $0xb38] sm:$0xff]  ;;  %v4158_v26 = vld [vmem:[%s6308_s2] sm:$0xf]  ;;  %v291_v29 = vrot.slane %v4153_v25, %v4128_v12  ;;  %v287_v31 = vrot.slane %v4153_v25, %v4131_v13 }
  0x27   : > { %3103 = vmatpush1.bf16.msra.mxu1 %v3102_v35  ;;  %2977 = vmatprep.subr.bf16.mxu0 %v2976_v36  ;;  %v275_v22 = vld [vmem:[%s4116_s11 + $0x8] sm:$0xff]  ;;  %v2523_v27 = vld [vmem:[%s6309_s3 + $0xb00] sm:$0xff]  ;;  %v321_v30 = vrot.slane %v4158_v26, %v4128_v12  ;;  %v317_v32 = vrot.slane %v4158_v26, %v4131_v13  ;;  %v2992_v34 = vpack.c.bf16 %v2528_v18, %v2524_v17  ;;  %v2525_v35 = vld [vmem:[%s6309_s3 + $0xb10] sm:$0xff] }
  0x28   : > { %3105 = vmatprep.subr.bf16.mxu1 %v3104_v40  ;;  %v279_v24 = vld [vmem:[%s4116_s11 + $0x28] sm:$0xff]  ;;  %v2527_v28 = vld [vmem:[%s6309_s3 + $0xb20] sm:$0xff]  ;;  %v3120_v38 = vpack.c.bf16 %v2530_v21, %v2526_v20  ;;  %v2529_v39 = vld [vmem:[%s6309_s3 + $0xb30] sm:$0xff]  ;;  %v305_v42 = vmul.f32 %v291_v29, %v275_v22 }
  0x29   : > { %v274_v36 = vld [vmem:[%s4116_s11] sm:$0xff]  ;;  %v2532_v40 = vld [vmem:[%s6309_s3 + $0xb48] sm:$0xff]  ;;  %v309_v43 = vmul.f32 %v291_v29, %v279_v24  ;;  %v2534_v45 = vld [vmem:[%s6309_s3 + $0xb58] sm:$0xff] }
  0x2a   : > { %2979 = vmatpush1.bf16.msra.mxu0 %v2978_v46  ;;  %v278_v37 = vld [vmem:[%s4116_s11 + $0x20] sm:$0xff]  ;;  %v2536_v41 = vld [vmem:[%s6309_s3 + $0xb68] sm:$0xff]  ;;  %v304_v44 = vmul.f32 %v287_v31, %v274_v36  ;;  %v2538_v46 = vld [vmem:[%s6309_s3 + $0xb78] sm:$0xff]  ;;  %v335_v50 = vadd.f32 %v321_v30, %v305_v42 }
  0x2b   : > { %3107 = vmatpush1.bf16.msra.mxu1 %v3106_v48  ;;  %2981 = vmatprep.subr.bf16.mxu0 %v2980_v49  ;;  %v308_v48 = vmul.f32 %v287_v31, %v278_v37  ;;  %v2994_v49 = vpack.c.bf16 %v2527_v28, %v2523_v27  ;;  %v339_v51 = vadd.f32 %v321_v30, %v309_v43  ;;  %v2531_v55 = vld [vmem:[%s6309_s3 + $0xb40] sm:$0xff]  ;;  %v2533_v57 = vld [vmem:[%s6309_s3 + $0xb50] sm:$0xff]  ;;  %v2544_v63 = vld [vmem:[%s6309_s3 + $0xba8] sm:$0xff] }
  0x2c   : > { %3109 = vmatprep.subr.bf16.mxu1 %v3108_v53  ;;  %v334_v52 = vadd.f32 %v317_v32, %v304_v44  ;;  %v3122_v53 = vpack.c.bf16 %v2529_v39, %v2525_v35  ;;  %v2996_v54 = vpack.c.bf16 %v2536_v41, %v2532_v40  ;;  %v2535_v56 = vld [vmem:[%s6309_s3 + $0xb60] sm:$0xff]  ;;  %v343_v0 = vmax.f32 %v335_v50, 0.0  ;;  %v2542_v3 = vld [vmem:[%s6309_s3 + $0xb98] sm:$0xff]  ;;  %v2541_v16 = vld [vmem:[%s6309_s3 + $0xb90] sm:$0xff] }
  0x2d   : > { %v338_v58 = vadd.f32 %v317_v32, %v308_v48  ;;  %v347_v1 = vmax.f32 %v339_v51, 0.0  ;;  %v2546_v4 = vld [vmem:[%s6309_s3 + $0xbb8] sm:$0xff]  ;;  %v2998_v6 = vpack.c.bf16 %v2535_v56, %v2531_v55  ;;  %v2548_v20 = vld [vmem:[%s6309_s3 + $0xbc8] sm:$0xff]  ;;  %v2547_v31 = vld [vmem:[%s6309_s3 + $0xbc0] sm:$0xff] }
  0x2e   : > { %2983 = vmatpush1.bf16.msra.mxu0 %v2982_v59  ;;  %v3124_v59 = vpack.c.bf16 %v2538_v46, %v2534_v45  ;;  %v360_v7 = vrot.slane %v343_v0, 7  ;;  %v3128_v18 = vpack.c.bf16 %v2546_v4, %v2542_v3  ;;  %v2552_v21 = vld [vmem:[%s6309_s3 + $0xbe8] sm:$0xff]  ;;  %v2554_v24 = vld [vmem:[%s6309_s3 + $0xbf8] sm:$0xff]  ;;  %v2551_v32 = vld [vmem:[%s6309_s3 + $0xbe0] sm:$0xff]  ;;  %v3774_v45 = vmov 0.0  }
  0x2f   : > { %3111 = vmatpush1.bf16.msra.mxu1 %v3110_v61  ;;  %2985 = vmatprep.subr.bf16.mxu0 %v2984_v62  ;;  %v2537_v61 = vld [vmem:[%s6309_s3 + $0xb70] sm:$0xff]  ;;  %v2540_v62 = vld [vmem:[%s6309_s3 + $0xb88] sm:$0xff]  ;;  %v346_v5 = vmax.f32 %v338_v58, 0.0  ;;  %v3004_v30 = vpack.c.bf16 %v2552_v21, %v2548_v20  ;;  %v3006_v39 = vpack.c.bf16 %v2551_v32, %v2547_v31  ;;  %v2562_v41 = vld [vmem:[%s6309_s3 + $0xc38] sm:$0xff] }
  0x30   : > { %3113 = vmatprep.subr.bf16.mxu1 %v3112_v2  ;;  %v342_v2 = vmax.f32 %v334_v52, 0.0  ;;  %v3126_v10 = vpack.c.bf16 %v2537_v61, %v2533_v57  ;;  %v3000_v11 = vpack.c.bf16 %v2544_v63, %v2540_v62  ;;  %384 = vst [vmem:[#allocation2 + $0x8] sm:$0xfe] %v360_v7  ;;  %v2553_v35 = vld [vmem:[%s6309_s3 + $0xbf0] sm:$0xff]  ;;  %v2556_v36 = vld [vmem:[%s6309_s3 + $0xc08] sm:$0xff]  ;;  %v2555_v43 = vld [vmem:[%s6309_s3 + $0xc00] sm:$0xff] }
  0x31   : > { %v363_v17 = vrot.slane %v346_v5, 7  ;;  %v2560_v37 = vld [vmem:[%s6309_s3 + $0xc28] sm:$0xff]  ;;  %v2559_v44 = vld [vmem:[%s6309_s3 + $0xc20] sm:$0xff]  ;;  %269 = vst.msk [vmem:[#allocation2] ss:$8 sm:$0xf] %vm267_vm1, %v3774_v45 }
  0x32   : > { %2987 = vmatpush1.bf16.msra.mxu0 %v2986_v8  ;;  %v365_v8 = vrot.slane %v347_v1, 7  ;;  %v359_v9 = vrot.slane %v342_v2, 7  ;;  %272 = vst.msk [vmem:[#allocation2 + $0x41] ss:$8 sm:$0xf] %vm267_vm1, %v3774_v45  ;;  %v3008_v51 = vpack.c.bf16 %v2560_v37, %v2556_v36  ;;  %v2568_v55 = vld [vmem:[%s6309_s3 + $0xc68] sm:$0xff]  ;;  %v3010_v62 = vpack.c.bf16 %v2559_v44, %v2555_v43 }
  0x33   : > { %3115 = vmatpush1.bf16.msra.mxu1 %v3114_v14  ;;  %2989 = vmatprep.subr.bf16.mxu0 %v2988_v15  ;;  %v2539_v14 = vld [vmem:[%s6309_s3 + $0xb80] sm:$0xff]  ;;  %391 = vst [vmem:[#allocation2 + $0x40] sm:$0x1] %v363_v17  ;;  %v2566_v57 = vld [vmem:[%s6309_s3 + $0xc58] sm:$0xff]  ;;  %v2565_v3 = vld [vmem:[%s6309_s3 + $0xc50] sm:$0xff] }
  0x34   : > { %3117 = vmatprep.subr.bf16.mxu1 %v3116_v19  ;;  %v2543_v15 = vld [vmem:[%s6309_s3 + $0xba0] sm:$0xff]  ;;  %v2545_v19 = vld [vmem:[%s6309_s3 + $0xbb0] sm:$0xff]  ;;  %v4237_v22 = vsel %vm358_vm0, %v360_v7, %v365_v8  ;;  %392 = vst [vmem:[#allocation2 + $0x48] sm:$0x1] %v365_v8  ;;  %383 = vst [vmem:[#allocation2] sm:$0xfe] %v359_v9  ;;  %v4247_v27 = vsel %vm358_vm0, %v359_v9, %v363_v17 }
  0x35   : > { %388 = vst [vmem:[#allocation2 + $0x28] sm:$0xff] %v4237_v22  ;;  %v3002_v28 = vpack.c.bf16 %v2543_v15, %v2539_v14  ;;  %387 = vst [vmem:[#allocation2 + $0x20] sm:$0xff] %v4247_v27  ;;  %v3130_v29 = vpack.c.bf16 %v2545_v19, %v2541_v16  ;;  %v941_v40 = vrot.slane %v4237_v22, 1  ;;  %v938_v42 = vrot.slane %v4247_v27, 1  ;;  %v2570_v58 = vld [vmem:[%s6309_s3 + $0xc78] sm:$0xff]  ;;  %v2563_v1 = vld [vmem:[%s6309_s3 + $0xc40] sm:$0xff] }
  0x36   : > { %2991 = vmatpush1.bf16.msra.mxu0 %v2990_v23  ;;  %v2550_v23 = vld [vmem:[%s6309_s3 + $0xbd8] sm:$0xff]  ;;  %v2567_v2 = vld [vmem:[%s6309_s3 + $0xc60] sm:$0xff]  ;;  %v3140_v4 = vpack.c.bf16 %v2570_v58, %v2566_v57  ;;  %v2569_v5 = vld [vmem:[%s6309_s3 + $0xc70] sm:$0xff] }
  0x37   : > { %3119 = vmatpush1.bf16.msra.mxu1 %v3118_v33  ;;  %2993 = vmatprep.subr.bf16.mxu0 %v2992_v34  ;;  %v3132_v33 = vpack.c.bf16 %v2554_v24, %v2550_v23  ;;  %v2549_v34 = vld [vmem:[%s6309_s3 + $0xbd0] sm:$0xff]  ;;  %v660_v46 = vld [vmem:[#allocation2 + $0x8] sm:$0xfe]  ;;  %v2574_v8 = vld [vmem:[%s6309_s3 + $0xc98] sm:$0xff] }
  0x38   : > { %3121 = vmatprep.subr.bf16.mxu1 %v3120_v38  ;;  %v2558_v38 = vld [vmem:[%s6309_s3 + $0xc18] sm:$0xff]  ;;  %v3134_v47 = vpack.c.bf16 %v2553_v35, %v2549_v34  ;;  %v940_v50 = vrot.slane %v660_v46, 1  ;;  %v2576_v7 = vld [vmem:[%s6309_s3 + $0xca8] sm:$0xff]  ;;  %v2571_v15 = vld [vmem:[%s6309_s3 + $0xc80] sm:$0xff] }
  0x39   : > { %v3136_v56 = vpack.c.bf16 %v2562_v41, %v2558_v38  ;;  %v2578_v9 = vld [vmem:[%s6309_s3 + $0xcb8] sm:$0xff]  ;;  %v2575_v16 = vld [vmem:[%s6309_s3 + $0xca0] sm:$0xff]  ;;  %v2573_v17 = vld [vmem:[%s6309_s3 + $0xc90] sm:$0xff] }
  0x3a   : > { %2995 = vmatpush1.bf16.msra.mxu0 %v2994_v49  ;;  %v2557_v49 = vld [vmem:[%s6309_s3 + $0xc10] sm:$0xff]  ;;  %v2580_v20 = vld [vmem:[%s6309_s3 + $0xcc8] sm:$0xff]  ;;  %v2582_v23 = vld [vmem:[%s6309_s3 + $0xcd8] sm:$0xff] }
  0x3b   : > { %3123 = vmatpush1.bf16.msra.mxu1 %v3122_v53  ;;  %2997 = vmatprep.subr.bf16.mxu0 %v2996_v54  ;;  %v659_v48 = vld [vmem:[#allocation2] sm:$0xfe]  ;;  %v2561_v53 = vld [vmem:[%s6309_s3 + $0xc30] sm:$0xff]  ;;  %v2564_v54 = vld [vmem:[%s6309_s3 + $0xc48] sm:$0xff] }
  0x3c   : > { %3125 = vmatprep.subr.bf16.mxu1 %v3124_v59  ;;  %v937_v52 = vrot.slane %v659_v48, 1  ;;  %v942_v59 = vsel %vm936_vm2, %v940_v50, %v941_v40  ;;  %v3138_v63 = vpack.c.bf16 %v2561_v53, %v2557_v49  ;;  %v3012_v0 = vpack.c.bf16 %v2568_v55, %v2564_v54  ;;  %v2577_v19 = vld [vmem:[%s6309_s3 + $0xcb0] sm:$0xff]  ;;  %v2584_v21 = vld [vmem:[%s6309_s3 + $0xce8] sm:$0xff]  ;;  %v2586_v24 = vld [vmem:[%s6309_s3 + $0xcf8] sm:$0xff] }
  0x3d   : > { %1029 = vmatprep.mubr.f32.mxu0 %v942_v59  ;;  %1183 = vmatprep.mubr.f32.mxu1 %v942_v59  ;;  %v2579_v31 = vld [vmem:[%s6309_s3 + $0xcc0] sm:$0xff]  ;;  %v3148_v34 = vpack.c.bf16 %v2586_v24, %v2582_v23  ;;  %v2585_v35 = vld [vmem:[%s6309_s3 + $0xcf0] sm:$0xff]  ;;  %v2588_v36 = vld [vmem:[%s6309_s3 + $0xd08] sm:$0xff] }
  0x3e   : > { %2999 = vmatpush1.bf16.msra.mxu0 %v2998_v6  ;;  %v939_v61 = vsel %vm936_vm2, %v937_v52, %v938_v42  ;;  %v2572_v6 = vld [vmem:[%s6309_s3 + $0xc88] sm:$0xff]  ;;  %v2583_v32 = vld [vmem:[%s6309_s3 + $0xce0] sm:$0xff]  ;;  %v2590_v38 = vld [vmem:[%s6309_s3 + $0xd18] sm:$0xff] }
  0x3f   : > { %3127 = vmatpush1.bf16.msra.mxu1 %v3126_v10  ;;  %3001 = vmatprep.subr.bf16.mxu0 %v3000_v11  ;;  %v3014_v10 = vpack.c.bf16 %v2567_v2, %v2563_v1  ;;  %v3142_v11 = vpack.c.bf16 %v2569_v5, %v2565_v3  ;;  %v3016_v14 = vpack.c.bf16 %v2576_v7, %v2572_v6  ;;  %v2592_v37 = vld [vmem:[%s6309_s3 + $0xd28] sm:$0xff]  ;;  %v2587_v45 = vld [vmem:[%s6309_s3 + $0xd00] sm:$0xff]  ;;  %v2589_v46 = vld [vmem:[%s6309_s3 + $0xd10] sm:$0xff] }
  0x40   : > { %3129 = vmatprep.subr.bf16.mxu1 %v3128_v18  ;;  %v3144_v18 = vpack.c.bf16 %v2578_v9, %v2574_v8  ;;  %v3022_v41 = vpack.c.bf16 %v2583_v32, %v2579_v31  ;;  %v3024_v44 = vpack.c.bf16 %v2592_v37, %v2588_v36  ;;  %v2593_v49 = vld [vmem:[%s6309_s3 + $0xd30] sm:$0xff]  ;;  %v2596_v50 = vld [vmem:[%s6309_s3 + $0xd48] sm:$0xff]  ;;  %v2598_v52 = vld [vmem:[%s6309_s3 + $0xd58] sm:$0xff] }
  0x41   : > { %v2602_v53 = vld [vmem:[%s6309_s3 + $0xd78] sm:$0xff]  ;;  %v3154_v55 = vpack.c.bf16 %v2593_v49, %v2589_v46  ;;  %v2595_v57 = vld [vmem:[%s6309_s3 + $0xd40] sm:$0xff]  ;;  %v2597_v59 = vld [vmem:[%s6309_s3 + $0xd50] sm:$0xff] }
  0x42   : > { %3003 = vmatpush1.bf16.msra.mxu0 %v3002_v28  ;;  %v3018_v28 = vpack.c.bf16 %v2575_v16, %v2571_v15  ;;  %v2599_v58 = vld [vmem:[%s6309_s3 + $0xd60] sm:$0xff]  ;;  %v2608_v1 = vld [vmem:[%s6309_s3 + $0xda8] sm:$0xff]  ;;  %v2606_v2 = vld [vmem:[%s6309_s3 + $0xd98] sm:$0xff] }
  0x43   : > { %3131 = vmatpush1.bf16.msra.mxu1 %v3130_v29  ;;  %3005 = vmatprep.subr.bf16.mxu0 %v3004_v30  ;;  %v3146_v29 = vpack.c.bf16 %v2577_v19, %v2573_v17  ;;  %v3020_v30 = vpack.c.bf16 %v2584_v21, %v2580_v20  ;;  %v2610_v3 = vld [vmem:[%s6309_s3 + $0xdb8] sm:$0xff]  ;;  %v3030_v5 = vpack.c.bf16 %v2599_v58, %v2595_v57  ;;  %v2603_v6 = vld [vmem:[%s6309_s3 + $0xd80] sm:$0xff]  ;;  %v2609_v16 = vld [vmem:[%s6309_s3 + $0xdb0] sm:$0xff] }
  0x44   : > { %3133 = vmatprep.subr.bf16.mxu1 %v3132_v33  ;;  %v2581_v33 = vld [vmem:[%s6309_s3 + $0xcd0] sm:$0xff]  ;;  %v2607_v9 = vld [vmem:[%s6309_s3 + $0xda0] sm:$0xff]  ;;  %v3160_v15 = vpack.c.bf16 %v2610_v3, %v2606_v2  ;;  %v2612_v17 = vld [vmem:[%s6309_s3 + $0xdc8] sm:$0xff] }
  0x45   : > { %v3150_v43 = vpack.c.bf16 %v2585_v35, %v2581_v33  ;;  %v2614_v20 = vld [vmem:[%s6309_s3 + $0xdd8] sm:$0xff]  ;;  %v663_v23 = vld [vmem:[#allocation2 + $0x40] sm:$0x1]  ;;  %v2613_v37 = vld [vmem:[%s6309_s3 + $0xdd0] sm:$0xff] }
  0x46   : > { %3007 = vmatpush1.bf16.msra.mxu0 %v3006_v39  ;;  %v2594_v39 = vld [vmem:[%s6309_s3 + $0xd38] sm:$0xff]  ;;  %v2615_v31 = vld [vmem:[%s6309_s3 + $0xde0] sm:$0xff]  ;;  %v949_v33 = vrot.slane %v663_v23, 1  ;;  %v2617_v22 = vld [vmem:[%s6309_s3 + $0xdf0] sm:$0xff] }
  0x47   : > { %3135 = vmatpush1.bf16.msra.mxu1 %v3134_v47  ;;  %3009 = vmatprep.subr.bf16.mxu0 %v3008_v51  ;;  %v2591_v47 = vld [vmem:[%s6309_s3 + $0xd20] sm:$0xff]  ;;  %v3152_v48 = vpack.c.bf16 %v2594_v39, %v2590_v38  ;;  %v2600_v51 = vld [vmem:[%s6309_s3 + $0xd68] sm:$0xff]  ;;  %v2618_v21 = vld [vmem:[%s6309_s3 + $0xdf8] sm:$0xff] }
  0x48   : > { %3137 = vmatprep.subr.bf16.mxu1 %v3136_v56  ;;  %v3026_v54 = vpack.c.bf16 %v2591_v47, %v2587_v45  ;;  %v3028_v56 = vpack.c.bf16 %v2600_v51, %v2596_v50  ;;  %v3164_v39 = vpack.c.bf16 %v2618_v21, %v2614_v20  ;;  %v276_v45 = vld [vmem:[%s4116_s11 + $0x10] sm:$0xff]  ;;  %v2622_v47 = vld [vmem:[%s6309_s3 + $0xe18] sm:$0xff]  ;;  %v2636_v21 = vld [vmem:[%s6309_s3 + $0xe88] sm:$0xff] }
  0x49   : > { %1030 = vmatmul.mubr.f32.vlgmr.msra.gmra.mrb[0].mxu0 %v939_v61  ;;  %v2626_v46 = vld [vmem:[%s6309_s3 + $0xe38] sm:$0xff]  ;;  %v280_v49 = vld [vmem:[%s4116_s11 + $0x30] sm:$0xff]  ;;  %v2640_v23 = vld [vmem:[%s6309_s3 + $0xea8] sm:$0xff] }
  0x4a   : > { %3011 = vmatpush1.bf16.msra.mxu0 %v3010_v62  ;;  %1184 = vmatmul.mubr.f32.vlgmr.msra.gmra.mrb[0].mxu1 %v939_v61  ;;  %v4413_v61 = vsub.s32 3, %v4085_v60  ;;  %v3156_v62 = vpack.c.bf16 %v2602_v53, %v2598_v52  ;;  %v3166_v52 = vpack.c.bf16 %v2617_v22, %v2613_v37  ;;  %v2630_v3 = vld [vmem:[%s6309_s3 + $0xe58] sm:$0xff]  ;;  %v2633_v20 = vld [vmem:[%s6309_s3 + $0xe70] sm:$0xff] }
  0x4b   : > { %3139 = vmatpush1.bf16.msra.mxu1 %v3138_v63  ;;  %3013 = vmatprep.subr.bf16.mxu0 %v3012_v0  ;;  %v2601_v63 = vld [vmem:[%s6309_s3 + $0xd70] sm:$0xff]  ;;  %v2604_v0 = vld [vmem:[%s6309_s3 + $0xd88] sm:$0xff] }
  0x4c   : > { %3141 = vmatprep.subr.bf16.mxu1 %v3140_v4  ;;  %v4431_v4 = vsub.s32 2, %v4085_v60  ;;  %v3158_v7 = vpack.c.bf16 %v2601_v63, %v2597_v59  ;;  %v3032_v8 = vpack.c.bf16 %v2608_v1, %v2604_v0  ;;  %v329_v24 = vrot.slane %v4158_v26, %v4413_v61  ;;  %v2628_v63 = vld [vmem:[%s6309_s3 + $0xe48] sm:$0xff]  ;;  %v2641_v22 = vld [vmem:[%s6309_s3 + $0xeb0] sm:$0xff] }
  0x4d   : > { %v3168_v59 = vpack.c.bf16 %v2626_v46, %v2622_v47  ;;  %v2632_v0 = vld [vmem:[%s6309_s3 + $0xe68] sm:$0xff]  ;;  %v2643_v46 = vld [vmem:[%s6309_s3 + $0xec0] sm:$0xff] }
  0x4e   : > { %3015 = vmatpush1.bf16.msra.mxu0 %v3014_v10  ;;  %v2605_v10 = vld [vmem:[%s6309_s3 + $0xd90] sm:$0xff]  ;;  %v325_v35 = vrot.slane %v4158_v26, %v4431_v4  ;;  %v2620_v26 = vld [vmem:[%s6309_s3 + $0xe08] sm:$0xff] }
  0x4f   : > { %3143 = vmatpush1.bf16.msra.mxu1 %v3142_v11  ;;  %3017 = vmatprep.subr.bf16.mxu0 %v3016_v14  ;;  %v664_v11 = vld [vmem:[#allocation2 + $0x48] sm:$0x1]  ;;  %v299_v14 = vrot.slane %v4153_v25, %v4413_v61 }
  0x50   : > { %3145 = vmatprep.subr.bf16.mxu1 %v3144_v18  ;;  %v2616_v18 = vld [vmem:[%s6309_s3 + $0xde8] sm:$0xff]  ;;  %v951_v19 = vrot.slane %v664_v11, 1 }
  0x51   : > { %v3036_v36 = vpack.c.bf16 %v2616_v18, %v2612_v17  ;;  %v2629_v17 = vld [vmem:[%s6309_s3 + $0xe50] sm:$0xff] }
  0x52   : > { %3019 = vmatpush1.bf16.msra.mxu0 %v3018_v28  ;;  %v295_v28 = vrot.slane %v4153_v25, %v4431_v4  ;;  %v952_v32 = vsel %vm936_vm2, %v941_v40, %v951_v19  ;;  %v3162_v25 = vpack.c.bf16 %v2609_v16, %v2605_v10  ;;  %v281_v40 = vld [vmem:[%s4116_s11 + $0x38] sm:$0xff]  ;;  %v2631_v16 = vld [vmem:[%s6309_s3 + $0xe60] sm:$0xff] }
  0x53   : > { %3147 = vmatpush1.bf16.msra.mxu1 %v3146_v29  ;;  %3021 = vmatprep.subr.bf16.mxu0 %v3020_v30  ;;  %v3034_v29 = vpack.c.bf16 %v2607_v9, %v2603_v6  ;;  %v2611_v30 = vld [vmem:[%s6309_s3 + $0xdc0] sm:$0xff] }
  0x54   : > { %3149 = vmatprep.subr.bf16.mxu1 %v3148_v34  ;;  %v277_v34 = vld [vmem:[%s4116_s11 + $0x18] sm:$0xff]  ;;  %1035 = vmatprep.mubr.f32.mxu0 %v952_v32  ;;  %v306_v50 = vmul.f32 %v295_v28, %v276_v45  ;;  %v3038_v51 = vpack.c.bf16 %v2615_v31, %v2611_v30 }
  0x55   : > { %v307_v38 = vmul.f32 %v299_v14, %v277_v34  ;;  %1189 = vmatprep.mubr.f32.mxu1 %v952_v32  ;;  %v2642_v30 = vld [vmem:[%s6309_s3 + $0xeb8] sm:$0xff]  ;;  %v3048_v34 = vpack.c.bf16 %v2640_v23, %v2636_v21 }
  0x56   : > { %3023 = vmatpush1.bf16.msra.mxu0 %v3022_v41  ;;  %v2624_v41 = vld [vmem:[%s6309_s3 + $0xe28] sm:$0xff]  ;;  %v336_v58 = vadd.f32 %v325_v35, %v306_v50 }
  0x57   : > { %3151 = vmatpush1.bf16.msra.mxu1 %v3150_v43  ;;  %3025 = vmatprep.subr.bf16.mxu0 %v3024_v44  ;;  %v950_v43 = vsel %vm936_vm2, %v938_v42, %v949_v33  ;;  %v311_v44 = vmul.f32 %v299_v14, %v281_v40  ;;  %v310_v42 = vmul.f32 %v295_v28, %v280_v49  ;;  %v2644_v40 = vld [vmem:[%s6309_s3 + $0xec8] sm:$0xff]  ;;  %v2645_v49 = vld [vmem:[%s6309_s3 + $0xed0] sm:$0xff] }
  0x58   : > { %3153 = vmatprep.subr.bf16.mxu1 %v3152_v48  ;;  %1036 = vmatmul.mubr.f32.gmra.mrb[2].mxu0 %v950_v43  ;;  %v337_v48 = vadd.f32 %v329_v24, %v307_v38  ;;  %v3040_v53 = vpack.c.bf16 %v2624_v41, %v2620_v26  ;;  %v3044_v14 = vpack.c.bf16 %v2632_v0, %v2628_v63  ;;  %v2648_v38 = vld [vmem:[%s6309_s3 + $0xee8] sm:$0xff]  ;;  %v2650_v26 = vld [vmem:[%s6309_s3 + $0xef8] sm:$0xff]  ;;  %v2653_v63 = vld [vmem:[%s6309_s3 + $0xf10] sm:$0xff] }
  0x59   : > { %1190 = vmatmul.mubr.f32.gmra.mrb[2].mxu1 %v950_v43  ;;  %v341_v27 = vadd.f32 %v329_v24, %v311_v44  ;;  %v340_v2 = vadd.f32 %v325_v35, %v310_v42  ;;  %v3174_v33 = vpack.c.bf16 %v2633_v20, %v2629_v17  ;;  %v2635_v35 = vld [vmem:[%s6309_s3 + $0xe80] sm:$0xff]  ;;  %v3052_v47 = vpack.c.bf16 %v2648_v38, %v2644_v40  ;;  %v2652_v42 = vld [vmem:[%s6309_s3 + $0xf08] sm:$0xff]  ;;  %v2674_v20 = vld [vmem:[%s6309_s3 + $0xfb8] sm:$0xff] }
  0x5a   : > { %3027 = vmatpush1.bf16.msra.mxu0 %v3026_v54  ;;  %v2619_v54 = vld [vmem:[%s6309_s3 + $0xe00] sm:$0xff]  ;;  %v345_v57 = vmax.f32 %v337_v48, 0.0  ;;  %v2668_v17 = vld [vmem:[%s6309_s3 + $0xf88] sm:$0xff] }
  0x5b   : > { %3155 = vmatpush1.bf16.msra.mxu1 %v3154_v55  ;;  %3029 = vmatprep.subr.bf16.mxu0 %v3028_v56  ;;  %v2623_v55 = vld [vmem:[%s6309_s3 + $0xe20] sm:$0xff]  ;;  %v2621_v56 = vld [vmem:[%s6309_s3 + $0xe10] sm:$0xff]  ;;  %v349_v1 = vmax.f32 %v341_v27, 0.0  ;;  %v348_v10 = vmax.f32 %v340_v2, 0.0  ;;  %v2660_v2 = vld [vmem:[%s6309_s3 + $0xf48] sm:$0xff] }
  0x5c   : > { %3157 = vmatprep.subr.bf16.mxu1 %v3156_v62  ;;  %v2625_v62 = vld [vmem:[%s6309_s3 + $0xe30] sm:$0xff]  ;;  %v362_v6 = vrot.slane %v345_v57, 7  ;;  %v2647_v48 = vld [vmem:[%s6309_s3 + $0xee0] sm:$0xff] }
  0x5d   : > { %v369_v9 = vrot.slane %v349_v1, 7  ;;  %v3170_v11 = vpack.c.bf16 %v2625_v62, %v2621_v56  ;;  %v367_v28 = vrot.slane %v348_v10, 7  ;;  %v2649_v27 = vld [vmem:[%s6309_s3 + $0xef0] sm:$0xff]  ;;  %v3054_v56 = vpack.c.bf16 %v2647_v48, %v2643_v46  ;;  %v2655_v62 = vld [vmem:[%s6309_s3 + $0xf20] sm:$0xff]  ;;  %v404_v46 = vld [vmem:[%s6309_s3 + $0x8] sm:$0xff] }
  0x5e   : > { %3031 = vmatpush1.bf16.msra.mxu0 %v3030_v5  ;;  %v2634_v5 = vld [vmem:[%s6309_s3 + $0xe78] sm:$0xff]  ;;  %386 = vst [vmem:[#allocation2 + $0x18] sm:$0xfe] %v362_v6  ;;  %v3182_v57 = vpack.c.bf16 %v2649_v27, %v2645_v49  ;;  %v2657_v1 = vld [vmem:[%s6309_s3 + $0xf30] sm:$0xff]  ;;  %v2659_v10 = vld [vmem:[%s6309_s3 + $0xf40] sm:$0xff] }
  0x5f   : > { %3159 = vmatpush1.bf16.msra.mxu1 %v3158_v7  ;;  %3033 = vmatprep.subr.bf16.mxu0 %v3032_v8  ;;  %v344_v7 = vmax.f32 %v336_v58, 0.0  ;;  %v3042_v8 = vpack.c.bf16 %v2623_v55, %v2619_v54  ;;  %v3172_v19 = vpack.c.bf16 %v2634_v5, %v2630_v3  ;;  %v4542_v24 = vsel %vm358_vm0, %v362_v6, %v369_v9  ;;  %v2658_v54 = vld [vmem:[%s6309_s3 + $0xf38] sm:$0xff]  ;;  %v2664_v3 = vld [vmem:[%s6309_s3 + $0xf68] sm:$0xff]  ;;  %v2675_v40 = vld [vmem:[%s6309_s3 + $0xfc0] sm:$0xff] }
  0x60   : > { %3161 = vmatprep.subr.bf16.mxu1 %v3160_v15  ;;  %v2627_v15 = vld [vmem:[%s6309_s3 + $0xe40] sm:$0xff]  ;;  %394 = vst [vmem:[#allocation2 + $0x58] sm:$0x1] %v369_v9  ;;  %390 = vst [vmem:[#allocation2 + $0x38] sm:$0xff] %v4542_v24  ;;  %v947_v41 = vrot.slane %v4542_v24, 1  ;;  %v2662_v5 = vld [vmem:[%s6309_s3 + $0xf58] sm:$0xff]  ;;  %v3060_v9 = vpack.c.bf16 %v2664_v3, %v2660_v2 }
  0x61   : > { %v361_v18 = vrot.slane %v344_v7, 7  ;;  %v3046_v31 = vpack.c.bf16 %v2631_v16, %v2627_v15  ;;  %393 = vst [vmem:[#allocation2 + $0x50] sm:$0x1] %v367_v28  ;;  %v2666_v6 = vld [vmem:[%s6309_s3 + $0xf78] sm:$0xff]  ;;  %v2665_v16 = vld [vmem:[%s6309_s3 + $0xf70] sm:$0xff]  ;;  %v408_v48 = vld [vmem:[%s6309_s3 + $0x28] sm:$0xff] }
  0x62   : > { %3035 = vmatpush1.bf16.msra.mxu0 %v3034_v29  ;;  %v2638_v29 = vld [vmem:[%s6309_s3 + $0xe98] sm:$0xff]  ;;  %v3188_v15 = vpack.c.bf16 %v2666_v6, %v2662_v5  ;;  %v411_v2 = vld [vmem:[%s6309_s3 + $0x40] sm:$0xff] }
  0x63   : > { %3163 = vmatpush1.bf16.msra.mxu1 %v3162_v25  ;;  %3037 = vmatprep.subr.bf16.mxu0 %v3036_v36  ;;  %385 = vst [vmem:[#allocation2 + $0x10] sm:$0xfe] %v361_v18  ;;  %v4552_v32 = vsel %vm358_vm0, %v361_v18, %v367_v28  ;;  %v2639_v25 = vld [vmem:[%s6309_s3 + $0xea0] sm:$0xff]  ;;  %v2637_v36 = vld [vmem:[%s6309_s3 + $0xe90] sm:$0xff]  ;;  %v3176_v37 = vpack.c.bf16 %v2642_v30, %v2638_v29  ;;  %v2672_v18 = vld [vmem:[%s6309_s3 + $0xfa8] sm:$0xff] }
  0x64   : > { %3165 = vmatprep.subr.bf16.mxu1 %v3164_v39  ;;  %389 = vst [vmem:[#allocation2 + $0x30] sm:$0xff] %v4552_v32  ;;  %v2646_v39 = vld [vmem:[%s6309_s3 + $0xed8] sm:$0xff]  ;;  %v3050_v43 = vpack.c.bf16 %v2639_v25, %v2635_v35  ;;  %v3178_v45 = vpack.c.bf16 %v2641_v22, %v2637_v36  ;;  %v3064_v28 = vpack.c.bf16 %v2672_v18, %v2668_v17  ;;  %v2667_v29 = vld [vmem:[%s6309_s3 + $0xf80] sm:$0xff]  ;;  %v2676_v35 = vld [vmem:[%s6309_s3 + $0xfc8] sm:$0xff] }
  0x65   : > { %v662_v44 = vld [vmem:[#allocation2 + $0x18] sm:$0xfe]  ;;  %v2671_v30 = vld [vmem:[%s6309_s3 + $0xfa0] sm:$0xff]  ;;  %v2680_v25 = vld [vmem:[%s6309_s3 + $0xfe8] sm:$0xff] }
  0x66   : > { %3039 = vmatpush1.bf16.msra.mxu0 %v3038_v51  ;;  %v946_v50 = vrot.slane %v662_v44, 1  ;;  %v3180_v51 = vpack.c.bf16 %v2650_v26, %v2646_v39  ;;  %v2678_v36 = vld [vmem:[%s6309_s3 + $0xfd8] sm:$0xff]  ;;  %v3066_v22 = vpack.c.bf16 %v2671_v30, %v2667_v29  ;;  %v3068_v39 = vpack.c.bf16 %v2680_v25, %v2676_v35  ;;  %v2679_v26 = vld [vmem:[%s6309_s3 + $0xfe0] sm:$0xff]  ;;  %v421_v29 = vld [vmem:[%s6309_s3 + $0x90] sm:$0xff] }
  0x67   : > { %3167 = vmatpush1.bf16.msra.mxu1 %v3166_v52  ;;  %3041 = vmatprep.subr.bf16.mxu0 %v3040_v53  ;;  %v2656_v52 = vld [vmem:[%s6309_s3 + $0xf28] sm:$0xff]  ;;  %v2654_v53 = vld [vmem:[%s6309_s3 + $0xf18] sm:$0xff]  ;;  %v415_v6 = vld [vmem:[%s6309_s3 + $0x60] sm:$0xff] }
  0x68   : > { %3169 = vmatprep.subr.bf16.mxu1 %v3168_v59  ;;  %v948_v55 = vsel %vm936_vm2, %v946_v50, %v947_v41  ;;  %v3056_v58 = vpack.c.bf16 %v2656_v52, %v2652_v42  ;;  %v2651_v59 = vld [vmem:[%s6309_s3 + $0xf00] sm:$0xff]  ;;  %v3184_v0 = vpack.c.bf16 %v2658_v54, %v2654_v53  ;;  %v406_v49 = vld [vmem:[%s6309_s3 + $0x18] sm:$0xff]  ;;  %v944_v42 = vrot.slane %v4552_v32, 1  ;;  %v409_v32 = vld [vmem:[%s6309_s3 + $0x30] sm:$0xff] }
  0x69   : > { %1106 = vmatprep.mubr.f32.mxu0 %v948_v55  ;;  %1260 = vmatprep.mubr.f32.mxu1 %v948_v55  ;;  %v3058_v7 = vpack.c.bf16 %v2655_v62, %v2651_v59  ;;  %v410_v50 = vld [vmem:[%s6309_s3 + $0x38] sm:$0xff]  ;;  %v3200_v53 = vpack.c.bf16 %v408_v48, %v404_v46  ;;  %v403_v54 = vld [vmem:[%s6309_s3] sm:$0xff]  ;;  %v416_v59 = vld [vmem:[%s6309_s3 + $0x68] sm:$0xff]  ;;  %v3206_v18 = vpack.c.bf16 %v415_v6, %v411_v2 }
  0x6a   : > { %3043 = vmatpush1.bf16.msra.mxu0 %v3042_v8  ;;  %v3186_v8 = vpack.c.bf16 %v2657_v1, %v2653_v63  ;;  %v661_v44 = vld [vmem:[#allocation2 + $0x10] sm:$0xfe]  ;;  %v407_v55 = vld [vmem:[%s6309_s3 + $0x20] sm:$0xff]  ;;  %v414_v62 = vld [vmem:[%s6309_s3 + $0x58] sm:$0xff] }
  0x6b   : > { %3171 = vmatpush1.bf16.msra.mxu1 %v3170_v11  ;;  %3045 = vmatprep.subr.bf16.mxu0 %v3044_v14  ;;  %v2663_v11 = vld [vmem:[%s6309_s3 + $0xf60] sm:$0xff]  ;;  %v2661_v14 = vld [vmem:[%s6309_s3 + $0xf50] sm:$0xff]  ;;  %v943_v27 = vrot.slane %v661_v44, 1  ;;  %v418_v63 = vld [vmem:[%s6309_s3 + $0x78] sm:$0xff]  ;;  %v3202_v1 = vpack.c.bf16 %v407_v55, %v403_v54 }
  0x6c   : > { %3173 = vmatprep.subr.bf16.mxu1 %v3172_v19  ;;  %v2670_v19 = vld [vmem:[%s6309_s3 + $0xf98] sm:$0xff]  ;;  %v3062_v21 = vpack.c.bf16 %v2663_v11, %v2659_v10  ;;  %v3190_v23 = vpack.c.bf16 %v2665_v16, %v2661_v14  ;;  %v420_v10 = vld [vmem:[%s6309_s3 + $0x88] sm:$0xff]  ;;  %v441_v55 = vld [vmem:[%s6309_s3 + $0x130] sm:$0xff] }
  0x6d   : > { %v424_v11 = vld [vmem:[%s6309_s3 + $0xa8] sm:$0xff]  ;;  %v666_v14 = vld [vmem:[#allocation2 + $0x58] sm:$0x1]  ;;  %v445_v2 = vld [vmem:[%s6309_s3 + $0x150] sm:$0xff] }
  0x6e   : > { %3047 = vmatpush1.bf16.msra.mxu0 %v3046_v31  ;;  %v2669_v31 = vld [vmem:[%s6309_s3 + $0xf90] sm:$0xff]  ;;  %v426_v16 = vld [vmem:[%s6309_s3 + $0xb8] sm:$0xff]  ;;  %v955_v17 = vrot.slane %v666_v14, 1  ;;  %v428_v35 = vld [vmem:[%s6309_s3 + $0xc8] sm:$0xff] }
  0x6f   : > { %3175 = vmatpush1.bf16.msra.mxu1 %v3174_v33  ;;  %3049 = vmatprep.subr.bf16.mxu0 %v3048_v34  ;;  %v3192_v33 = vpack.c.bf16 %v2674_v20, %v2670_v19  ;;  %v2673_v34 = vld [vmem:[%s6309_s3 + $0xfb0] sm:$0xff]  ;;  %v432_v25 = vld [vmem:[%s6309_s3 + $0xe8] sm:$0xff]  ;;  %v430_v24 = vld [vmem:[%s6309_s3 + $0xd8] sm:$0xff] }
  0x70   : > { %3177 = vmatprep.subr.bf16.mxu1 %v3176_v37  ;;  %v2682_v37 = vld [vmem:[%s6309_s3 + $0xff8] sm:$0xff]  ;;  %v3194_v38 = vpack.c.bf16 %v2673_v34, %v2669_v31  ;;  %v665_v19 = vld [vmem:[#allocation2 + $0x50] sm:$0x1]  ;;  %v956_v30 = vsel %vm936_vm2, %v947_v41, %v955_v17  ;;  %v440_v46 = vld [vmem:[%s6309_s3 + $0x128] sm:$0xff] }
  0x71   : > { %v953_v31 = vrot.slane %v665_v19, 1  ;;  %v425_v34 = vld [vmem:[%s6309_s3 + $0xb0] sm:$0xff]  ;;  %v434_v41 = vld [vmem:[%s6309_s3 + $0xf8] sm:$0xff]  ;;  %v452_v6 = vld [vmem:[%s6309_s3 + $0x188] sm:$0xff] }
  0x72   : > { %3051 = vmatpush1.bf16.msra.mxu0 %v3050_v43  ;;  %v2677_v43 = vld [vmem:[%s6309_s3 + $0xfd0] sm:$0xff]  ;;  %v3340_v44 = vpack.c.bf16 %v434_v41, %v430_v24  ;;  %v438_v48 = vld [vmem:[%s6309_s3 + $0x118] sm:$0xff]  ;;  %v468_v41 = vld [vmem:[%s6309_s3 + $0x208] sm:$0xff] }
  0x73   : > { %3179 = vmatpush1.bf16.msra.mxu1 %v3178_v45  ;;  %3053 = vmatprep.subr.bf16.mxu0 %v3052_v47  ;;  %v3196_v45 = vpack.c.bf16 %v2682_v37, %v2678_v36  ;;  %v2681_v47 = vld [vmem:[%s6309_s3 + $0xff0] sm:$0xff]  ;;  %v954_v36 = vsel %vm936_vm2, %v944_v42, %v953_v31 }
  0x74   : > { %3181 = vmatprep.subr.bf16.mxu1 %v3180_v51  ;;  %v3070_v51 = vpack.c.bf16 %v2679_v26, %v2675_v40  ;;  %v3198_v52 = vpack.c.bf16 %v2681_v47, %v2677_v43  ;;  %v3338_v40 = vpack.c.bf16 %v425_v34, %v421_v29  ;;  %v431_v26 = vld [vmem:[%s6309_s3 + $0xe0] sm:$0xff]  ;;  %v429_v43 = vld [vmem:[%s6309_s3 + $0xd0] sm:$0xff]  ;;  %v436_v47 = vld [vmem:[%s6309_s3 + $0x108] sm:$0xff] }
  0x75   : > { %v453_v17 = vld [vmem:[%s6309_s3 + $0x190] sm:$0xff]  ;;  %v463_v34 = vld [vmem:[%s6309_s3 + $0x1e0] sm:$0xff] }
  0x76   : > { %3055 = vmatpush1.bf16.msra.mxu0 %v3054_v56  ;;  %v405_v56 = vld [vmem:[%s6309_s3 + $0x10] sm:$0xff] }
  0x77   : > { %3183 = vmatpush1.bf16.msra.mxu1 %v3182_v57  ;;  %3057 = vmatprep.subr.bf16.mxu0 %v3056_v58  ;;  %v3328_v57 = vpack.c.bf16 %v410_v50, %v406_v49  ;;  %v412_v58 = vld [vmem:[%s6309_s3 + $0x48] sm:$0xff]  ;;  %v3330_v3 = vpack.c.bf16 %v409_v32, %v405_v56  ;;  %v442_v49 = vld [vmem:[%s6309_s3 + $0x138] sm:$0xff]  ;;  %v457_v19 = vld [vmem:[%s6309_s3 + $0x1b0] sm:$0xff] }
  0x78   : > { %3185 = vmatprep.subr.bf16.mxu1 %v3184_v0  ;;  %v945_v0 = vsel %vm936_vm2, %v943_v27, %v944_v42  ;;  %v3204_v5 = vpack.c.bf16 %v416_v59, %v412_v58  ;;  %v3216_v27 = vpack.c.bf16 %v440_v46, %v436_v47  ;;  %v435_v42 = vld [vmem:[%s6309_s3 + $0x100] sm:$0xff]  ;;  %v3344_v54 = vpack.c.bf16 %v442_v49, %v438_v48  ;;  %v444_v56 = vld [vmem:[%s6309_s3 + $0x148] sm:$0xff]  ;;  %v446_v32 = vld [vmem:[%s6309_s3 + $0x158] sm:$0xff] }
  0x79   : > { %v450_v58 = vld [vmem:[%s6309_s3 + $0x178] sm:$0xff]  ;;  %v465_v24 = vld [vmem:[%s6309_s3 + $0x1f0] sm:$0xff]  ;;  %v476_v46 = vld [vmem:[%s6309_s3 + $0x248] sm:$0xff] }
  0x7a   : > { %3059 = vmatpush1.bf16.msra.mxu0 %v3058_v7  ;;  %v413_v7 = vld [vmem:[%s6309_s3 + $0x50] sm:$0xff]  ;;  %v480_v48 = vld [vmem:[%s6309_s3 + $0x268] sm:$0xff]  ;;  %v478_v49 = vld [vmem:[%s6309_s3 + $0x258] sm:$0xff] }
  0x7b   : > { %3187 = vmatpush1.bf16.msra.mxu1 %v3186_v8  ;;  %3061 = vmatprep.subr.bf16.mxu0 %v3060_v9  ;;  %v417_v8 = vld [vmem:[%s6309_s3 + $0x70] sm:$0xff]  ;;  %v3332_v9 = vpack.c.bf16 %v418_v63, %v414_v62 }
  0x7c   : > { %3189 = vmatprep.subr.bf16.mxu1 %v3188_v15  ;;  %v422_v15 = vld [vmem:[%s6309_s3 + $0x98] sm:$0xff]  ;;  %v3334_v20 = vpack.c.bf16 %v417_v8, %v413_v7  ;;  %v456_v7 = vld [vmem:[%s6309_s3 + $0x1a8] sm:$0xff]  ;;  %v473_v47 = vld [vmem:[%s6309_s3 + $0x230] sm:$0xff] }
  0x7d   : > { %v454_v8 = vld [vmem:[%s6309_s3 + $0x198] sm:$0xff]  ;;  %v3224_v14 = vpack.c.bf16 %v456_v7, %v452_v6  ;;  %v489_v6 = vld [vmem:[%s6309_s3 + $0x2b0] sm:$0xff]  ;;  %v492_v7 = vld [vmem:[%s6309_s3 + $0x2c8] sm:$0xff] }
  0x7e   : > { %3063 = vmatpush1.bf16.msra.mxu0 %v3062_v21  ;;  %v3208_v21 = vpack.c.bf16 %v424_v11, %v420_v10 }
  0x7f   : > { %3191 = vmatpush1.bf16.msra.mxu1 %v3190_v23  ;;  %3065 = vmatprep.subr.bf16.mxu0 %v3064_v28  ;;  %v419_v23 = vld [vmem:[%s6309_s3 + $0x80] sm:$0xff] }
  0x80   : > { %3193 = vmatprep.subr.bf16.mxu1 %v3192_v33  ;;  %v423_v28 = vld [vmem:[%s6309_s3 + $0xa0] sm:$0xff]  ;;  %v3336_v33 = vpack.c.bf16 %v426_v16, %v422_v15 }
  0x81   : > { %v3210_v37 = vpack.c.bf16 %v423_v28, %v419_v23  ;;  %v451_v15 = vld [vmem:[%s6309_s3 + $0x180] sm:$0xff]  ;;  %v462_v23 = vld [vmem:[%s6309_s3 + $0x1d8] sm:$0xff] }
  0x82   : > { %3067 = vmatpush1.bf16.msra.mxu0 %v3066_v22  ;;  %v396_v22 = vld [vmem:[#allocation2 + $0x8] sm:$0xff]  ;;  %v455_v16 = vld [vmem:[%s6309_s3 + $0x1a0] sm:$0xff]  ;;  %v466_v28 = vld [vmem:[%s6309_s3 + $0x1f8] sm:$0xff] }
  0x83   : > { %3195 = vmatpush1.bf16.msra.mxu1 %v3194_v38  ;;  %3069 = vmatprep.subr.bf16.mxu0 %v3068_v39  ;;  %v3212_v38 = vpack.c.bf16 %v432_v25, %v428_v35  ;;  %v427_v39 = vld [vmem:[%s6309_s3 + $0xc0] sm:$0xff]  ;;  %v3226_v29 = vpack.c.bf16 %v455_v16, %v451_v15  ;;  %v461_v35 = vld [vmem:[%s6309_s3 + $0x1d0] sm:$0xff]  ;;  %v3356_v25 = vpack.c.bf16 %v466_v28, %v462_v23  ;;  %v504_v23 = vld [vmem:[%s6309_s3 + $0x328] sm:$0xff] }
  0x84   : > { %3197 = vmatprep.subr.bf16.mxu1 %v3196_v45  ;;  %v433_v45 = vld [vmem:[%s6309_s3 + $0xf0] sm:$0xff]  ;;  %v3214_v50 = vpack.c.bf16 %v431_v26, %v427_v39  ;;  %v467_v26 = vld [vmem:[%s6309_s3 + $0x200] sm:$0xff]  ;;  %v502_v28 = vld [vmem:[%s6309_s3 + $0x318] sm:$0xff] }
  0x85   : > { %v491_v16 = vld [vmem:[%s6309_s3 + $0x2c0] sm:$0xff] }
  0x86   : > { %3071 = vmatpush1.bf16.msra.mxu0 %v3070_v51  ;;  %v3342_v51 = vpack.c.bf16 %v433_v45, %v429_v43  ;;  %v471_v43 = vld [vmem:[%s6309_s3 + $0x220] sm:$0xff] }
  0x87   : > { %3199 = vmatpush1.bf16.msra.mxu1 %v3198_v52  ;;  %3201 = vmatprep.subr.bf16.mxu0 %v3200_v53  ;;  %v439_v52 = vld [vmem:[%s6309_s3 + $0x120] sm:$0xff]  ;;  %v437_v53 = vld [vmem:[%s6309_s3 + $0x110] sm:$0xff] }
  0x88   : > { %3329 = vmatprep.subr.bf16.mxu1 %v3328_v57  ;;  %v448_v57 = vld [vmem:[%s6309_s3 + $0x168] sm:$0xff]  ;;  %v3218_v59 = vpack.c.bf16 %v439_v52, %v435_v42  ;;  %v3346_v62 = vpack.c.bf16 %v441_v55, %v437_v53  ;;  %v3236_v42 = vpack.c.bf16 %v480_v48, %v476_v46  ;;  %v475_v52 = vld [vmem:[%s6309_s3 + $0x240] sm:$0xff]  ;;  %v513_v46 = vld [vmem:[%s6309_s3 + $0x370] sm:$0xff] }
  0x89   : > { %1107 = vmatmul.mubr.f32.vlgmr.msra.gmra.mrb[0].mxu0 %v945_v0  ;;  %v3220_v63 = vpack.c.bf16 %v448_v57, %v444_v56  ;;  %v479_v53 = vld [vmem:[%s6309_s3 + $0x260] sm:$0xff]  ;;  %v481_v56 = vld [vmem:[%s6309_s3 + $0x270] sm:$0xff]  ;;  %v484_v57 = vld [vmem:[%s6309_s3 + $0x288] sm:$0xff] }
  0x8a   : > { %1261 = vmatmul.mubr.f32.vlgmr.msra.gmra.mrb[0].mxu1 %v945_v0  ;;  %3203 = vmatpush1.bf16.msra.mxu0 %v3202_v1  ;;  %v443_v0 = vld [vmem:[%s6309_s3 + $0x140] sm:$0xff]  ;;  %v516_v48 = vld [vmem:[%s6309_s3 + $0x388] sm:$0xff] }
  0x8b   : > { %3331 = vmatpush1.bf16.msra.mxu1 %v3330_v3  ;;  %3205 = vmatprep.subr.bf16.mxu0 %v3204_v5  ;;  %v447_v1 = vld [vmem:[%s6309_s3 + $0x160] sm:$0xff]  ;;  %v3348_v3 = vpack.c.bf16 %v450_v58, %v446_v32  ;;  %v449_v5 = vld [vmem:[%s6309_s3 + $0x170] sm:$0xff]  ;;  %v488_v32 = vld [vmem:[%s6309_s3 + $0x2a8] sm:$0xff] }
  0x8c   : > { %3333 = vmatprep.subr.bf16.mxu1 %v3332_v9  ;;  %1112 = vmatprep.mubr.f32.mxu0 %v956_v30  ;;  %v458_v9 = vld [vmem:[%s6309_s3 + $0x1b8] sm:$0xff]  ;;  %v3222_v10 = vpack.c.bf16 %v447_v1, %v443_v0  ;;  %v3350_v11 = vpack.c.bf16 %v449_v5, %v445_v2  ;;  %v3240_v0 = vpack.c.bf16 %v488_v32, %v484_v57  ;;  %v483_v1 = vld [vmem:[%s6309_s3 + $0x280] sm:$0xff]  ;;  %v521_v57 = vld [vmem:[%s6309_s3 + $0x3b0] sm:$0xff] }
  0x8d   : > { %1266 = vmatprep.mubr.f32.mxu1 %v956_v30  ;;  %1113 = vmatmul.mubr.f32.gmra.mrb[2].mxu0 %v954_v36  ;;  %v3354_v30 = vpack.c.bf16 %v457_v19, %v453_v17  ;;  %v486_v58 = vld [vmem:[%s6309_s3 + $0x298] sm:$0xff]  ;;  %v487_v2 = vld [vmem:[%s6309_s3 + $0x2a0] sm:$0xff]  ;;  %v524_v32 = vld [vmem:[%s6309_s3 + $0x3c8] sm:$0xff] }
  0x8e   : > { %3207 = vmatpush1.bf16.msra.mxu0 %v3206_v18  ;;  %1267 = vmatmul.mubr.f32.gmra.mrb[2].mxu1 %v954_v36  ;;  %v3352_v18 = vpack.c.bf16 %v458_v9, %v454_v8  ;;  %v472_v36 = vld [vmem:[%s6309_s3 + $0x228] sm:$0xff]  ;;  %v494_v9 = vld [vmem:[%s6309_s3 + $0x2d8] sm:$0xff]  ;;  %v495_v17 = vld [vmem:[%s6309_s3 + $0x2e0] sm:$0xff] }
  0x8f   : > { %3335 = vmatpush1.bf16.msra.mxu1 %v3334_v20  ;;  %3209 = vmatprep.subr.bf16.mxu0 %v3208_v21  ;;  %v460_v20 = vld [vmem:[%s6309_s3 + $0x1c8] sm:$0xff]  ;;  %v3232_v39 = vpack.c.bf16 %v472_v36, %v468_v41  ;;  %v505_v41 = vld [vmem:[%s6309_s3 + $0x330] sm:$0xff] }
  0x90   : > { %3337 = vmatprep.subr.bf16.mxu1 %v3336_v33  ;;  %1337 = vmatprep.mubr.f32.mxu0 %v396_v22  ;;  %v464_v21 = vld [vmem:[%s6309_s3 + $0x1e8] sm:$0xff]  ;;  %v459_v33 = vld [vmem:[%s6309_s3 + $0x1c0] sm:$0xff] }
  0x91   : > { %1491 = vmatprep.mubr.f32.mxu1 %v396_v22  ;;  %v3228_v31 = vpack.c.bf16 %v464_v21, %v460_v20  ;;  %v474_v22 = vld [vmem:[%s6309_s3 + $0x238] sm:$0xff]  ;;  %v496_v8 = vld [vmem:[%s6309_s3 + $0x2e8] sm:$0xff]  ;;  %v497_v20 = vld [vmem:[%s6309_s3 + $0x2f0] sm:$0xff] }
  0x92   : > { %3211 = vmatpush1.bf16.msra.mxu0 %v3210_v37  ;;  %v470_v37 = vld [vmem:[%s6309_s3 + $0x218] sm:$0xff]  ;;  %v3244_v15 = vpack.c.bf16 %v496_v8, %v492_v7  ;;  %v500_v21 = vld [vmem:[%s6309_s3 + $0x308] sm:$0xff]  ;;  %v529_v7 = vld [vmem:[%s6309_s3 + $0x3f0] sm:$0xff] }
  0x93   : > { %3339 = vmatpush1.bf16.msra.mxu1 %v3338_v40  ;;  %3213 = vmatprep.subr.bf16.mxu0 %v3212_v38  ;;  %v3230_v40 = vpack.c.bf16 %v463_v34, %v459_v33  ;;  %v3358_v38 = vpack.c.bf16 %v465_v24, %v461_v35  ;;  %v3360_v45 = vpack.c.bf16 %v474_v22, %v470_v37  ;;  %v499_v34 = vld [vmem:[%s6309_s3 + $0x300] sm:$0xff]  ;;  %v508_v36 = vld [vmem:[%s6309_s3 + $0x348] sm:$0xff]  ;;  %v510_v22 = vld [vmem:[%s6309_s3 + $0x358] sm:$0xff] }
  0x94   : > { %3341 = vmatprep.subr.bf16.mxu1 %v3340_v44  ;;  %v469_v44 = vld [vmem:[%s6309_s3 + $0x210] sm:$0xff]  ;;  %v3248_v33 = vpack.c.bf16 %v504_v23, %v500_v21  ;;  %v503_v35 = vld [vmem:[%s6309_s3 + $0x320] sm:$0xff]  ;;  %v512_v37 = vld [vmem:[%s6309_s3 + $0x368] sm:$0xff] }
  0x95   : > { %v532_v8 = vld [vmem:[%s6309_s3 + $0x408] sm:$0xff]  ;;  %v537_v21 = vld [vmem:[%s6309_s3 + $0x430] sm:$0xff] }
  0x96   : > { %3215 = vmatpush1.bf16.msra.mxu0 %v3214_v50  ;;  %v482_v50 = vld [vmem:[%s6309_s3 + $0x278] sm:$0xff]  ;;  %v540_v23 = vld [vmem:[%s6309_s3 + $0x448] sm:$0xff] }
  0x97   : > { %3343 = vmatpush1.bf16.msra.mxu1 %v3342_v51  ;;  %3217 = vmatprep.subr.bf16.mxu0 %v3216_v27  ;;  %v3234_v51 = vpack.c.bf16 %v471_v43, %v467_v26  ;;  %v3362_v27 = vpack.c.bf16 %v473_v47, %v469_v44  ;;  %v3364_v55 = vpack.c.bf16 %v482_v50, %v478_v49  ;;  %v507_v43 = vld [vmem:[%s6309_s3 + $0x340] sm:$0xff]  ;;  %v520_v49 = vld [vmem:[%s6309_s3 + $0x3a8] sm:$0xff]  ;;  %v518_v50 = vld [vmem:[%s6309_s3 + $0x398] sm:$0xff] }
  0x98   : > { %3345 = vmatprep.subr.bf16.mxu1 %v3344_v54  ;;  %v477_v54 = vld [vmem:[%s6309_s3 + $0x250] sm:$0xff]  ;;  %v3252_v26 = vpack.c.bf16 %v512_v37, %v508_v36  ;;  %v511_v44 = vld [vmem:[%s6309_s3 + $0x360] sm:$0xff] }
  0x99   : > { %v545_v37 = vld [vmem:[%s6309_s3 + $0x470] sm:$0xff] }
  0x9a   : > { %3219 = vmatpush1.bf16.msra.mxu0 %v3218_v59  ;;  %v490_v59 = vld [vmem:[%s6309_s3 + $0x2b8] sm:$0xff] }
  0x9b   : > { %3347 = vmatpush1.bf16.msra.mxu1 %v3346_v62  ;;  %3221 = vmatprep.subr.bf16.mxu0 %v3220_v63  ;;  %v3238_v62 = vpack.c.bf16 %v479_v53, %v475_v52  ;;  %v3366_v63 = vpack.c.bf16 %v481_v56, %v477_v54  ;;  %v3368_v5 = vpack.c.bf16 %v490_v59, %v486_v58  ;;  %v515_v53 = vld [vmem:[%s6309_s3 + $0x380] sm:$0xff]  ;;  %v528_v58 = vld [vmem:[%s6309_s3 + $0x3e8] sm:$0xff]  ;;  %v526_v59 = vld [vmem:[%s6309_s3 + $0x3d8] sm:$0xff] }
  0x9c   : > { %3349 = vmatprep.subr.bf16.mxu1 %v3348_v3  ;;  %v485_v3 = vld [vmem:[%s6309_s3 + $0x290] sm:$0xff]  ;;  %v3256_v52 = vpack.c.bf16 %v520_v49, %v516_v48  ;;  %v519_v54 = vld [vmem:[%s6309_s3 + $0x3a0] sm:$0xff] }
  0x9d   : > { %v553_v49 = vld [vmem:[%s6309_s3 + $0x4b0] sm:$0xff] }
  0x9e   : > { %3223 = vmatpush1.bf16.msra.mxu0 %v3222_v10  ;;  %v498_v10 = vld [vmem:[%s6309_s3 + $0x2f8] sm:$0xff] }
  0x9f   : > { %3351 = vmatpush1.bf16.msra.mxu1 %v3350_v11  ;;  %3225 = vmatprep.subr.bf16.mxu0 %v3224_v14  ;;  %v3242_v11 = vpack.c.bf16 %v487_v2, %v483_v1  ;;  %v3370_v14 = vpack.c.bf16 %v489_v6, %v485_v3  ;;  %v3372_v19 = vpack.c.bf16 %v498_v10, %v494_v9  ;;  %v523_v2 = vld [vmem:[%s6309_s3 + $0x3c0] sm:$0xff]  ;;  %v536_v9 = vld [vmem:[%s6309_s3 + $0x428] sm:$0xff]  ;;  %v534_v10 = vld [vmem:[%s6309_s3 + $0x418] sm:$0xff] }
  0xa0   : > { %3353 = vmatprep.subr.bf16.mxu1 %v3352_v18  ;;  %v493_v18 = vld [vmem:[%s6309_s3 + $0x2d0] sm:$0xff]  ;;  %v3260_v1 = vpack.c.bf16 %v528_v58, %v524_v32  ;;  %v527_v3 = vld [vmem:[%s6309_s3 + $0x3e0] sm:$0xff] }
  0xa1   : > { %v555_v32 = vld [vmem:[%s6309_s3 + $0x4c0] sm:$0xff] }
  0xa2   : > { %3227 = vmatpush1.bf16.msra.mxu0 %v3226_v29  ;;  %v506_v29 = vld [vmem:[%s6309_s3 + $0x338] sm:$0xff]  ;;  %v559_v58 = vld [vmem:[%s6309_s3 + $0x4e0] sm:$0xff] }
  0xa3   : > { %3355 = vmatpush1.bf16.msra.mxu1 %v3354_v30  ;;  %3229 = vmatprep.subr.bf16.mxu0 %v3228_v31  ;;  %v3246_v30 = vpack.c.bf16 %v495_v17, %v491_v16  ;;  %v3374_v31 = vpack.c.bf16 %v497_v20, %v493_v18  ;;  %v3376_v24 = vpack.c.bf16 %v506_v29, %v502_v28  ;;  %v531_v17 = vld [vmem:[%s6309_s3 + $0x400] sm:$0xff]  ;;  %v544_v28 = vld [vmem:[%s6309_s3 + $0x468] sm:$0xff]  ;;  %v542_v29 = vld [vmem:[%s6309_s3 + $0x458] sm:$0xff] }
  0xa4   : > { %3357 = vmatprep.subr.bf16.mxu1 %v3356_v25  ;;  %v501_v25 = vld [vmem:[%s6309_s3 + $0x310] sm:$0xff]  ;;  %v3264_v16 = vpack.c.bf16 %v536_v9, %v532_v8  ;;  %v535_v18 = vld [vmem:[%s6309_s3 + $0x420] sm:$0xff] }
  0xa5   : > { %v563_v8 = vld [vmem:[%s6309_s3 + $0x500] sm:$0xff] }
  0xa6   : > { %3231 = vmatpush1.bf16.msra.mxu0 %v3230_v40  ;;  %v514_v40 = vld [vmem:[%s6309_s3 + $0x378] sm:$0xff]  ;;  %v567_v9 = vld [vmem:[%s6309_s3 + $0x520] sm:$0xff] }
  0xa7   : > { %3359 = vmatpush1.bf16.msra.mxu1 %v3358_v38  ;;  %3233 = vmatprep.subr.bf16.mxu0 %v3232_v39  ;;  %v3250_v38 = vpack.c.bf16 %v503_v35, %v499_v34  ;;  %v3378_v39 = vpack.c.bf16 %v505_v41, %v501_v25  ;;  %v3380_v47 = vpack.c.bf16 %v514_v40, %v510_v22  ;;  %v539_v25 = vld [vmem:[%s6309_s3 + $0x440] sm:$0xff]  ;;  %v541_v41 = vld [vmem:[%s6309_s3 + $0x450] sm:$0xff]  ;;  %v548_v22 = vld [vmem:[%s6309_s3 + $0x488] sm:$0xff] }
  0xa8   : > { %3361 = vmatprep.subr.bf16.mxu1 %v3360_v45  ;;  %v509_v45 = vld [vmem:[%s6309_s3 + $0x350] sm:$0xff]  ;;  %v3268_v35 = vpack.c.bf16 %v544_v28, %v540_v23  ;;  %v552_v40 = vld [vmem:[%s6309_s3 + $0x4a8] sm:$0xff]  ;;  %v571_v23 = vld [vmem:[%s6309_s3 + $0x540] sm:$0xff] }
  0xa9   : > { %v575_v28 = vld [vmem:[%s6309_s3 + $0x560] sm:$0xff] }
  0xaa   : > { %3235 = vmatpush1.bf16.msra.mxu0 %v3234_v51  ;;  %v522_v51 = vld [vmem:[%s6309_s3 + $0x3b8] sm:$0xff] }
  0xab   : > { %3363 = vmatpush1.bf16.msra.mxu1 %v3362_v27  ;;  %3237 = vmatprep.subr.bf16.mxu0 %v3236_v42  ;;  %v3254_v27 = vpack.c.bf16 %v511_v44, %v507_v43  ;;  %v3382_v42 = vpack.c.bf16 %v513_v46, %v509_v45  ;;  %v3384_v56 = vpack.c.bf16 %v522_v51, %v518_v50  ;;  %v547_v45 = vld [vmem:[%s6309_s3 + $0x480] sm:$0xff]  ;;  %v549_v46 = vld [vmem:[%s6309_s3 + $0x490] sm:$0xff]  ;;  %v556_v50 = vld [vmem:[%s6309_s3 + $0x4c8] sm:$0xff] }
  0xac   : > { %3365 = vmatprep.subr.bf16.mxu1 %v3364_v55  ;;  %v517_v55 = vld [vmem:[%s6309_s3 + $0x390] sm:$0xff]  ;;  %v3398_v43 = vpack.c.bf16 %v545_v37, %v541_v41  ;;  %v3272_v44 = vpack.c.bf16 %v552_v40, %v548_v22  ;;  %v560_v51 = vld [vmem:[%s6309_s3 + $0x4e8] sm:$0xff]  ;;  %v579_v37 = vld [vmem:[%s6309_s3 + $0x580] sm:$0xff] }
  0xad   : > { %v583_v22 = vld [vmem:[%s6309_s3 + $0x5a0] sm:$0xff]  ;;  %v581_v40 = vld [vmem:[%s6309_s3 + $0x590] sm:$0xff] }
  0xae   : > { %3239 = vmatpush1.bf16.msra.mxu0 %v3238_v62  ;;  %v530_v62 = vld [vmem:[%s6309_s3 + $0x3f8] sm:$0xff] }
  0xaf   : > { %3367 = vmatpush1.bf16.msra.mxu1 %v3366_v63  ;;  %3241 = vmatprep.subr.bf16.mxu0 %v3240_v0  ;;  %v3258_v63 = vpack.c.bf16 %v519_v54, %v515_v53  ;;  %v3386_v0 = vpack.c.bf16 %v521_v57, %v517_v55  ;;  %v3388_v6 = vpack.c.bf16 %v530_v62, %v526_v59  ;;  %v5169_v53 = vld [vmem:[#allocation2 + $0x20] sm:$0xff]  ;;  %v398_v54 = vld [vmem:[#allocation2 + $0x18] sm:$0xff]  ;;  %v557_v59 = vld [vmem:[%s6309_s3 + $0x4d0] sm:$0xff] }
  0xb0   : > { %3369 = vmatprep.subr.bf16.mxu1 %v3368_v5  ;;  %v525_v5 = vld [vmem:[%s6309_s3 + $0x3d0] sm:$0xff]  ;;  %v3276_v57 = vpack.c.bf16 %v560_v51, %v556_v50  ;;  %v591_v50 = vld [vmem:[%s6309_s3 + $0x5e0] sm:$0xff] }
  0xb1   : > { %v589_v51 = vld [vmem:[%s6309_s3 + $0x5d0] sm:$0xff] }
  0xb2   : > { %3243 = vmatpush1.bf16.msra.mxu0 %v3242_v11  ;;  %v538_v11 = vld [vmem:[%s6309_s3 + $0x438] sm:$0xff] }
  0xb3   : > { %3371 = vmatpush1.bf16.msra.mxu1 %v3370_v14  ;;  %3245 = vmatprep.subr.bf16.mxu0 %v3244_v15  ;;  %v3262_v14 = vpack.c.bf16 %v527_v3, %v523_v2  ;;  %v3390_v15 = vpack.c.bf16 %v529_v7, %v525_v5  ;;  %v3392_v20 = vpack.c.bf16 %v538_v11, %v534_v10  ;;  %v566_v2 = vld [vmem:[%s6309_s3 + $0x518] sm:$0xff]  ;;  %v565_v10 = vld [vmem:[%s6309_s3 + $0x510] sm:$0xff] }
  0xb4   : > { %3373 = vmatprep.subr.bf16.mxu1 %v3372_v19  ;;  %v533_v19 = vld [vmem:[%s6309_s3 + $0x410] sm:$0xff]  ;;  %v570_v3 = vld [vmem:[%s6309_s3 + $0x538] sm:$0xff]  ;;  %v3278_v5 = vpack.c.bf16 %v559_v58, %v555_v32 }
  0xb5   : > { %v3394_v34 = vpack.c.bf16 %v537_v21, %v533_v19  ;;  %v3408_v11 = vpack.c.bf16 %v570_v3, %v566_v2  ;;  %v3282_v19 = vpack.c.bf16 %v567_v9, %v563_v8  ;;  %v601_v2 = vld [vmem:[%s6309_s3 + $0x630] sm:$0xff]  ;;  %v604_v3 = vld [vmem:[%s6309_s3 + $0x648] sm:$0xff] }
  0xb6   : > { %3247 = vmatpush1.bf16.msra.mxu0 %v3246_v30  ;;  %v546_v30 = vld [vmem:[%s6309_s3 + $0x478] sm:$0xff] }
  0xb7   : > { %3375 = vmatpush1.bf16.msra.mxu1 %v3374_v31  ;;  %3249 = vmatprep.subr.bf16.mxu0 %v3248_v33  ;;  %v395_v31 = vld [vmem:[#allocation2] sm:$0xff]  ;;  %v3266_v33 = vpack.c.bf16 %v535_v18, %v531_v17  ;;  %v3396_v36 = vpack.c.bf16 %v546_v30, %v542_v29  ;;  %v574_v17 = vld [vmem:[%s6309_s3 + $0x558] sm:$0xff]  ;;  %v573_v29 = vld [vmem:[%s6309_s3 + $0x550] sm:$0xff] }
  0xb8   : > { %3377 = vmatprep.subr.bf16.mxu1 %v3376_v24  ;;  %v543_v24 = vld [vmem:[%s6309_s3 + $0x460] sm:$0xff]  ;;  %v578_v18 = vld [vmem:[%s6309_s3 + $0x578] sm:$0xff] }
  0xb9   : > { %v3412_v30 = vpack.c.bf16 %v578_v18, %v574_v17  ;;  %v609_v17 = vld [vmem:[%s6309_s3 + $0x670] sm:$0xff]  ;;  %v612_v18 = vld [vmem:[%s6309_s3 + $0x688] sm:$0xff] }
  0xba   : > { %3251 = vmatpush1.bf16.msra.mxu0 %v3250_v38  ;;  %v550_v38 = vld [vmem:[%s6309_s3 + $0x498] sm:$0xff] }
  0xbb   : > { %3379 = vmatpush1.bf16.msra.mxu1 %v3378_v39  ;;  %3253 = vmatprep.subr.bf16.mxu0 %v3252_v26  ;;  %v554_v39 = vld [vmem:[%s6309_s3 + $0x4b8] sm:$0xff]  ;;  %v3270_v26 = vpack.c.bf16 %v543_v24, %v539_v25  ;;  %v3286_v24 = vpack.c.bf16 %v575_v28, %v571_v23 }
  0xbc   : > { %3381 = vmatprep.subr.bf16.mxu1 %v3380_v47  ;;  %v551_v47 = vld [vmem:[%s6309_s3 + $0x4a0] sm:$0xff]  ;;  %v3400_v48 = vpack.c.bf16 %v554_v39, %v550_v38  ;;  %v586_v25 = vld [vmem:[%s6309_s3 + $0x5b8] sm:$0xff]  ;;  %v585_v39 = vld [vmem:[%s6309_s3 + $0x5b0] sm:$0xff] }
  0xbd   : > { %v3274_v55 = vpack.c.bf16 %v551_v47, %v547_v45  ;;  %v594_v45 = vld [vmem:[%s6309_s3 + $0x5f8] sm:$0xff]  ;;  %v3290_v47 = vpack.c.bf16 %v583_v22, %v579_v37 }
  0xbe   : > { %3255 = vmatpush1.bf16.msra.mxu0 %v3254_v27  ;;  %v5159_v27 = vld [vmem:[#allocation2 + $0x28] sm:$0xff] }
  0xbf   : > { %3383 = vmatpush1.bf16.msra.mxu1 %v3382_v42  ;;  %3257 = vmatprep.subr.bf16.mxu0 %v3256_v52  ;;  %v558_v42 = vld [vmem:[%s6309_s3 + $0x4d8] sm:$0xff] }
  0xc0   : > { %3385 = vmatprep.subr.bf16.mxu1 %v3384_v56  ;;  %v562_v52 = vld [vmem:[%s6309_s3 + $0x4f8] sm:$0xff]  ;;  %v3402_v56 = vpack.c.bf16 %v553_v49, %v549_v46  ;;  %v3418_v46 = vpack.c.bf16 %v585_v39, %v581_v40  ;;  %v587_v49 = vld [vmem:[%s6309_s3 + $0x5c0] sm:$0xff] }
  0xc1   : > { %v3404_v62 = vpack.c.bf16 %v562_v52, %v558_v42  ;;  %v593_v52 = vld [vmem:[%s6309_s3 + $0x5f0] sm:$0xff]  ;;  %v3294_v32 = vpack.c.bf16 %v591_v50, %v587_v49  ;;  %v623_v39 = vld [vmem:[%s6309_s3 + $0x6e0] sm:$0xff] }
  0xc2   : > { %3259 = vmatpush1.bf16.msra.mxu0 %v3258_v63  ;;  %v561_v63 = vld [vmem:[%s6309_s3 + $0x4f0] sm:$0xff]  ;;  %v3422_v58 = vpack.c.bf16 %v593_v52, %v589_v51  ;;  %v631_v52 = vld [vmem:[%s6309_s3 + $0x720] sm:$0xff] }
  0xc3   : > { %3387 = vmatpush1.bf16.msra.mxu1 %v3386_v0  ;;  %3261 = vmatprep.subr.bf16.mxu0 %v3260_v1  ;;  %v564_v0 = vld [vmem:[%s6309_s3 + $0x508] sm:$0xff] }
  0xc4   : > { %3389 = vmatprep.subr.bf16.mxu1 %v3388_v6  ;;  %v568_v1 = vld [vmem:[%s6309_s3 + $0x528] sm:$0xff]  ;;  %v3406_v6 = vpack.c.bf16 %v561_v63, %v557_v59  ;;  %v599_v63 = vld [vmem:[%s6309_s3 + $0x620] sm:$0xff] }
  0xc5   : > { %v3280_v7 = vpack.c.bf16 %v568_v1, %v564_v0  ;;  %v597_v0 = vld [vmem:[%s6309_s3 + $0x610] sm:$0xff] }
  0xc6   : > { %3263 = vmatpush1.bf16.msra.mxu0 %v3262_v14  ;;  %v569_v14 = vld [vmem:[%s6309_s3 + $0x530] sm:$0xff]  ;;  %v3426_v9 = vpack.c.bf16 %v601_v2, %v597_v0  ;;  %v639_v2 = vld [vmem:[%s6309_s3 + $0x760] sm:$0xff] }
  0xc7   : > { %3391 = vmatpush1.bf16.msra.mxu1 %v3390_v15  ;;  %3265 = vmatprep.subr.bf16.mxu0 %v3264_v16  ;;  %v572_v15 = vld [vmem:[%s6309_s3 + $0x548] sm:$0xff] }
  0xc8   : > { %3393 = vmatprep.subr.bf16.mxu1 %v3392_v20  ;;  %v576_v16 = vld [vmem:[%s6309_s3 + $0x568] sm:$0xff]  ;;  %v3410_v20 = vpack.c.bf16 %v569_v14, %v565_v10  ;;  %v607_v14 = vld [vmem:[%s6309_s3 + $0x660] sm:$0xff] }
  0xc9   : > { %1338 = vmatmul.mubr.f32.vlgmr.msra.gmra.mrb[0].mxu0 %v395_v31  ;;  %v3284_v21 = vpack.c.bf16 %v576_v16, %v572_v15  ;;  %v605_v15 = vld [vmem:[%s6309_s3 + $0x650] sm:$0xff] }
  0xca   : > { %3267 = vmatpush1.bf16.msra.mxu0 %v3266_v33  ;;  %1492 = vmatmul.mubr.f32.vlgmr.msra.gmra.mrb[0].mxu1 %v395_v31  ;;  %v577_v31 = vld [vmem:[%s6309_s3 + $0x570] sm:$0xff]  ;;  %v580_v33 = vld [vmem:[%s6309_s3 + $0x588] sm:$0xff]  ;;  %v3430_v28 = vpack.c.bf16 %v609_v17, %v605_v15  ;;  %v647_v17 = vld [vmem:[%s6309_s3 + $0x7a0] sm:$0xff] }
  0xcb   : > { %3395 = vmatpush1.bf16.msra.mxu1 %v3394_v34  ;;  %3269 = vmatprep.subr.bf16.mxu0 %v3268_v35  ;;  %v584_v34 = vld [vmem:[%s6309_s3 + $0x5a8] sm:$0xff]  ;;  %v582_v35 = vld [vmem:[%s6309_s3 + $0x598] sm:$0xff]  ;;  %v3414_v41 = vpack.c.bf16 %v577_v31, %v573_v29  ;;  %v615_v31 = vld [vmem:[%s6309_s3 + $0x6a0] sm:$0xff] }
  0xcc   : > { %3397 = vmatprep.subr.bf16.mxu1 %v3396_v36  ;;  %1343 = vmatprep.mubr.f32.mxu0 %v5159_v27  ;;  %v3288_v36 = vpack.c.bf16 %v584_v34, %v580_v33  ;;  %v3416_v38 = vpack.c.bf16 %v586_v25, %v582_v35  ;;  %v613_v33 = vld [vmem:[%s6309_s3 + $0x690] sm:$0xff]  ;;  %v620_v25 = vld [vmem:[%s6309_s3 + $0x6c8] sm:$0xff] }
  0xcd   : > { %1497 = vmatprep.mubr.f32.mxu1 %v5159_v27  ;;  %1344 = vmatmul.mubr.f32.gmra.mrb[2].mxu0 %v5169_v53  ;;  %v617_v35 = vld [vmem:[%s6309_s3 + $0x6b0] sm:$0xff] }
  0xce   : > { %3271 = vmatpush1.bf16.msra.mxu0 %v3270_v26  ;;  %1498 = vmatmul.mubr.f32.gmra.mrb[2].mxu1 %v5169_v53  ;;  %v588_v26 = vld [vmem:[%s6309_s3 + $0x5c8] sm:$0xff]  ;;  %v3434_v22 = vpack.c.bf16 %v617_v35, %v613_v33  ;;  %v655_v35 = vld [vmem:[%s6309_s3 + $0x7e0] sm:$0xff] }
  0xcf   : > { %3399 = vmatpush1.bf16.msra.mxu1 %v3398_v43  ;;  %3273 = vmatprep.subr.bf16.mxu0 %v3272_v44  ;;  %v592_v43 = vld [vmem:[%s6309_s3 + $0x5e8] sm:$0xff]  ;;  %v590_v44 = vld [vmem:[%s6309_s3 + $0x5d8] sm:$0xff] }
  0xd0   : > { %3401 = vmatprep.subr.bf16.mxu1 %v3400_v48  ;;  %1414 = vmatprep.mubr.f32.mxu0 %v398_v54  ;;  %v3292_v48 = vpack.c.bf16 %v592_v43, %v588_v26  ;;  %v3420_v42 = vpack.c.bf16 %v594_v45, %v590_v44  ;;  %v621_v26 = vld [vmem:[%s6309_s3 + $0x6d0] sm:$0xff]  ;;  %v628_v45 = vld [vmem:[%s6309_s3 + $0x708] sm:$0xff] }
  0xd1   : > { %1568 = vmatprep.mubr.f32.mxu1 %v398_v54  ;;  %v596_v54 = vld [vmem:[%s6309_s3 + $0x608] sm:$0xff]  ;;  %v625_v44 = vld [vmem:[%s6309_s3 + $0x6f0] sm:$0xff] }
  0xd2   : > { %3275 = vmatpush1.bf16.msra.mxu0 %v3274_v55  ;;  %v600_v55 = vld [vmem:[%s6309_s3 + $0x628] sm:$0xff]  ;;  %v3438_v50 = vpack.c.bf16 %v625_v44, %v621_v26  ;;  %v2687_v44 = vld [vmem:[%s6309_s3 + $0x1020] sm:$0xff] }
  0xd3   : > { %3403 = vmatpush1.bf16.msra.mxu1 %v3402_v56  ;;  %3277 = vmatprep.subr.bf16.mxu0 %v3276_v57  ;;  %v598_v56 = vld [vmem:[%s6309_s3 + $0x618] sm:$0xff]  ;;  %v3296_v59 = vpack.c.bf16 %v600_v55, %v596_v54  ;;  %v629_v54 = vld [vmem:[%s6309_s3 + $0x710] sm:$0xff] }
  0xd4   : > { %3405 = vmatprep.subr.bf16.mxu1 %v3404_v62  ;;  %v602_v57 = vld [vmem:[%s6309_s3 + $0x638] sm:$0xff]  ;;  %v595_v62 = vld [vmem:[%s6309_s3 + $0x600] sm:$0xff] }
  0xd5   : > { %v3424_v1 = vpack.c.bf16 %v602_v57, %v598_v56  ;;  %v3298_v8 = vpack.c.bf16 %v599_v63, %v595_v62  ;;  %v633_v56 = vld [vmem:[%s6309_s3 + $0x730] sm:$0xff]  ;;  %v636_v57 = vld [vmem:[%s6309_s3 + $0x748] sm:$0xff] }
  0xd6   : > { %3279 = vmatpush1.bf16.msra.mxu0 %v3278_v5  ;;  %v608_v5 = vld [vmem:[%s6309_s3 + $0x668] sm:$0xff]  ;;  %v3442_v63 = vpack.c.bf16 %v633_v56, %v629_v54 }
  0xd7   : > { %3407 = vmatpush1.bf16.msra.mxu1 %v3406_v6  ;;  %3281 = vmatprep.subr.bf16.mxu0 %v3280_v7  ;;  %v606_v6 = vld [vmem:[%s6309_s3 + $0x658] sm:$0xff]  ;;  %v3300_v10 = vpack.c.bf16 %v608_v5, %v604_v3  ;;  %v637_v3 = vld [vmem:[%s6309_s3 + $0x750] sm:$0xff]  ;;  %v1582_v54 = vld [vmem:[#allocation2 + $0x8] sm:$0xfc] }
  0xd8   : > { %3409 = vmatprep.subr.bf16.mxu1 %v3408_v11  ;;  %v610_v7 = vld [vmem:[%s6309_s3 + $0x678] sm:$0xff]  ;;  %v603_v11 = vld [vmem:[%s6309_s3 + $0x640] sm:$0xff] }
  0xd9   : > { %v3428_v16 = vpack.c.bf16 %v610_v7, %v606_v6  ;;  %v3302_v23 = vpack.c.bf16 %v607_v14, %v603_v11  ;;  %v641_v6 = vld [vmem:[%s6309_s3 + $0x770] sm:$0xff]  ;;  %v644_v7 = vld [vmem:[%s6309_s3 + $0x788] sm:$0xff] }
  0xda   : > { %3283 = vmatpush1.bf16.msra.mxu0 %v3282_v19  ;;  %v616_v19 = vld [vmem:[%s6309_s3 + $0x6a8] sm:$0xff]  ;;  %v3446_v14 = vpack.c.bf16 %v641_v6, %v637_v3  ;;  %v1858_v3 = vrot.slane %v1582_v54, 2  ;;  %v2727_v54 = vld [vmem:[%s6309_s3 + $0x1160] sm:$0xff] }
  0xdb   : > { %3411 = vmatpush1.bf16.msra.mxu1 %v3410_v20  ;;  %3285 = vmatprep.subr.bf16.mxu0 %v3284_v21  ;;  %v614_v20 = vld [vmem:[%s6309_s3 + $0x698] sm:$0xff]  ;;  %v3304_v29 = vpack.c.bf16 %v616_v19, %v612_v18  ;;  %v645_v18 = vld [vmem:[%s6309_s3 + $0x790] sm:$0xff] }
  0xdc   : > { %3413 = vmatprep.subr.bf16.mxu1 %v3412_v30  ;;  %v618_v21 = vld [vmem:[%s6309_s3 + $0x6b8] sm:$0xff]  ;;  %v611_v30 = vld [vmem:[%s6309_s3 + $0x680] sm:$0xff] }
  0xdd   : > { %v3432_v34 = vpack.c.bf16 %v618_v21, %v614_v20  ;;  %v3306_v37 = vpack.c.bf16 %v615_v31, %v611_v30  ;;  %v649_v20 = vld [vmem:[%s6309_s3 + $0x7b0] sm:$0xff]  ;;  %v652_v21 = vld [vmem:[%s6309_s3 + $0x7c8] sm:$0xff] }
  0xde   : > { %3287 = vmatpush1.bf16.msra.mxu0 %v3286_v24  ;;  %v624_v24 = vld [vmem:[%s6309_s3 + $0x6e8] sm:$0xff]  ;;  %v3450_v31 = vpack.c.bf16 %v649_v20, %v645_v18  ;;  %v5552_v18 = vld [vmem:[#allocation2 + $0x38] sm:$0xff] }
  0xdf   : > { %3415 = vmatpush1.bf16.msra.mxu1 %v3414_v41  ;;  %3289 = vmatprep.subr.bf16.mxu0 %v3288_v36  ;;  %v622_v41 = vld [vmem:[%s6309_s3 + $0x6d8] sm:$0xff]  ;;  %v3308_v40 = vpack.c.bf16 %v624_v24, %v620_v25  ;;  %v653_v25 = vld [vmem:[%s6309_s3 + $0x7d0] sm:$0xff] }
  0xe0   : > { %3417 = vmatprep.subr.bf16.mxu1 %v3416_v38  ;;  %v626_v36 = vld [vmem:[%s6309_s3 + $0x6f8] sm:$0xff]  ;;  %v619_v38 = vld [vmem:[%s6309_s3 + $0x6c0] sm:$0xff] }
  0xe1   : > { %v3436_v43 = vpack.c.bf16 %v626_v36, %v622_v41  ;;  %v3310_v49 = vpack.c.bf16 %v623_v39, %v619_v38  ;;  %v657_v41 = vld [vmem:[%s6309_s3 + $0x7f0] sm:$0xff]  ;;  %v2684_v36 = vld [vmem:[%s6309_s3 + $0x1008] sm:$0xff]  ;;  %v2714_v20 = vld [vmem:[%s6309_s3 + $0x10f8] sm:$0xff] }
  0xe2   : > { %3291 = vmatpush1.bf16.msra.mxu0 %v3290_v47  ;;  %v632_v47 = vld [vmem:[%s6309_s3 + $0x728] sm:$0xff]  ;;  %v3454_v39 = vpack.c.bf16 %v657_v41, %v653_v25  ;;  %v2713_v25 = vld [vmem:[%s6309_s3 + $0x10f0] sm:$0xff] }
  0xe3   : > { %3419 = vmatpush1.bf16.msra.mxu1 %v3418_v46  ;;  %3293 = vmatprep.subr.bf16.mxu0 %v3292_v48  ;;  %v630_v46 = vld [vmem:[%s6309_s3 + $0x718] sm:$0xff]  ;;  %v3312_v51 = vpack.c.bf16 %v632_v47, %v628_v45  ;;  %v2685_v45 = vld [vmem:[%s6309_s3 + $0x1010] sm:$0xff]  ;;  %v2720_v41 = vld [vmem:[%s6309_s3 + $0x1128] sm:$0xff] }
  0xe4   : > { %3421 = vmatprep.subr.bf16.mxu1 %v3420_v42  ;;  %v634_v48 = vld [vmem:[%s6309_s3 + $0x738] sm:$0xff]  ;;  %v627_v42 = vld [vmem:[%s6309_s3 + $0x700] sm:$0xff] }
  0xe5   : > { %v3440_v55 = vpack.c.bf16 %v634_v48, %v630_v46  ;;  %v3314_v62 = vpack.c.bf16 %v631_v52, %v627_v42  ;;  %v2689_v46 = vld [vmem:[%s6309_s3 + $0x1030] sm:$0xff]  ;;  %v2692_v48 = vld [vmem:[%s6309_s3 + $0x1048] sm:$0xff] }
  0xe6   : > { %3295 = vmatpush1.bf16.msra.mxu0 %v3294_v32  ;;  %v640_v32 = vld [vmem:[%s6309_s3 + $0x768] sm:$0xff]  ;;  %v397_v42 = vld [vmem:[#allocation2 + $0x10] sm:$0xff] }
  0xe7   : > { %3423 = vmatpush1.bf16.msra.mxu1 %v3422_v58  ;;  %3297 = vmatprep.subr.bf16.mxu0 %v3296_v59  ;;  %v638_v58 = vld [vmem:[%s6309_s3 + $0x758] sm:$0xff]  ;;  %v3316_v0 = vpack.c.bf16 %v640_v32, %v636_v57  ;;  %v2691_v57 = vld [vmem:[%s6309_s3 + $0x1040] sm:$0xff] }
  0xe8   : > { %3425 = vmatprep.subr.bf16.mxu1 %v3424_v1  ;;  %v642_v59 = vld [vmem:[%s6309_s3 + $0x778] sm:$0xff]  ;;  %v635_v1 = vld [vmem:[%s6309_s3 + $0x740] sm:$0xff] }
  0xe9   : > { %v3444_v5 = vpack.c.bf16 %v642_v59, %v638_v58  ;;  %v3318_v11 = vpack.c.bf16 %v639_v2, %v635_v1  ;;  %v2695_v32 = vld [vmem:[%s6309_s3 + $0x1060] sm:$0xff]  ;;  %v2693_v58 = vld [vmem:[%s6309_s3 + $0x1050] sm:$0xff]  ;;  %v2702_v1 = vld [vmem:[%s6309_s3 + $0x1098] sm:$0xff] }
  0xea   : > { %3299 = vmatpush1.bf16.msra.mxu0 %v3298_v8  ;;  %v648_v8 = vld [vmem:[%s6309_s3 + $0x7a8] sm:$0xff]  ;;  %v2706_v2 = vld [vmem:[%s6309_s3 + $0x10b8] sm:$0xff]  ;;  %v3462_v6 = vpack.c.bf16 %v2695_v32, %v2691_v57  ;;  %v2729_v57 = vld [vmem:[%s6309_s3 + $0x1170] sm:$0xff] }
  0xeb   : > { %3427 = vmatpush1.bf16.msra.mxu1 %v3426_v9  ;;  %3301 = vmatprep.subr.bf16.mxu0 %v3300_v10  ;;  %v646_v9 = vld [vmem:[%s6309_s3 + $0x798] sm:$0xff]  ;;  %v3320_v15 = vpack.c.bf16 %v648_v8, %v644_v7  ;;  %v2732_v32 = vld [vmem:[%s6309_s3 + $0x1188] sm:$0xff] }
  0xec   : > { %3429 = vmatprep.subr.bf16.mxu1 %v3428_v16  ;;  %v650_v10 = vld [vmem:[%s6309_s3 + $0x7b8] sm:$0xff]  ;;  %v643_v16 = vld [vmem:[%s6309_s3 + $0x780] sm:$0xff] }
  0xed   : > { %v3448_v19 = vpack.c.bf16 %v650_v10, %v646_v9  ;;  %v3322_v30 = vpack.c.bf16 %v647_v17, %v643_v16  ;;  %v2699_v9 = vld [vmem:[%s6309_s3 + $0x1080] sm:$0xff]  ;;  %v2708_v16 = vld [vmem:[%s6309_s3 + $0x10c8] sm:$0xff] }
  0xee   : > { %3303 = vmatpush1.bf16.msra.mxu0 %v3302_v23  ;;  %v656_v23 = vld [vmem:[%s6309_s3 + $0x7e8] sm:$0xff]  ;;  %v2703_v10 = vld [vmem:[%s6309_s3 + $0x10a0] sm:$0xff] }
  0xef   : > { %3431 = vmatpush1.bf16.msra.mxu1 %v3430_v28  ;;  %3305 = vmatprep.subr.bf16.mxu0 %v3304_v29  ;;  %v654_v28 = vld [vmem:[%s6309_s3 + $0x7d8] sm:$0xff]  ;;  %v3324_v33 = vpack.c.bf16 %v656_v23, %v652_v21  ;;  %v2712_v17 = vld [vmem:[%s6309_s3 + $0x10e8] sm:$0xff]  ;;  %v5562_v21 = vld [vmem:[#allocation2 + $0x30] sm:$0xff] }
  0xf0   : > { %3433 = vmatprep.subr.bf16.mxu1 %v3432_v34  ;;  %v658_v29 = vld [vmem:[%s6309_s3 + $0x7f8] sm:$0xff]  ;;  %v651_v34 = vld [vmem:[%s6309_s3 + $0x7c0] sm:$0xff] }
  0xf1   : > { %v3452_v24 = vpack.c.bf16 %v658_v29, %v654_v28  ;;  %v3326_v38 = vpack.c.bf16 %v655_v35, %v651_v34  ;;  %v3466_v28 = vpack.c.bf16 %v2703_v10, %v2699_v9  ;;  %v2709_v34 = vld [vmem:[%s6309_s3 + $0x10d0] sm:$0xff]  ;;  %v2740_v9 = vld [vmem:[%s6309_s3 + $0x11c8] sm:$0xff] }
  0xf2   : > { %3307 = vmatpush1.bf16.msra.mxu0 %v3306_v37  ;;  %v2688_v37 = vld [vmem:[%s6309_s3 + $0x1028] sm:$0xff] }
  0xf3   : > { %3435 = vmatpush1.bf16.msra.mxu1 %v3434_v22  ;;  %3309 = vmatprep.subr.bf16.mxu0 %v3308_v40  ;;  %v2686_v22 = vld [vmem:[%s6309_s3 + $0x1018] sm:$0xff]  ;;  %v3456_v26 = vpack.c.bf16 %v2688_v37, %v2684_v36  ;;  %v2744_v10 = vld [vmem:[%s6309_s3 + $0x11e8] sm:$0xff] }
  0xf4   : > { %3437 = vmatprep.subr.bf16.mxu1 %v3436_v43  ;;  %v2690_v40 = vld [vmem:[%s6309_s3 + $0x1038] sm:$0xff]  ;;  %v2683_v43 = vld [vmem:[%s6309_s3 + $0x1000] sm:$0xff] }
  0xf5   : > { %v3584_v47 = vpack.c.bf16 %v2690_v40, %v2686_v22  ;;  %v3458_v52 = vpack.c.bf16 %v2687_v44, %v2683_v43  ;;  %v2718_v36 = vld [vmem:[%s6309_s3 + $0x1118] sm:$0xff]  ;;  %v3598_v40 = vpack.c.bf16 %v2713_v25, %v2709_v34  ;;  %v2717_v43 = vld [vmem:[%s6309_s3 + $0x1110] sm:$0xff] }
  0xf6   : > { %3311 = vmatpush1.bf16.msra.mxu0 %v3310_v49  ;;  %v2696_v49 = vld [vmem:[%s6309_s3 + $0x1068] sm:$0xff]  ;;  %v2722_v37 = vld [vmem:[%s6309_s3 + $0x1138] sm:$0xff] }
  0xf7   : > { %3439 = vmatpush1.bf16.msra.mxu1 %v3438_v50  ;;  %3313 = vmatprep.subr.bf16.mxu0 %v3312_v51  ;;  %v2694_v50 = vld [vmem:[%s6309_s3 + $0x1058] sm:$0xff]  ;;  %v3460_v56 = vpack.c.bf16 %v2696_v49, %v2692_v48  ;;  %v3600_v44 = vpack.c.bf16 %v2722_v37, %v2718_v36  ;;  %v2751_v36 = vld [vmem:[%s6309_s3 + $0x1220] sm:$0xff]  ;;  %v2749_v37 = vld [vmem:[%s6309_s3 + $0x1210] sm:$0xff] }
  0xf8   : > { %3441 = vmatprep.subr.bf16.mxu1 %v3440_v55  ;;  %v2698_v51 = vld [vmem:[%s6309_s3 + $0x1078] sm:$0xff]  ;;  %v3586_v55 = vpack.c.bf16 %v2689_v46, %v2685_v45  ;;  %v2721_v45 = vld [vmem:[%s6309_s3 + $0x1130] sm:$0xff]  ;;  %v2728_v46 = vld [vmem:[%s6309_s3 + $0x1168] sm:$0xff] }
  0xf9   : > { %v3588_v59 = vpack.c.bf16 %v2698_v51, %v2694_v50  ;;  %v2726_v48 = vld [vmem:[%s6309_s3 + $0x1158] sm:$0xff]  ;;  %v3602_v51 = vpack.c.bf16 %v2721_v45, %v2717_v43 }
  0xfa   : > { %3315 = vmatpush1.bf16.msra.mxu0 %v3314_v62  ;;  %v2697_v62 = vld [vmem:[%s6309_s3 + $0x1070] sm:$0xff]  ;;  %v2730_v49 = vld [vmem:[%s6309_s3 + $0x1178] sm:$0xff] }
  0xfb   : > { %3443 = vmatpush1.bf16.msra.mxu1 %v3442_v63  ;;  %3317 = vmatprep.subr.bf16.mxu0 %v3316_v0  ;;  %v2700_v63 = vld [vmem:[%s6309_s3 + $0x1088] sm:$0xff]  ;;  %v3590_v7 = vpack.c.bf16 %v2697_v62, %v2693_v58  ;;  %v2738_v62 = vld [vmem:[%s6309_s3 + $0x11b8] sm:$0xff] }
  0xfc   : > { %3445 = vmatprep.subr.bf16.mxu1 %v3444_v5  ;;  %v2704_v0 = vld [vmem:[%s6309_s3 + $0x10a8] sm:$0xff]  ;;  %v1859_v5 = vrot.slane %v5159_v27, 2  ;;  %v2754_v34 = vld [vmem:[%s6309_s3 + $0x1238] sm:$0xff]  ;;  %v2831_v27 = vld [vmem:[%s6309_s3 + $0x14a0] sm:$0xff] }
  0xfd   : > { %v3464_v8 = vpack.c.bf16 %v2704_v0, %v2700_v63  ;;  %v2736_v58 = vld [vmem:[%s6309_s3 + $0x11a8] sm:$0xff]  ;;  %v2762_v43 = vld [vmem:[%s6309_s3 + $0x1278] sm:$0xff] }
  0xfe   : > { %3319 = vmatpush1.bf16.msra.mxu0 %v3318_v11  ;;  %v2701_v11 = vld [vmem:[%s6309_s3 + $0x1090] sm:$0xff]  ;;  %v1860_v23 = vsel %vm1854_vm3, %v1858_v3, %v1859_v5  ;;  %v2735_v3 = vld [vmem:[%s6309_s3 + $0x11a0] sm:$0xff] }
  0xff   : > { %3447 = vmatpush1.bf16.msra.mxu1 %v3446_v14  ;;  %3321 = vmatprep.subr.bf16.mxu0 %v3320_v15  ;;  %v3592_v14 = vpack.c.bf16 %v2706_v2, %v2702_v1  ;;  %v2705_v15 = vld [vmem:[%s6309_s3 + $0x10b0] sm:$0xff]  ;;  %v3480_v1 = vpack.c.bf16 %v2736_v58, %v2732_v32  ;;  %v2731_v2 = vld [vmem:[%s6309_s3 + $0x1180] sm:$0xff] }
 0x100   : > { %3449 = vmatprep.subr.bf16.mxu1 %v3448_v19  ;;  %v2710_v19 = vld [vmem:[%s6309_s3 + $0x10d8] sm:$0xff]  ;;  %v3594_v29 = vpack.c.bf16 %v2705_v15, %v2701_v11  ;;  %v3482_v15 = vpack.c.bf16 %v2735_v3, %v2731_v2  ;;  %v2763_v58 = vld [vmem:[%s6309_s3 + $0x1280] sm:$0xff]  ;;  %v2776_v2 = vld [vmem:[%s6309_s3 + $0x12e8] sm:$0xff] }
 0x101   : > { %v3596_v35 = vpack.c.bf16 %v2714_v20, %v2710_v19  ;;  %v2742_v11 = vld [vmem:[%s6309_s3 + $0x11d8] sm:$0xff]  ;;  %v2739_v19 = vld [vmem:[%s6309_s3 + $0x11c0] sm:$0xff] }
 0x102   : > { %3323 = vmatpush1.bf16.msra.mxu0 %v3322_v30  ;;  %v3468_v30 = vpack.c.bf16 %v2712_v17, %v2708_v16  ;;  %v3484_v17 = vpack.c.bf16 %v2744_v10, %v2740_v9  ;;  %v2743_v20 = vld [vmem:[%s6309_s3 + $0x11e0] sm:$0xff]  ;;  %v2774_v3 = vld [vmem:[%s6309_s3 + $0x12d8] sm:$0xff] }
 0x103   : > { %3451 = vmatpush1.bf16.msra.mxu1 %v3450_v31  ;;  %3325 = vmatprep.subr.bf16.mxu0 %v3324_v33  ;;  %v2707_v31 = vld [vmem:[%s6309_s3 + $0x10c0] sm:$0xff] }
 0x104   : > { %3453 = vmatprep.subr.bf16.mxu1 %v3452_v24  ;;  %v2711_v33 = vld [vmem:[%s6309_s3 + $0x10e0] sm:$0xff]  ;;  %v2716_v24 = vld [vmem:[%s6309_s3 + $0x1108] sm:$0xff] }
 0x105   : > { %v3470_v22 = vpack.c.bf16 %v2711_v33, %v2707_v31  ;;  %v2752_v31 = vld [vmem:[%s6309_s3 + $0x1228] sm:$0xff]  ;;  %v2750_v33 = vld [vmem:[%s6309_s3 + $0x1218] sm:$0xff]  ;;  %v2771_v10 = vld [vmem:[%s6309_s3 + $0x12c0] sm:$0xff] }
 0x106   : > { %3327 = vmatpush1.bf16.msra.mxu0 %v3326_v38  ;;  %v3472_v38 = vpack.c.bf16 %v2720_v41, %v2716_v24  ;;  %v2747_v41 = vld [vmem:[%s6309_s3 + $0x1200] sm:$0xff] }
 0x107   : > { %3455 = vmatpush1.bf16.msra.mxu1 %v3454_v39  ;;  %3457 = vmatprep.subr.bf16.mxu0 %v3456_v26  ;;  %v2715_v39 = vld [vmem:[%s6309_s3 + $0x1100] sm:$0xff] }
 0x108   : > { %3585 = vmatprep.subr.bf16.mxu1 %v3584_v47  ;;  %v2719_v26 = vld [vmem:[%s6309_s3 + $0x1120] sm:$0xff]  ;;  %v2724_v47 = vld [vmem:[%s6309_s3 + $0x1148] sm:$0xff] }
 0x109   : > { %1415 = vmatmul.mubr.f32.vlgmr.msra.gmra.mrb[0].mxu0 %v397_v42  ;;  %v3474_v50 = vpack.c.bf16 %v2719_v26, %v2715_v39  ;;  %v2760_v39 = vld [vmem:[%s6309_s3 + $0x1268] sm:$0xff]  ;;  %v2758_v26 = vld [vmem:[%s6309_s3 + $0x1258] sm:$0xff] }
 0x10a   : > { %1569 = vmatmul.mubr.f32.vlgmr.msra.gmra.mrb[0].mxu1 %v397_v42  ;;  %3459 = vmatpush1.bf16.msra.mxu0 %v3458_v52  ;;  %v3476_v42 = vpack.c.bf16 %v2728_v46, %v2724_v47  ;;  %v2723_v52 = vld [vmem:[%s6309_s3 + $0x1140] sm:$0xff] }
 0x10b   : > { %3587 = vmatpush1.bf16.msra.mxu1 %v3586_v55  ;;  %3461 = vmatprep.subr.bf16.mxu0 %v3460_v56  ;;  %v2725_v55 = vld [vmem:[%s6309_s3 + $0x1150] sm:$0xff]  ;;  %v3604_v56 = vpack.c.bf16 %v2730_v49, %v2726_v48  ;;  %v3478_v63 = vpack.c.bf16 %v2727_v54, %v2723_v52  ;;  %v2755_v46 = vld [vmem:[%s6309_s3 + $0x1240] sm:$0xff]  ;;  %v2768_v52 = vld [vmem:[%s6309_s3 + $0x12a8] sm:$0xff] }
 0x10c   : > { %3589 = vmatprep.subr.bf16.mxu1 %v3588_v59  ;;  %1420 = vmatprep.mubr.f32.mxu0 %v5552_v18  ;;  %v2734_v59 = vld [vmem:[%s6309_s3 + $0x1198] sm:$0xff]  ;;  %v3606_v0 = vpack.c.bf16 %v2729_v57, %v2725_v55  ;;  %v2759_v48 = vld [vmem:[%s6309_s3 + $0x1260] sm:$0xff]  ;;  %v2757_v49 = vld [vmem:[%s6309_s3 + $0x1250] sm:$0xff] }
 0x10d   : > { %1574 = vmatprep.mubr.f32.mxu1 %v5552_v18  ;;  %1421 = vmatmul.mubr.f32.gmra.mrb[2].mxu0 %v5562_v21  ;;  %v2766_v54 = vld [vmem:[%s6309_s3 + $0x1298] sm:$0xff] }
 0x10e   : > { %3463 = vmatpush1.bf16.msra.mxu0 %v3462_v6  ;;  %1575 = vmatmul.mubr.f32.gmra.mrb[2].mxu1 %v5562_v21  ;;  %v2733_v6 = vld [vmem:[%s6309_s3 + $0x1190] sm:$0xff]  ;;  %v2770_v55 = vld [vmem:[%s6309_s3 + $0x12b8] sm:$0xff] }
 0x10f   : > { %3591 = vmatpush1.bf16.msra.mxu1 %v3590_v7  ;;  %3465 = vmatprep.subr.bf16.mxu0 %v3464_v8  ;;  %v3608_v7 = vpack.c.bf16 %v2738_v62, %v2734_v59  ;;  %v2737_v8 = vld [vmem:[%s6309_s3 + $0x11b0] sm:$0xff]  ;;  %v2767_v59 = vld [vmem:[%s6309_s3 + $0x12a0] sm:$0xff] }
 0x110   : > { %3593 = vmatprep.subr.bf16.mxu1 %v3592_v14  ;;  %1947 = vmatprep.mubr.f32.mxu0 %v1860_v23  ;;  %v2746_v14 = vld [vmem:[%s6309_s3 + $0x11f8] sm:$0xff]  ;;  %v3610_v16 = vpack.c.bf16 %v2737_v8, %v2733_v6  ;;  %v2765_v62 = vld [vmem:[%s6309_s3 + $0x1290] sm:$0xff] }
 0x111   : > { %2101 = vmatprep.mubr.f32.mxu1 %v1860_v23  ;;  %v2741_v23 = vld [vmem:[%s6309_s3 + $0x11d0] sm:$0xff]  ;;  %v2778_v6 = vld [vmem:[%s6309_s3 + $0x12f8] sm:$0xff] }
 0x112   : > { %3467 = vmatpush1.bf16.msra.mxu0 %v3466_v28  ;;  %v3612_v28 = vpack.c.bf16 %v2746_v14, %v2742_v11  ;;  %v2775_v11 = vld [vmem:[%s6309_s3 + $0x12e0] sm:$0xff]  ;;  %v2773_v14 = vld [vmem:[%s6309_s3 + $0x12d0] sm:$0xff] }
 0x113   : > { %3595 = vmatpush1.bf16.msra.mxu1 %v3594_v29  ;;  %3469 = vmatprep.subr.bf16.mxu0 %v3468_v30  ;;  %v2745_v29 = vld [vmem:[%s6309_s3 + $0x11f0] sm:$0xff]  ;;  %v2748_v30 = vld [vmem:[%s6309_s3 + $0x1208] sm:$0xff] }
 0x114   : > { %3597 = vmatprep.subr.bf16.mxu1 %v3596_v35  ;;  %v3486_v35 = vpack.c.bf16 %v2743_v20, %v2739_v19  ;;  %v3614_v25 = vpack.c.bf16 %v2745_v29, %v2741_v23  ;;  %v3488_v24 = vpack.c.bf16 %v2752_v31, %v2748_v30  ;;  %v2784_v19 = vld [vmem:[%s6309_s3 + $0x1328] sm:$0xff]  ;;  %v2782_v20 = vld [vmem:[%s6309_s3 + $0x1318] sm:$0xff]  ;;  %v2779_v31 = vld [vmem:[%s6309_s3 + $0x1300] sm:$0xff] }
 0x115   : > { %v2786_v23 = vld [vmem:[%s6309_s3 + $0x1338] sm:$0xff] }
 0x116   : > { %3471 = vmatpush1.bf16.msra.mxu0 %v3470_v22  ;;  %v3616_v22 = vpack.c.bf16 %v2754_v34, %v2750_v33  ;;  %v2783_v33 = vld [vmem:[%s6309_s3 + $0x1320] sm:$0xff]  ;;  %v2781_v34 = vld [vmem:[%s6309_s3 + $0x1310] sm:$0xff] }
 0x117   : > { %3599 = vmatpush1.bf16.msra.mxu1 %v3598_v40  ;;  %3473 = vmatprep.subr.bf16.mxu0 %v3472_v38  ;;  %v2753_v40 = vld [vmem:[%s6309_s3 + $0x1230] sm:$0xff]  ;;  %v2756_v38 = vld [vmem:[%s6309_s3 + $0x1248] sm:$0xff] }
 0x118   : > { %3601 = vmatprep.subr.bf16.mxu1 %v3600_v44  ;;  %v3490_v44 = vpack.c.bf16 %v2751_v36, %v2747_v41  ;;  %v3618_v45 = vpack.c.bf16 %v2753_v40, %v2749_v37  ;;  %v3492_v47 = vpack.c.bf16 %v2760_v39, %v2756_v38  ;;  %v2792_v41 = vld [vmem:[%s6309_s3 + $0x1368] sm:$0xff]  ;;  %v2790_v36 = vld [vmem:[%s6309_s3 + $0x1358] sm:$0xff]  ;;  %v2787_v39 = vld [vmem:[%s6309_s3 + $0x1340] sm:$0xff] }
 0x119   : > { %v2794_v37 = vld [vmem:[%s6309_s3 + $0x1378] sm:$0xff] }
 0x11a   : > { %3475 = vmatpush1.bf16.msra.mxu0 %v3474_v50  ;;  %v3620_v50 = vpack.c.bf16 %v2762_v43, %v2758_v26  ;;  %v2791_v26 = vld [vmem:[%s6309_s3 + $0x1360] sm:$0xff]  ;;  %v2789_v43 = vld [vmem:[%s6309_s3 + $0x1350] sm:$0xff] }
 0x11b   : > { %3603 = vmatpush1.bf16.msra.mxu1 %v3602_v51  ;;  %3477 = vmatprep.subr.bf16.mxu0 %v3476_v42  ;;  %v2761_v51 = vld [vmem:[%s6309_s3 + $0x1270] sm:$0xff]  ;;  %v2764_v42 = vld [vmem:[%s6309_s3 + $0x1288] sm:$0xff] }
 0x11c   : > { %3605 = vmatprep.subr.bf16.mxu1 %v3604_v56  ;;  %v3494_v56 = vpack.c.bf16 %v2759_v48, %v2755_v46  ;;  %v3622_v57 = vpack.c.bf16 %v2761_v51, %v2757_v49  ;;  %v3496_v32 = vpack.c.bf16 %v2768_v52, %v2764_v42  ;;  %v2800_v46 = vld [vmem:[%s6309_s3 + $0x13a8] sm:$0xff]  ;;  %v2798_v48 = vld [vmem:[%s6309_s3 + $0x1398] sm:$0xff]  ;;  %v2795_v52 = vld [vmem:[%s6309_s3 + $0x1380] sm:$0xff] }
 0x11d   : > { %v2802_v49 = vld [vmem:[%s6309_s3 + $0x13b8] sm:$0xff] }
 0x11e   : > { %3479 = vmatpush1.bf16.msra.mxu0 %v3478_v63  ;;  %v3624_v63 = vpack.c.bf16 %v2770_v55, %v2766_v54  ;;  %v2799_v54 = vld [vmem:[%s6309_s3 + $0x13a0] sm:$0xff]  ;;  %v2797_v55 = vld [vmem:[%s6309_s3 + $0x1390] sm:$0xff] }
 0x11f   : > { %3607 = vmatpush1.bf16.msra.mxu1 %v3606_v0  ;;  %3481 = vmatprep.subr.bf16.mxu0 %v3480_v1  ;;  %v2769_v0 = vld [vmem:[%s6309_s3 + $0x12b0] sm:$0xff]  ;;  %v2772_v1 = vld [vmem:[%s6309_s3 + $0x12c8] sm:$0xff] }
 0x120   : > { %3609 = vmatprep.subr.bf16.mxu1 %v3608_v7  ;;  %v3498_v7 = vpack.c.bf16 %v2767_v59, %v2763_v58  ;;  %v3626_v8 = vpack.c.bf16 %v2769_v0, %v2765_v62  ;;  %v3500_v9 = vpack.c.bf16 %v2776_v2, %v2772_v1  ;;  %v2808_v58 = vld [vmem:[%s6309_s3 + $0x13e8] sm:$0xff]  ;;  %v2806_v59 = vld [vmem:[%s6309_s3 + $0x13d8] sm:$0xff]  ;;  %v2803_v0 = vld [vmem:[%s6309_s3 + $0x13c0] sm:$0xff] }
 0x121   : > { %v2810_v62 = vld [vmem:[%s6309_s3 + $0x13f8] sm:$0xff] }
 0x122   : > { %3483 = vmatpush1.bf16.msra.mxu0 %v3482_v15  ;;  %v3628_v15 = vpack.c.bf16 %v2778_v6, %v2774_v3  ;;  %v2807_v3 = vld [vmem:[%s6309_s3 + $0x13e0] sm:$0xff]  ;;  %v2805_v6 = vld [vmem:[%s6309_s3 + $0x13d0] sm:$0xff] }
 0x123   : > { %3611 = vmatpush1.bf16.msra.mxu1 %v3610_v16  ;;  %3485 = vmatprep.subr.bf16.mxu0 %v3484_v17  ;;  %v2777_v16 = vld [vmem:[%s6309_s3 + $0x12f0] sm:$0xff]  ;;  %v2780_v17 = vld [vmem:[%s6309_s3 + $0x1308] sm:$0xff] }
 0x124   : > { %3613 = vmatprep.subr.bf16.mxu1 %v3612_v28  ;;  %v3502_v28 = vpack.c.bf16 %v2775_v11, %v2771_v10  ;;  %v3630_v29 = vpack.c.bf16 %v2777_v16, %v2773_v14  ;;  %v3504_v30 = vpack.c.bf16 %v2784_v19, %v2780_v17  ;;  %v2812_v10 = vld [vmem:[%s6309_s3 + $0x1408] sm:$0xff]  ;;  %v2814_v14 = vld [vmem:[%s6309_s3 + $0x1418] sm:$0xff]  ;;  %v3518_v16 = vpack.c.bf16 %v2807_v3, %v2803_v0 }
 0x125   : > { %v2816_v11 = vld [vmem:[%s6309_s3 + $0x1428] sm:$0xff]  ;;  %v1856_v19 = vrot.slane %v5169_v53, 2 }
 0x126   : > { %3487 = vmatpush1.bf16.msra.mxu0 %v3486_v35  ;;  %v3632_v35 = vpack.c.bf16 %v2786_v23, %v2782_v20  ;;  %v2811_v20 = vld [vmem:[%s6309_s3 + $0x1400] sm:$0xff]  ;;  %v1586_v23 = vld [vmem:[#allocation2 + $0x48] sm:$0x3] }
 0x127   : > { %3615 = vmatpush1.bf16.msra.mxu1 %v3614_v25  ;;  %3489 = vmatprep.subr.bf16.mxu0 %v3488_v24  ;;  %v2785_v25 = vld [vmem:[%s6309_s3 + $0x1330] sm:$0xff]  ;;  %v2788_v24 = vld [vmem:[%s6309_s3 + $0x1348] sm:$0xff] }
 0x128   : > { %3617 = vmatprep.subr.bf16.mxu1 %v3616_v22  ;;  %v3506_v22 = vpack.c.bf16 %v2783_v33, %v2779_v31  ;;  %v3634_v40 = vpack.c.bf16 %v2785_v25, %v2781_v34  ;;  %v3508_v38 = vpack.c.bf16 %v2792_v41, %v2788_v24  ;;  %v2813_v31 = vld [vmem:[%s6309_s3 + $0x1410] sm:$0xff]  ;;  %v1585_v33 = vld [vmem:[#allocation2 + $0x40] sm:$0x3]  ;;  %v2824_v25 = vld [vmem:[%s6309_s3 + $0x1468] sm:$0xff] }
 0x129   : > { %v2817_v34 = vld [vmem:[%s6309_s3 + $0x1430] sm:$0xff]  ;;  %v2822_v24 = vld [vmem:[%s6309_s3 + $0x1458] sm:$0xff]  ;;  %v2840_v0 = vld [vmem:[%s6309_s3 + $0x14e8] sm:$0xff] }
 0x12a   : > { %3491 = vmatpush1.bf16.msra.mxu0 %v3490_v44  ;;  %v3636_v44 = vpack.c.bf16 %v2794_v37, %v2790_v36  ;;  %v2826_v41 = vld [vmem:[%s6309_s3 + $0x1478] sm:$0xff]  ;;  %v1869_v36 = vrot.slane %v1586_v23, 2 }
 0x12b   : > { %3619 = vmatpush1.bf16.msra.mxu1 %v3618_v45  ;;  %3493 = vmatprep.subr.bf16.mxu0 %v3492_v47  ;;  %v2793_v45 = vld [vmem:[%s6309_s3 + $0x1370] sm:$0xff]  ;;  %v2796_v47 = vld [vmem:[%s6309_s3 + $0x1388] sm:$0xff] }
 0x12c   : > { %3621 = vmatprep.subr.bf16.mxu1 %v3620_v50  ;;  %v3510_v50 = vpack.c.bf16 %v2791_v26, %v2787_v39  ;;  %v3638_v51 = vpack.c.bf16 %v2793_v45, %v2789_v43  ;;  %v3512_v42 = vpack.c.bf16 %v2800_v46, %v2796_v47  ;;  %v3650_v39 = vpack.c.bf16 %v2817_v34, %v2813_v31  ;;  %v2819_v43 = vld [vmem:[%s6309_s3 + $0x1440] sm:$0xff]  ;;  %v2821_v45 = vld [vmem:[%s6309_s3 + $0x1450] sm:$0xff] }
 0x12d   : > { %v3652_v47 = vpack.c.bf16 %v2826_v41, %v2822_v24  ;;  %v2825_v46 = vld [vmem:[%s6309_s3 + $0x1470] sm:$0xff]  ;;  %v2847_v31 = vld [vmem:[%s6309_s3 + $0x1520] sm:$0xff]  ;;  %v2854_v24 = vld [vmem:[%s6309_s3 + $0x1558] sm:$0xff] }
 0x12e   : > { %3495 = vmatpush1.bf16.msra.mxu0 %v3494_v56  ;;  %v3640_v56 = vpack.c.bf16 %v2802_v49, %v2798_v48  ;;  %v2828_v48 = vld [vmem:[%s6309_s3 + $0x1488] sm:$0xff]  ;;  %v2849_v34 = vld [vmem:[%s6309_s3 + $0x1530] sm:$0xff]  ;;  %v2858_v41 = vld [vmem:[%s6309_s3 + $0x1578] sm:$0xff] }
 0x12f   : > { %3623 = vmatpush1.bf16.msra.mxu1 %v3622_v57  ;;  %3497 = vmatprep.subr.bf16.mxu0 %v3496_v32  ;;  %v2801_v57 = vld [vmem:[%s6309_s3 + $0x13b0] sm:$0xff]  ;;  %v2804_v32 = vld [vmem:[%s6309_s3 + $0x13c8] sm:$0xff] }
 0x130   : > { %3625 = vmatprep.subr.bf16.mxu1 %v3624_v63  ;;  %v3514_v63 = vpack.c.bf16 %v2799_v54, %v2795_v52  ;;  %v3642_v1 = vpack.c.bf16 %v2801_v57, %v2797_v55  ;;  %v3516_v2 = vpack.c.bf16 %v2808_v58, %v2804_v32  ;;  %v2832_v49 = vld [vmem:[%s6309_s3 + $0x14a8] sm:$0xff]  ;;  %v1865_v54 = vrot.slane %v5552_v18, 2  ;;  %v2827_v58 = vld [vmem:[%s6309_s3 + $0x1480] sm:$0xff] }
 0x131   : > { %v3654_v57 = vpack.c.bf16 %v2825_v46, %v2821_v45  ;;  %v3528_v32 = vpack.c.bf16 %v2832_v49, %v2828_v48  ;;  %v2864_v45 = vld [vmem:[%s6309_s3 + $0x15a8] sm:$0xff]  ;;  %v2866_v46 = vld [vmem:[%s6309_s3 + $0x15b8] sm:$0xff] }
 0x132   : > { %3499 = vmatpush1.bf16.msra.mxu0 %v3498_v7  ;;  %v1581_v7 = vld [vmem:[#allocation2] sm:$0xfc] }
 0x133   : > { %3627 = vmatpush1.bf16.msra.mxu1 %v3626_v8  ;;  %3501 = vmatprep.subr.bf16.mxu0 %v3500_v9  ;;  %v3644_v8 = vpack.c.bf16 %v2810_v62, %v2806_v59  ;;  %v2809_v9 = vld [vmem:[%s6309_s3 + $0x13f0] sm:$0xff]  ;;  %v1855_v17 = vrot.slane %v1581_v7, 2 }
 0x134   : > { %3629 = vmatprep.subr.bf16.mxu1 %v3628_v15  ;;  %v2818_v15 = vld [vmem:[%s6309_s3 + $0x1438] sm:$0xff]  ;;  %v2833_v62 = vld [vmem:[%s6309_s3 + $0x14b0] sm:$0xff] }
 0x135   : > { %v3648_v53 = vpack.c.bf16 %v2818_v15, %v2814_v14  ;;  %v1857_v37 = vsel %vm1854_vm3, %v1855_v17, %v1856_v19  ;;  %v2841_v15 = vld [vmem:[%s6309_s3 + $0x14f0] sm:$0xff]  ;;  %v2848_v17 = vld [vmem:[%s6309_s3 + $0x1528] sm:$0xff] }
 0x136   : > { %3503 = vmatpush1.bf16.msra.mxu0 %v3502_v28  ;;  %v3646_v28 = vpack.c.bf16 %v2809_v9, %v2805_v6  ;;  %v3530_v6 = vpack.c.bf16 %v2831_v27, %v2827_v58  ;;  %v2835_v9 = vld [vmem:[%s6309_s3 + $0x14c0] sm:$0xff]  ;;  %v2870_v58 = vld [vmem:[%s6309_s3 + $0x15d8] sm:$0xff] }
 0x137   : > { %3631 = vmatpush1.bf16.msra.mxu1 %v3630_v29  ;;  %3505 = vmatprep.subr.bf16.mxu0 %v3504_v30  ;;  %v3520_v29 = vpack.c.bf16 %v2816_v11, %v2812_v10  ;;  %v2815_v30 = vld [vmem:[%s6309_s3 + $0x1420] sm:$0xff]  ;;  %v2837_v11 = vld [vmem:[%s6309_s3 + $0x14d0] sm:$0xff]  ;;  %v2874_v27 = vld [vmem:[%s6309_s3 + $0x15f8] sm:$0xff] }
 0x138   : > { %3633 = vmatprep.subr.bf16.mxu1 %v3632_v35  ;;  %v2820_v35 = vld [vmem:[%s6309_s3 + $0x1448] sm:$0xff]  ;;  %v2839_v10 = vld [vmem:[%s6309_s3 + $0x14e0] sm:$0xff] }
 0x139   : > { %v3524_v26 = vpack.c.bf16 %v2824_v25, %v2820_v35  ;;  %v3534_v23 = vpack.c.bf16 %v2839_v10, %v2835_v9  ;;  %v2852_v35 = vld [vmem:[%s6309_s3 + $0x1548] sm:$0xff]  ;;  %v2882_v9 = vld [vmem:[%s6309_s3 + $0x1638] sm:$0xff] }
 0x13a   : > { %3507 = vmatpush1.bf16.msra.mxu0 %v3506_v22  ;;  %v3522_v22 = vpack.c.bf16 %v2815_v30, %v2811_v20  ;;  %v2850_v20 = vld [vmem:[%s6309_s3 + $0x1538] sm:$0xff]  ;;  %v2843_v30 = vld [vmem:[%s6309_s3 + $0x1500] sm:$0xff]  ;;  %v2856_v25 = vld [vmem:[%s6309_s3 + $0x1568] sm:$0xff] }
 0x13b   : > { %3635 = vmatpush1.bf16.msra.mxu1 %v3634_v40  ;;  %3509 = vmatprep.subr.bf16.mxu0 %v3508_v38  ;;  %v1867_v40 = vrot.slane %v1585_v33, 2  ;;  %v1584_v38 = vld [vmem:[#allocation2 + $0x18] sm:$0xfc]  ;;  %v2845_v33 = vld [vmem:[%s6309_s3 + $0x1510] sm:$0xff] }
 0x13c   : > { %3637 = vmatprep.subr.bf16.mxu1 %v3636_v44  ;;  %v2823_v44 = vld [vmem:[%s6309_s3 + $0x1460] sm:$0xff]  ;;  %v1864_v52 = vrot.slane %v1584_v38, 2 }
 0x13d   : > { %v3526_v55 = vpack.c.bf16 %v2823_v44, %v2819_v43  ;;  %v2855_v38 = vld [vmem:[%s6309_s3 + $0x1560] sm:$0xff]  ;;  %v2857_v43 = vld [vmem:[%s6309_s3 + $0x1570] sm:$0xff]  ;;  %v2860_v44 = vld [vmem:[%s6309_s3 + $0x1588] sm:$0xff] }
 0x13e   : > { %3511 = vmatpush1.bf16.msra.mxu0 %v3510_v50  ;;  %v2830_v50 = vld [vmem:[%s6309_s3 + $0x1498] sm:$0xff]  ;;  %v1866_v3 = vsel %vm1854_vm3, %v1864_v52, %v1865_v54  ;;  %v2861_v52 = vld [vmem:[%s6309_s3 + $0x1590] sm:$0xff] }
 0x13f   : > { %3639 = vmatpush1.bf16.msra.mxu1 %v3638_v51  ;;  %3513 = vmatprep.subr.bf16.mxu0 %v3512_v42  ;;  %v2834_v51 = vld [vmem:[%s6309_s3 + $0x14b8] sm:$0xff]  ;;  %v1870_v42 = vsel %vm1854_vm3, %v1859_v5, %v1869_v36  ;;  %v2829_v5 = vld [vmem:[%s6309_s3 + $0x1490] sm:$0xff]  ;;  %v3538_v36 = vpack.c.bf16 %v2847_v31, %v2843_v30 }
 0x140   : > { %3641 = vmatprep.subr.bf16.mxu1 %v3640_v56  ;;  %v1868_v56 = vsel %vm1854_vm3, %v1856_v19, %v1867_v40  ;;  %v3656_v59 = vpack.c.bf16 %v2834_v51, %v2830_v50  ;;  %v3658_v7 = vpack.c.bf16 %v2833_v62, %v2829_v5  ;;  %v2846_v19 = vld [vmem:[%s6309_s3 + $0x1518] sm:$0xff]  ;;  %v2851_v40 = vld [vmem:[%s6309_s3 + $0x1540] sm:$0xff]  ;;  %v3544_v50 = vpack.c.bf16 %v2864_v45, %v2860_v44  ;;  %v2893_v45 = vld [vmem:[%s6309_s3 + $0x1690] sm:$0xff] }
 0x141   : > { %v3542_v48 = vpack.c.bf16 %v2855_v38, %v2851_v40  ;;  %v2859_v51 = vld [vmem:[%s6309_s3 + $0x1580] sm:$0xff]  ;;  %v2890_v30 = vld [vmem:[%s6309_s3 + $0x1678] sm:$0xff] }
 0x142   : > { %3515 = vmatpush1.bf16.msra.mxu0 %v3514_v63  ;;  %v2836_v63 = vld [vmem:[%s6309_s3 + $0x14c8] sm:$0xff]  ;;  %v2898_v40 = vld [vmem:[%s6309_s3 + $0x16b8] sm:$0xff]  ;;  %v2895_v44 = vld [vmem:[%s6309_s3 + $0x16a0] sm:$0xff] }
 0x143   : > { %3643 = vmatpush1.bf16.msra.mxu1 %v3642_v1  ;;  %3517 = vmatprep.subr.bf16.mxu0 %v3516_v2  ;;  %v2838_v1 = vld [vmem:[%s6309_s3 + $0x14d8] sm:$0xff] }
 0x144   : > { %3645 = vmatprep.subr.bf16.mxu1 %v3644_v8  ;;  %v2842_v2 = vld [vmem:[%s6309_s3 + $0x14f8] sm:$0xff]  ;;  %v3532_v8 = vpack.c.bf16 %v2840_v0, %v2836_v63  ;;  %v2867_v63 = vld [vmem:[%s6309_s3 + $0x15c0] sm:$0xff] }
 0x145   : > { %v3660_v14 = vpack.c.bf16 %v2842_v2, %v2838_v1  ;;  %v2871_v0 = vld [vmem:[%s6309_s3 + $0x15e0] sm:$0xff]  ;;  %v2869_v1 = vld [vmem:[%s6309_s3 + $0x15d0] sm:$0xff]  ;;  %v3676_v2 = vpack.c.bf16 %v2874_v27, %v2870_v58 }
 0x146   : > { %3519 = vmatpush1.bf16.msra.mxu0 %v3518_v16  ;;  %v2844_v16 = vld [vmem:[%s6309_s3 + $0x1508] sm:$0xff]  ;;  %v3550_v10 = vpack.c.bf16 %v2871_v0, %v2867_v63  ;;  %v2905_v27 = vld [vmem:[%s6309_s3 + $0x16f0] sm:$0xff]  ;;  %v2914_v63 = vld [vmem:[%s6309_s3 + $0x1738] sm:$0xff] }
 0x147   : > { %3647 = vmatpush1.bf16.msra.mxu1 %v3646_v28  ;;  %3521 = vmatprep.subr.bf16.mxu0 %v3520_v29  ;;  %v3662_v28 = vpack.c.bf16 %v2841_v15, %v2837_v11  ;;  %v3536_v29 = vpack.c.bf16 %v2848_v17, %v2844_v16  ;;  %v2875_v15 = vld [vmem:[%s6309_s3 + $0x1600] sm:$0xff]  ;;  %v2877_v17 = vld [vmem:[%s6309_s3 + $0x1610] sm:$0xff] }
 0x148   : > { %3649 = vmatprep.subr.bf16.mxu1 %v3648_v53  ;;  %v3664_v53 = vpack.c.bf16 %v2850_v20, %v2846_v19  ;;  %v2879_v16 = vld [vmem:[%s6309_s3 + $0x1620] sm:$0xff]  ;;  %v2881_v20 = vld [vmem:[%s6309_s3 + $0x1630] sm:$0xff] }
 0x149   : > { %1948 = vmatmul.mubr.f32.vlgmr.msra.gmra.mrb[0].mxu0 %v1857_v37  ;;  %v3554_v31 = vpack.c.bf16 %v2879_v16, %v2875_v15  ;;  %v2922_v15 = vld [vmem:[%s6309_s3 + $0x1778] sm:$0xff] }
 0x14a   : > { %3523 = vmatpush1.bf16.msra.mxu0 %v3522_v22  ;;  %2102 = vmatmul.mubr.f32.vlgmr.msra.gmra.mrb[0].mxu1 %v1857_v37  ;;  %v3666_v37 = vpack.c.bf16 %v2849_v34, %v2845_v33  ;;  %v3540_v22 = vpack.c.bf16 %v2856_v25, %v2852_v35  ;;  %v3682_v33 = vpack.c.bf16 %v2881_v20, %v2877_v17  ;;  %v2883_v34 = vld [vmem:[%s6309_s3 + $0x1640] sm:$0xff]  ;;  %v2885_v25 = vld [vmem:[%s6309_s3 + $0x1650] sm:$0xff] }
 0x14b   : > { %3651 = vmatpush1.bf16.msra.mxu1 %v3650_v39  ;;  %3525 = vmatprep.subr.bf16.mxu0 %v3524_v26  ;;  %v2853_v39 = vld [vmem:[%s6309_s3 + $0x1550] sm:$0xff]  ;;  %v3668_v26 = vpack.c.bf16 %v2858_v41, %v2854_v24  ;;  %v2887_v35 = vld [vmem:[%s6309_s3 + $0x1660] sm:$0xff] }
 0x14c   : > { %3653 = vmatprep.subr.bf16.mxu1 %v3652_v47  ;;  %1953 = vmatprep.mubr.f32.mxu0 %v1870_v42  ;;  %v2862_v47 = vld [vmem:[%s6309_s3 + $0x1598] sm:$0xff]  ;;  %v3670_v49 = vpack.c.bf16 %v2857_v43, %v2853_v39  ;;  %v2889_v41 = vld [vmem:[%s6309_s3 + $0x1670] sm:$0xff]  ;;  %v3558_v38 = vpack.c.bf16 %v2887_v35, %v2883_v34  ;;  %v2891_v43 = vld [vmem:[%s6309_s3 + $0x1680] sm:$0xff] }
 0x14d   : > { %2107 = vmatprep.mubr.f32.mxu1 %v1870_v42  ;;  %1954 = vmatmul.mubr.f32.gmra.mrb[2].mxu0 %v1868_v56  ;;  %v2863_v42 = vld [vmem:[%s6309_s3 + $0x15a0] sm:$0xff]  ;;  %v3686_v39 = vpack.c.bf16 %v2889_v41, %v2885_v25  ;;  %v2930_v34 = vld [vmem:[%s6309_s3 + $0x17b8] sm:$0xff] }
 0x14e   : > { %3527 = vmatpush1.bf16.msra.mxu0 %v3526_v55  ;;  %2108 = vmatmul.mubr.f32.gmra.mrb[2].mxu1 %v1868_v56  ;;  %v3672_v55 = vpack.c.bf16 %v2866_v46, %v2862_v47  ;;  %v2865_v56 = vld [vmem:[%s6309_s3 + $0x15b0] sm:$0xff]  ;;  %v3546_v5 = vpack.c.bf16 %v2863_v42, %v2859_v51  ;;  %v2906_v51 = vld [vmem:[%s6309_s3 + $0x16f8] sm:$0xff]  ;;  %v3562_v42 = vpack.c.bf16 %v2895_v44, %v2891_v43  ;;  %v2915_v20 = vld [vmem:[%s6309_s3 + $0x1740] sm:$0xff] }
 0x14f   : > { %3655 = vmatpush1.bf16.msra.mxu1 %v3654_v57  ;;  %3529 = vmatprep.subr.bf16.mxu0 %v3528_v32  ;;  %v2868_v57 = vld [vmem:[%s6309_s3 + $0x15c8] sm:$0xff]  ;;  %v2897_v46 = vld [vmem:[%s6309_s3 + $0x16b0] sm:$0xff]  ;;  %v2923_v41 = vld [vmem:[%s6309_s3 + $0x1780] sm:$0xff] }
 0x150   : > { %3657 = vmatprep.subr.bf16.mxu1 %v3656_v59  ;;  %2024 = vmatprep.mubr.f32.mxu0 %v1866_v3  ;;  %v2872_v32 = vld [vmem:[%s6309_s3 + $0x15e8] sm:$0xff]  ;;  %v3674_v59 = vpack.c.bf16 %v2865_v56, %v2861_v52  ;;  %v3690_v52 = vpack.c.bf16 %v2897_v46, %v2893_v45  ;;  %v2899_v56 = vld [vmem:[%s6309_s3 + $0x16c0] sm:$0xff]  ;;  %v2938_v43 = vld [vmem:[%s6309_s3 + $0x17f8] sm:$0xff] }
 0x151   : > { %2178 = vmatprep.mubr.f32.mxu1 %v1866_v3  ;;  %v3548_v62 = vpack.c.bf16 %v2872_v32, %v2868_v57  ;;  %v2873_v3 = vld [vmem:[%s6309_s3 + $0x15f0] sm:$0xff]  ;;  %v2903_v57 = vld [vmem:[%s6309_s3 + $0x16e0] sm:$0xff] }
 0x152   : > { %3531 = vmatpush1.bf16.msra.mxu0 %v3530_v6  ;;  %v2876_v6 = vld [vmem:[%s6309_s3 + $0x1608] sm:$0xff]  ;;  %v3678_v11 = vpack.c.bf16 %v2873_v3, %v2869_v1  ;;  %v2901_v32 = vld [vmem:[%s6309_s3 + $0x16d0] sm:$0xff]  ;;  %v3566_v0 = vpack.c.bf16 %v2903_v57, %v2899_v56  ;;  %v2907_v3 = vld [vmem:[%s6309_s3 + $0x1700] sm:$0xff]  ;;  %v1862_v57 = vrot.slane %v5562_v21, 2 }
 0x153   : > { %3659 = vmatpush1.bf16.msra.mxu1 %v3658_v7  ;;  %3533 = vmatprep.subr.bf16.mxu0 %v3532_v8  ;;  %v2880_v7 = vld [vmem:[%s6309_s3 + $0x1628] sm:$0xff]  ;;  %v2878_v8 = vld [vmem:[%s6309_s3 + $0x1618] sm:$0xff]  ;;  %v3694_v1 = vpack.c.bf16 %v2905_v27, %v2901_v32  ;;  %v2931_v46 = vld [vmem:[%s6309_s3 + $0x17c0] sm:$0xff] }
 0x154   : > { %3661 = vmatprep.subr.bf16.mxu1 %v3660_v14  ;;  %v3552_v14 = vpack.c.bf16 %v2880_v7, %v2876_v6  ;;  %v3680_v19 = vpack.c.bf16 %v2882_v9, %v2878_v8  ;;  %v2911_v6 = vld [vmem:[%s6309_s3 + $0x1720] sm:$0xff]  ;;  %v2909_v7 = vld [vmem:[%s6309_s3 + $0x1710] sm:$0xff] }
 0x155   : > { %v2913_v9 = vld [vmem:[%s6309_s3 + $0x1730] sm:$0xff]  ;;  %v3570_v16 = vpack.c.bf16 %v2911_v6, %v2907_v3 }
 0x156   : > { %3535 = vmatpush1.bf16.msra.mxu0 %v3534_v23  ;;  %v2884_v23 = vld [vmem:[%s6309_s3 + $0x1648] sm:$0xff]  ;;  %v3698_v17 = vpack.c.bf16 %v2913_v9, %v2909_v7  ;;  %v1587_v27 = vld [vmem:[#allocation2 + $0x50] sm:$0x3] }
 0x157   : > { %3663 = vmatpush1.bf16.msra.mxu1 %v3662_v28  ;;  %3537 = vmatprep.subr.bf16.mxu0 %v3536_v29  ;;  %v2888_v28 = vld [vmem:[%s6309_s3 + $0x1668] sm:$0xff]  ;;  %v2886_v29 = vld [vmem:[%s6309_s3 + $0x1658] sm:$0xff] }
 0x158   : > { %3665 = vmatprep.subr.bf16.mxu1 %v3664_v53  ;;  %v3556_v53 = vpack.c.bf16 %v2888_v28, %v2884_v23  ;;  %v3684_v24 = vpack.c.bf16 %v2890_v30, %v2886_v29  ;;  %v2919_v23 = vld [vmem:[%s6309_s3 + $0x1760] sm:$0xff]  ;;  %v2917_v28 = vld [vmem:[%s6309_s3 + $0x1750] sm:$0xff] }
 0x159   : > { %v2921_v30 = vld [vmem:[%s6309_s3 + $0x1770] sm:$0xff]  ;;  %v3574_v35 = vpack.c.bf16 %v2919_v23, %v2915_v20 }
 0x15a   : > { %3539 = vmatpush1.bf16.msra.mxu0 %v3538_v36  ;;  %v2892_v36 = vld [vmem:[%s6309_s3 + $0x1688] sm:$0xff]  ;;  %v3702_v25 = vpack.c.bf16 %v2921_v30, %v2917_v28 }
 0x15b   : > { %3667 = vmatpush1.bf16.msra.mxu1 %v3666_v37  ;;  %3541 = vmatprep.subr.bf16.mxu0 %v3540_v22  ;;  %v2896_v37 = vld [vmem:[%s6309_s3 + $0x16a8] sm:$0xff]  ;;  %v2894_v22 = vld [vmem:[%s6309_s3 + $0x1698] sm:$0xff] }
 0x15c   : > { %3669 = vmatprep.subr.bf16.mxu1 %v3668_v26  ;;  %v3560_v26 = vpack.c.bf16 %v2896_v37, %v2892_v36  ;;  %v3688_v47 = vpack.c.bf16 %v2898_v40, %v2894_v22  ;;  %v2927_v36 = vld [vmem:[%s6309_s3 + $0x17a0] sm:$0xff]  ;;  %v2925_v37 = vld [vmem:[%s6309_s3 + $0x1790] sm:$0xff] }
 0x15d   : > { %v2929_v40 = vld [vmem:[%s6309_s3 + $0x17b0] sm:$0xff]  ;;  %v3578_v44 = vpack.c.bf16 %v2927_v36, %v2923_v41 }
 0x15e   : > { %3543 = vmatpush1.bf16.msra.mxu0 %v3542_v48  ;;  %v2900_v48 = vld [vmem:[%s6309_s3 + $0x16c8] sm:$0xff]  ;;  %v3706_v45 = vpack.c.bf16 %v2929_v40, %v2925_v37 }
 0x15f   : > { %3671 = vmatpush1.bf16.msra.mxu1 %v3670_v49  ;;  %3545 = vmatprep.subr.bf16.mxu0 %v3544_v50  ;;  %v2904_v49 = vld [vmem:[%s6309_s3 + $0x16e8] sm:$0xff]  ;;  %v2902_v50 = vld [vmem:[%s6309_s3 + $0x16d8] sm:$0xff] }
 0x160   : > { %3673 = vmatprep.subr.bf16.mxu1 %v3672_v55  ;;  %v3564_v55 = vpack.c.bf16 %v2904_v49, %v2900_v48  ;;  %v3692_v58 = vpack.c.bf16 %v2906_v51, %v2902_v50  ;;  %v2935_v48 = vld [vmem:[%s6309_s3 + $0x17e0] sm:$0xff]  ;;  %v1583_v49 = vld [vmem:[#allocation2 + $0x10] sm:$0xfc] }
 0x161   : > { %v2933_v51 = vld [vmem:[%s6309_s3 + $0x17d0] sm:$0xff]  ;;  %v1861_v56 = vrot.slane %v1583_v49, 2 }
 0x162   : > { %3547 = vmatpush1.bf16.msra.mxu0 %v3546_v5  ;;  %v2908_v5 = vld [vmem:[%s6309_s3 + $0x1708] sm:$0xff] }
 0x163   : > { %3675 = vmatpush1.bf16.msra.mxu1 %v3674_v59  ;;  %3549 = vmatprep.subr.bf16.mxu0 %v3548_v62  ;;  %v2912_v59 = vld [vmem:[%s6309_s3 + $0x1728] sm:$0xff]  ;;  %v2910_v62 = vld [vmem:[%s6309_s3 + $0x1718] sm:$0xff] }
 0x164   : > { %3677 = vmatprep.subr.bf16.mxu1 %v3676_v2  ;;  %v3568_v2 = vpack.c.bf16 %v2912_v59, %v2908_v5  ;;  %v3696_v8 = vpack.c.bf16 %v2914_v63, %v2910_v62  ;;  %v1863_v5 = vsel %vm1854_vm3, %v1861_v56, %v1862_v57  ;;  %v1871_v59 = vrot.slane %v1587_v27, 2  ;;  %v2199_v63 = vld [vmem:[%s6310_s4] sm:$0xf] }
 0x165   : > { %v2208_v18 = vrot.slane %v2199_v63, %v4128_v12 }
 0x166   : > { %3551 = vmatpush1.bf16.msra.mxu0 %v3550_v10  ;;  %v2916_v10 = vld [vmem:[%s6309_s3 + $0x1748] sm:$0xff]  ;;  %v1872_v21 = vsel %vm1854_vm3, %v1862_v57, %v1871_v59 }
 0x167   : > { %3679 = vmatpush1.bf16.msra.mxu1 %v3678_v11  ;;  %3553 = vmatprep.subr.bf16.mxu0 %v3552_v14  ;;  %v2920_v11 = vld [vmem:[%s6309_s3 + $0x1768] sm:$0xff]  ;;  %v2918_v14 = vld [vmem:[%s6309_s3 + $0x1758] sm:$0xff] }
 0x168   : > { %3681 = vmatprep.subr.bf16.mxu1 %v3680_v19  ;;  %v3572_v19 = vpack.c.bf16 %v2920_v11, %v2916_v10  ;;  %v3700_v29 = vpack.c.bf16 %v2922_v15, %v2918_v14  ;;  %v3775_v15 = vmov 1983009808  }
 0x16a   : > { %3555 = vmatpush1.bf16.msra.mxu0 %v3554_v31  ;;  %v2924_v31 = vld [vmem:[%s6309_s3 + $0x1788] sm:$0xff] }
 0x16b   : > { %3683 = vmatpush1.bf16.msra.mxu1 %v3682_v33  ;;  %3557 = vmatprep.subr.bf16.mxu0 %v3556_v53  ;;  %v2928_v33 = vld [vmem:[%s6309_s3 + $0x17a8] sm:$0xff]  ;;  %v2926_v53 = vld [vmem:[%s6309_s3 + $0x1798] sm:$0xff] }
 0x16c   : > { %3685 = vmatprep.subr.bf16.mxu1 %v3684_v24  ;;  %v3576_v24 = vpack.c.bf16 %v2928_v33, %v2924_v31  ;;  %v3704_v22 = vpack.c.bf16 %v2930_v34, %v2926_v53 }
 0x16e   : > { %3559 = vmatpush1.bf16.msra.mxu0 %v3558_v38  ;;  %v2932_v38 = vld [vmem:[%s6309_s3 + $0x17c8] sm:$0xff] }
 0x16f   : > { %3687 = vmatpush1.bf16.msra.mxu1 %v3686_v39  ;;  %3561 = vmatprep.subr.bf16.mxu0 %v3560_v26  ;;  %v2936_v39 = vld [vmem:[%s6309_s3 + $0x17e8] sm:$0xff]  ;;  %v2934_v26 = vld [vmem:[%s6309_s3 + $0x17d8] sm:$0xff] }
 0x170   : > { %3689 = vmatprep.subr.bf16.mxu1 %v3688_v47  ;;  %v3580_v47 = vpack.c.bf16 %v2936_v39, %v2932_v38  ;;  %v3708_v50 = vpack.c.bf16 %v2938_v43, %v2934_v26 }
 0x172   : > { %3563 = vmatpush1.bf16.msra.mxu0 %v3562_v42  ;;  %v2937_v42 = vld [vmem:[%s6309_s3 + $0x17f0] sm:$0xff] }
 0x173   : > { %3691 = vmatpush1.bf16.msra.mxu1 %v3690_v52  ;;  %3565 = vmatprep.subr.bf16.mxu0 %v3564_v55  ;;  %v1588_v52 = vld [vmem:[#allocation2 + $0x58] sm:$0x3]  ;;  %v3582_v55 = vpack.c.bf16 %v2935_v48, %v2931_v46  ;;  %v3710_v32 = vpack.c.bf16 %v2937_v42, %v2933_v51 }
 0x174   : > { %3693 = vmatprep.subr.bf16.mxu1 %v3692_v58  ;;  %v1873_v58 = vrot.slane %v1588_v52, 2 }
 0x176   : > { %3567 = vmatpush1.bf16.msra.mxu0 %v3566_v0  ;;  %v1874_v62 = vsel %vm1854_vm3, %v1865_v54, %v1873_v58  ;;  %v2204_v0 = vrot.slane %v2199_v63, %v4131_v13  ;;  %v2216_v54 = vrot.slane %v2199_v63, %v4413_v61 }
 0x177   : > { %3695 = vmatpush1.bf16.msra.mxu1 %v3694_v1  ;;  %3569 = vmatprep.subr.bf16.mxu0 %v3568_v2  ;;  %v2212_v1 = vrot.slane %v2199_v63, %v4431_v4 }
 0x178   : > { %3697 = vmatprep.subr.bf16.mxu1 %v3696_v8 }
 0x17a   : > { %3571 = vmatpush1.bf16.msra.mxu0 %v3570_v16  ;;  %v6287_v16 = vunpack.c.l.s4 %v3775_v15 }
 0x17b   : > { %3699 = vmatpush1.bf16.msra.mxu1 %v3698_v17  ;;  %3573 = vmatprep.subr.bf16.mxu0 %v3572_v19 }
 0x17c   : > { %3701 = vmatprep.subr.bf16.mxu1 %v3700_v29 }
 0x17e   : > { %3575 = vmatpush1.bf16.msra.mxu0 %v3574_v35 }
 0x17f   : > { %3703 = vmatpush1.bf16.msra.mxu1 %v3702_v25  ;;  %3577 = vmatprep.subr.bf16.mxu0 %v3576_v24 }
 0x180   : > { %3705 = vmatprep.subr.bf16.mxu1 %v3704_v22 }
 0x182   : > { %3579 = vmatpush1.bf16.msra.mxu0 %v3578_v44 }
 0x183   : > { %3707 = vmatpush1.bf16.msra.mxu1 %v3706_v45  ;;  %3581 = vmatprep.subr.bf16.mxu0 %v3580_v47 }
 0x184   : > { %3709 = vmatprep.subr.bf16.mxu1 %v3708_v50 }
 0x186   : > { %3583 = vmatpush1.bf16.msra.mxu0 %v3582_v55 }
 0x187   : > { %3711 = vmatpush1.bf16.msra.mxu1 %v3710_v32 }
 0x189   : > { %2025 = vmatmul.mubr.f32.vlgmr.msra.gmra.mrb[0].mxu0 %v1863_v5 }
 0x18a   : > { %2179 = vmatmul.mubr.f32.vlgmr.msra.gmra.mrb[0].mxu1 %v1863_v5  ;;  %2030 = vmatprep.mubr.f32.mxu0 %v1874_v62 }
 0x18b   : > { %2184 = vmatprep.mubr.f32.mxu1 %v1874_v62 }
 0x18d   : > { %2031 = vmatmul.mubr.f32.gmra.mrb[2].mxu0 %v1872_v21 }
 0x18e   : > { %2185 = vmatmul.mubr.f32.gmra.mrb[2].mxu1 %v1872_v21 }
 0x25c   : > { %v2026_v2 = vpop.f32.mrb[0].mxu0 }
 0x25d   : > { %v2221_v3 = vadd.f32 %v2204_v0, %v2026_v2  ;;  %v2180_v6 = vpop.f32.mrb[0].mxu1  ;;  %v2028_v13 = vpop.f32.mrb[1].mxu0 }
 0x25e   : > { %v2223_v7 = vadd.f32 %v2212_v1, %v2180_v6  ;;  %v2222_v4 = vadd.f32 %v2208_v18, %v2028_v13  ;;  %v2182_v8 = vpop.f32.mrb[1].mxu1 }
 0x25f   : > { %2229 = vst [vmem:[%s6281_s18] sm:$0xff] %v2221_v3  ;;  %v2224_v12 = vadd.f32 %v2216_v54, %v2182_v8  ;;  %v2265_v9 = vmul.f32 %v2221_v3, %v2221_v3  ;;  %v2313_v8 = vunpack.c.0.s8 %v6287_v16 }
 0x260   : > { %2231 = vst [vmem:[%s6281_s18 + $0x10] sm:$0xff] %v2223_v7  ;;  %2230 = vst [vmem:[%s6281_s18 + $0x8] sm:$0xff] %v2222_v4  ;;  %v2032_v61 = vpop.f32.mrb[2].mxu0  ;;  %v2267_v17 = vmul.f32 %v2223_v7, %v2223_v7  ;;  %v2266_v19 = vmul.f32 %v2222_v4, %v2222_v4 }
 0x261   : > { %2232 = vst [vmem:[%s6281_s18 + $0x18] sm:$0xff] %v2224_v12  ;;  %v2225_v10 = vadd.f32 %v2204_v0, %v2032_v61  ;;  %v2186_v11 = vpop.f32.mrb[2].mxu1  ;;  %v2034_v14 = vpop.f32.mrb[3].mxu0  ;;  %v2268_v29 = vmul.f32 %v2224_v12, %v2224_v12 }
 0x262   : > { %v2227_v20 = vadd.f32 %v2212_v1, %v2186_v11  ;;  %v2226_v23 = vadd.f32 %v2208_v18, %v2034_v14  ;;  %v2188_v28 = vpop.f32.mrb[3].mxu1 }
 0x263   : > { %2233 = vst [vmem:[%s6281_s18 + $0x20] sm:$0xff] %v2225_v10  ;;  %v2237_v30 = vadd.f32 %v2225_v10, %v2221_v3  ;;  %v2269_v31 = vmul.f32 %v2225_v10, %v2225_v10  ;;  %v2228_v33 = vadd.f32 %v2216_v54, %v2188_v28 }
 0x264   : > { %2235 = vst [vmem:[%s6281_s18 + $0x30] sm:$0xff] %v2227_v20  ;;  %v2251_v53 = vadd.f32 %v2227_v20, %v2223_v7  ;;  %v2271_v34 = vmul.f32 %v2227_v20, %v2227_v20  ;;  %2234 = vst [vmem:[%s6281_s18 + $0x28] sm:$0xff] %v2226_v23  ;;  %v2244_v35 = vadd.f32 %v2226_v23, %v2222_v4 }
 0x265   : > { %v2270_v25 = vmul.f32 %v2226_v23, %v2226_v23  ;;  %v2238_v24 = vrot.slane %v2237_v30, 4  ;;  %v2273_v41 = vadd.f32 %v2269_v31, %v2265_v9  ;;  %2236 = vst [vmem:[%s6281_s18 + $0x38] sm:$0xff] %v2228_v33  ;;  %v2258_v36 = vadd.f32 %v2228_v33, %v2224_v12 }
 0x266   : > { %v2272_v37 = vmul.f32 %v2228_v33, %v2228_v33  ;;  %v2252_v22 = vrot.slane %v2251_v53, 4  ;;  %v2287_v40 = vadd.f32 %v2271_v34, %v2267_v17  ;;  %v2245_v38 = vrot.slane %v2244_v35, 4 }
 0x267   : > { %v2280_v39 = vadd.f32 %v2270_v25, %v2266_v19  ;;  %v2239_v26 = vadd.f32 %v2238_v24, %v2237_v30  ;;  %v2274_v43 = vrot.slane %v2273_v41, 4  ;;  %v2259_v44 = vrot.slane %v2258_v36, 4 }
 0x268   : > { %v2294_v45 = vadd.f32 %v2272_v37, %v2268_v29  ;;  %v2253_v47 = vadd.f32 %v2252_v22, %v2251_v53  ;;  %v2288_v46 = vrot.slane %v2287_v40, 4  ;;  %v2246_v48 = vadd.f32 %v2245_v38, %v2244_v35 }
 0x269   : > { %v2281_v49 = vrot.slane %v2280_v39, 4  ;;  %v2240_v50 = vrot.slane %v2239_v26, 2  ;;  %v2275_v51 = vadd.f32 %v2274_v43, %v2273_v41  ;;  %v2260_v42 = vadd.f32 %v2259_v44, %v2258_v36 }
 0x26a   : > { %v2295_v52 = vrot.slane %v2294_v45, 4  ;;  %v2254_v55 = vrot.slane %v2253_v47, 2  ;;  %v2289_v56 = vadd.f32 %v2288_v46, %v2287_v40  ;;  %v2247_v57 = vrot.slane %v2246_v48, 2 }
 0x26b   : > { %v2282_v32 = vadd.f32 %v2281_v49, %v2280_v39  ;;  %v2241_v58 = vadd.f32 %v2240_v50, %v2239_v26  ;;  %v2276_v27 = vrot.slane %v2275_v51, 2  ;;  %v2261_v5 = vrot.slane %v2260_v42, 2 }
 0x26c   : > { %v2296_v59 = vadd.f32 %v2295_v52, %v2294_v45  ;;  %v2255_v62 = vadd.f32 %v2254_v55, %v2253_v47  ;;  %v2290_v21 = vrot.slane %v2289_v56, 2  ;;  %v2248_v63 = vadd.f32 %v2247_v57, %v2246_v48 }
 0x26d   : > { %v2283_v0 = vrot.slane %v2282_v32, 2  ;;  %v2242_v1 = vrot.slane %v2241_v58, 1  ;;  %v2277_v18 = vadd.f32 %v2276_v27, %v2275_v51  ;;  %v2262_v54 = vadd.f32 %v2261_v5, %v2260_v42 }
 0x26e   : > { %v2297_v2 = vrot.slane %v2296_v59, 2  ;;  %v2256_v3 = vrot.slane %v2255_v62, 1  ;;  %v2291_v6 = vadd.f32 %v2290_v21, %v2289_v56  ;;  %v2249_v13 = vrot.slane %v2248_v63, 1 }
 0x26f   : > { %v2284_v7 = vadd.f32 %v2283_v0, %v2282_v32  ;;  %v2278_v4 = vrot.slane %v2277_v18, 1  ;;  %v2263_v12 = vrot.slane %v2262_v54, 1  ;;  %v2243_v11 = vadd.f32 %v2242_v1, %v2241_v58 }
 0x270   : > { %v2298_v61 = vadd.f32 %v2297_v2, %v2296_v59  ;;  %v2292_v9 = vrot.slane %v2291_v6, 1  ;;  %v2257_v17 = vadd.f32 %v2256_v3, %v2255_v62  ;;  %v2250_v20 = vadd.f32 %v2249_v13, %v2248_v63 }
 0x271   : > { %v2285_v10 = vrot.slane %v2284_v7, 1  ;;  %v2279_v14 = vadd.f32 %v2278_v4, %v2277_v18  ;;  %v2316_v29 = vsub.s32 %v2313_v8, %v4085_v60  ;;  %v2264_v30 = vadd.f32 %v2263_v12, %v2262_v54 }
 0x272   : > { %v2299_v15 = vrot.slane %v2298_v61, 1  ;;  %v2293_v19 = vadd.f32 %v2292_v9, %v2291_v6 }
 0x273   : > { %v2286_v23 = vadd.f32 %v2285_v10, %v2284_v7  ;;  %v2301_v28 = vsel %vm358_vm0, %v2243_v11, %v2279_v14 }
 0x274   : > { %v2300_v31 = vadd.f32 %v2299_v15, %v2298_v61  ;;  %v2303_v16 = vsel %vm358_vm0, %v2257_v17, %v2293_v19 }
 0x275   : > { %v2302_v33 = vsel %vm358_vm0, %v2250_v20, %v2286_v23 }
 0x276   : > { %v2309_v53 = vcombine.low %v2301_v28, %v2302_v33  ;;  %v2304_v34 = vsel %vm358_vm0, %v2264_v30, %v2300_v31 }
 0x277   : > { %v2310_v35 = vcombine.low %v2303_v16, %v2304_v34 }
 0x278   : > { %v2317_v25 = vrot.slane %v2309_v53, %v2316_v29 }
 0x279   : > { %v2324_v24 = vrot.slane %v2310_v35, %v2316_v29 }
 0x27b   : > { %v2325_v41 = vcombine.low %v2317_v25, %v2324_v24 }
 0x27d   : > { %2327 = vst [vmem:[%s264_s23] sm:$0xff] %v2325_v41 }
 0x27e PF: > { %s17_s21 = sadd.s32 1, %s3772_s21  }
 0x27f   : > { %p14_p4 = scmp.ge.s32.totalorder %s17_s21, 4  }
 0x281   :  { %16 = sbr.rel (!%p14_p4) target bundleno = 1 (0x1), region = 85 }

// kernel: decoder_block_forward.5
= control target key start
LH: loop header
LB: loop body
LE: loop exit
PB: predicated region body
PF: predicated region fallthrough
CT: control target
= control target key end

     0   :  { %s1263_s24 = smov 0   ;;  %s1683_s0 = inlined_call_operand.vmem [shape: f32[2,16,512], index: 0, kind: input, shape index: {}]   ;;  %s1684_s1 = inlined_call_operand.vmem [shape: f32[1,512], index: 1, kind: input, shape index: {}]   ;;  %s1685_s2 = inlined_call_operand.vmem [shape: f32[1,512], index: 2, kind: input, shape index: {}]   ;;  %s1686_s3 = inlined_call_operand.vmem [shape: f32[512,32], index: 3, kind: input, shape index: {}]   ;;  %s1687_s4 = inlined_call_operand.vmem [shape: f32[32,2], index: 4, kind: input, shape index: {}]   ;;  %s1688_s5 = inlined_call_operand.vmem [shape: f32[2,32], index: 5, kind: input, shape index: {}]   ;;  %s1689_s6 = inlined_call_operand.vmem [shape: f32[32,512], index: 6, kind: input, shape index: {}]   ;;  %s1690_s7 = inlined_call_operand.vmem [shape: f32[2,16,512], index: 7, kind: output, shape index: {}]  }
   0x1 LB: > { %s999_s25 = sadd.s32 4294967295, %s1218_s24   ;;  %p1003_p0 = scmp.ge.s32.totalorder %s1218_s24, 1  ;;  %s1218_s24 = sphi %s1263_s24, %s17_s24  }
   0x2   : > { %p237_p1 = scmp.lt.s32.totalorder %s1218_s24, 3 }
   0x4   : > { %p238_p2 = pnand %p1003_p0, %p237_p1 }
   0x5   : > { %v399_v0 = vld [vmem:[%s1686_s3 + $0x80] sm:$0xff] (!%p238_p2)  ;;  %v400_v1 = vld [vmem:[%s1686_s3 + $0x88] sm:$0xff] (!%p238_p2)  ;;  %v401_v11 = vld [vmem:[%s1686_s3 + $0x90] sm:$0xff] (!%p238_p2)  ;;  %p1345_p3 = scmp.lt.s32.totalorder (!%p238_p2), %s999_s25, 1  ;;  %v289_v50 = vlaneseq (!%p238_p2)  ;;  %vm1221_vm0 = vmmov (!%p238_p2), 0   ;;  %vm671_vm1 = vcmask (!%p238_p2), 1041408  }
   0x6   : > { %241 = sbr.rel (%p238_p2) target bundleno = 941 (0x3ad), region = 48  ;;  %v431_v2 = vld [vmem:[%s1686_s3 + $0x180] sm:$0xff] (!%p238_p2)  ;;  %v1111_v3 = vpack.c.bf16 (!%p238_p2), %v400_v1, %v399_v0  ;;  %v432_v4 = vld [vmem:[%s1686_s3 + $0x188] sm:$0xff] (!%p238_p2)  ;;  %v402_v13 = vld [vmem:[%s1686_s3 + $0x98] sm:$0xff] (!%p238_p2)  ;;  %vm591_vm2 = vcmask (!%p238_p2), 261120   ;;  %vm667_vm3 = vcmask (!%p238_p2), 15360  }
   0x7   : > { %v383_v5 = vld [vmem:[%s1686_s3] sm:$0xff] (!%p238_p2)  ;;  %v384_v6 = vld [vmem:[%s1686_s3 + $0x8] sm:$0xff] (!%p238_p2)  ;;  %v1143_v7 = vpack.c.bf16 (!%p238_p2), %v432_v4, %v431_v2  ;;  %v433_v14 = vld [vmem:[%s1686_s3 + $0x190] sm:$0xff] (!%p238_p2)  ;;  %v1115_v16 = vpack.c.bf16 (!%p238_p2), %v402_v13, %v401_v11 }
   0x8   : > { %v1113_v8 = vpack.c.bf16 (!%p238_p2), %v384_v6, %v383_v5  ;;  %v415_v9 = vld [vmem:[%s1686_s3 + $0x100] sm:$0xff] (!%p238_p2)  ;;  %v416_v10 = vld [vmem:[%s1686_s3 + $0x108] sm:$0xff] (!%p238_p2)  ;;  %1112 = vmatprep.subr.bf16.mxu0 (!%p238_p2), %v1111_v3  ;;  %v434_v15 = vld [vmem:[%s1686_s3 + $0x198] sm:$0xff] (!%p238_p2)  ;;  %v1432_v3 = vshrl.u32 (!%p238_p2), %v289_v50, 7 }
   0x9   : > { %v1145_v12 = vpack.c.bf16 (!%p238_p2), %v416_v10, %v415_v9  ;;  %1144 = vmatprep.subr.bf16.mxu1 (!%p238_p2), %v1143_v7  ;;  %v1147_v17 = vpack.c.bf16 (!%p238_p2), %v434_v15, %v433_v14  ;;  %v385_v18 = vld [vmem:[%s1686_s3 + $0x10] sm:$0xff] (!%p238_p2)  ;;  %v386_v19 = vld [vmem:[%s1686_s3 + $0x18] sm:$0xff] (!%p238_p2)  ;;  %v403_v23 = vld [vmem:[%s1686_s3 + $0xa0] sm:$0xff] (!%p238_p2) }
   0xa   : > { %1114 = vmatpush3.bf16.msra.mxu0 (!%p238_p2), %v1113_v8  ;;  %v417_v20 = vld [vmem:[%s1686_s3 + $0x110] sm:$0xff] (!%p238_p2)  ;;  %v1117_v21 = vpack.c.bf16 (!%p238_p2), %v386_v19, %v385_v18  ;;  %v418_v22 = vld [vmem:[%s1686_s3 + $0x118] sm:$0xff] (!%p238_p2)  ;;  %v404_v24 = vld [vmem:[%s1686_s3 + $0xa8] sm:$0xff] (!%p238_p2) }
   0xb   : > { %1146 = vmatpush3.bf16.msra.mxu1 (!%p238_p2), %v1145_v12  ;;  %1116 = vmatprep.subr.bf16.mxu0 (!%p238_p2), %v1115_v16  ;;  %v1149_v25 = vpack.c.bf16 (!%p238_p2), %v418_v22, %v417_v20  ;;  %v1119_v26 = vpack.c.bf16 (!%p238_p2), %v404_v24, %v403_v23  ;;  %v435_v27 = vld [vmem:[%s1686_s3 + $0x1a0] sm:$0xff] (!%p238_p2)  ;;  %v436_v28 = vld [vmem:[%s1686_s3 + $0x1a8] sm:$0xff] (!%p238_p2)  ;;  %v405_v35 = vld [vmem:[%s1686_s3 + $0xb0] sm:$0xff] (!%p238_p2)  ;;  %v1496_v20 = vsub.s32 (!%p238_p2), 0, %v1432_v3  ;;  %v303_v22 = vsub.s32 (!%p238_p2), 3, %v1432_v3 }
   0xc   : > { %1148 = vmatprep.subr.bf16.mxu1 (!%p238_p2), %v1147_v17  ;;  %v387_v29 = vld [vmem:[%s1686_s3 + $0x20] sm:$0xff] (!%p238_p2)  ;;  %v1151_v30 = vpack.c.bf16 (!%p238_p2), %v436_v28, %v435_v27  ;;  %v388_v31 = vld [vmem:[%s1686_s3 + $0x28] sm:$0xff] (!%p238_p2)  ;;  %v406_v36 = vld [vmem:[%s1686_s3 + $0xb8] sm:$0xff] (!%p238_p2) }
   0xd   : > { %v419_v32 = vld [vmem:[%s1686_s3 + $0x120] sm:$0xff]  ;;  %v420_v33 = vld [vmem:[%s1686_s3 + $0x128] sm:$0xff]  ;;  %v1121_v34 = vpack.c.bf16 %v388_v31, %v387_v29  ;;  %v437_v37 = vld [vmem:[%s1686_s3 + $0x1b0] sm:$0xff]  ;;  %v1123_v39 = vpack.c.bf16 %v406_v36, %v405_v35  ;;  %s1693_s25 = smov (!%p1345_p3, %s999_s25), 1  ;;  %v299_v29 = vsub.s32 2, %v1432_v3 }
   0xe   : > { %1118 = vmatpush3.bf16.msra.mxu0 %v1117_v21  ;;  %v1153_v38 = vpack.c.bf16 %v420_v33, %v419_v32  ;;  %v438_v40 = vld [vmem:[%s1686_s3 + $0x1b8] sm:$0xff]  ;;  %v389_v41 = vld [vmem:[%s1686_s3 + $0x30] sm:$0xff]  ;;  %v407_v46 = vld [vmem:[%s1686_s3 + $0xc0] sm:$0xff]  ;;  %s1016_s17 = sshll.u32 %s1693_s25, 6  ;;  %v295_v21 = vsub.s32 1, %v1432_v3 }
   0xf   : > { %1150 = vmatpush3.bf16.msra.mxu1 %v1149_v25  ;;  %1120 = vmatprep.subr.bf16.mxu0 %v1119_v26  ;;  %v390_v42 = vld [vmem:[%s1686_s3 + $0x38] sm:$0xff]  ;;  %v1155_v43 = vpack.c.bf16 %v438_v40, %v437_v37  ;;  %v421_v44 = vld [vmem:[%s1686_s3 + $0x130] sm:$0xff]  ;;  %v408_v47 = vld [vmem:[%s1686_s3 + $0xc8] sm:$0xff]  ;;  %s1478_s18 = scalar_lea.vmem %s1683_s0, %s1016_s17  ;;  %s278_s20 = scalar_lea.vmem %s1690_s7, %s1016_s17 }
  0x10   : > { %1152 = vmatprep.subr.bf16.mxu1 %v1151_v30  ;;  %v422_v45 = vld [vmem:[%s1686_s3 + $0x138] sm:$0xff]  ;;  %v439_v48 = vld [vmem:[%s1686_s3 + $0x1c0] sm:$0xff]  ;;  %v440_v49 = vld [vmem:[%s1686_s3 + $0x1c8] sm:$0xff]  ;;  %v1125_v51 = vpack.c.bf16 %v390_v42, %v389_v41  ;;  %v1127_v55 = vpack.c.bf16 %v408_v47, %v407_v46 }
  0x11   : > { %v391_v52 = vld [vmem:[%s1686_s3 + $0x40] sm:$0xff]  ;;  %v392_v53 = vld [vmem:[%s1686_s3 + $0x48] sm:$0xff]  ;;  %v1157_v54 = vpack.c.bf16 %v422_v45, %v421_v44  ;;  %v409_v58 = vld [vmem:[%s1686_s3 + $0xd0] sm:$0xff]  ;;  %v1159_v59 = vpack.c.bf16 %v440_v49, %v439_v48 }
  0x12   : > { %1122 = vmatpush3.bf16.msra.mxu0 %v1121_v34  ;;  %v423_v56 = vld [vmem:[%s1686_s3 + $0x140] sm:$0xff]  ;;  %v424_v57 = vld [vmem:[%s1686_s3 + $0x148] sm:$0xff]  ;;  %v410_v60 = vld [vmem:[%s1686_s3 + $0xd8] sm:$0xff]  ;;  %v1129_v4 = vpack.c.bf16 %v392_v53, %v391_v52 }
  0x13   : > { %1154 = vmatpush3.bf16.msra.mxu1 %v1153_v38  ;;  %1124 = vmatprep.subr.bf16.mxu0 %v1123_v39  ;;  %v441_v61 = vld [vmem:[%s1686_s3 + $0x1d0] sm:$0xff]  ;;  %v442_v62 = vld [vmem:[%s1686_s3 + $0x1d8] sm:$0xff]  ;;  %v411_v5 = vld [vmem:[%s1686_s3 + $0xe0] sm:$0xff]  ;;  %v1161_v8 = vpack.c.bf16 %v424_v57, %v423_v56  ;;  %v1131_v9 = vpack.c.bf16 %v410_v60, %v409_v58 }
  0x14   : > { %1156 = vmatprep.subr.bf16.mxu1 %v1155_v43  ;;  %v393_v63 = vld [vmem:[%s1686_s3 + $0x50] sm:$0xff]  ;;  %v394_v0 = vld [vmem:[%s1686_s3 + $0x58] sm:$0xff]  ;;  %v412_v6 = vld [vmem:[%s1686_s3 + $0xe8] sm:$0xff]  ;;  %v1163_v13 = vpack.c.bf16 %v442_v62, %v441_v61 }
  0x15   : > { %v1424_v1 = vld [vmem:[%s1686_s3 + $0x150] sm:$0xff]  ;;  %v1429_v2 = vld [vmem:[%s1686_s3 + $0x158] sm:$0xff]  ;;  %v1443_v7 = vld [vmem:[%s1686_s3 + $0x1e0] sm:$0xff]  ;;  %v1133_v23 = vpack.c.bf16 %v394_v0, %v393_v63  ;;  %v1135_v25 = vpack.c.bf16 %v412_v6, %v411_v5 }
  0x16   : > { %1126 = vmatpush3.bf16.msra.mxu0 %v1125_v51  ;;  %v444_v10 = vld [vmem:[%s1686_s3 + $0x1e8] sm:$0xff]  ;;  %v1451_v11 = vld [vmem:[%s1686_s3 + $0x60] sm:$0xff]  ;;  %v1471_v16 = vld [vmem:[%s1686_s3 + $0xf0] sm:$0xff]  ;;  %v1165_v24 = vpack.c.bf16 %v1429_v2, %v1424_v1 }
  0x17   : > { %1158 = vmatpush3.bf16.msra.mxu1 %v1157_v54  ;;  %1128 = vmatprep.subr.bf16.mxu0 %v1127_v55  ;;  %v1456_v12 = vld [vmem:[%s1686_s3 + $0x68] sm:$0xff]  ;;  %v1461_v14 = vld [vmem:[%s1686_s3 + $0x160] sm:$0xff]  ;;  %v1483_v17 = vld [vmem:[%s1686_s3 + $0xf8] sm:$0xff]  ;;  %v1167_v30 = vpack.c.bf16 %v444_v10, %v1443_v7 }
  0x18   : > { %1160 = vmatprep.subr.bf16.mxu1 %v1159_v59  ;;  %v1466_v15 = vld [vmem:[%s1686_s3 + $0x168] sm:$0xff]  ;;  %v1488_v18 = vld [vmem:[%s1686_s3 + $0x1f0] sm:$0xff]  ;;  %v1493_v19 = vld [vmem:[%s1686_s3 + $0x1f8] sm:$0xff]  ;;  %v1137_v31 = vpack.c.bf16 %v1456_v12, %v1451_v11  ;;  %v1139_v36 = vpack.c.bf16 %v1483_v17, %v1471_v16 }
  0x19   : > { %v1505_v26 = vld [vmem:[%s1686_s3 + $0x70] sm:$0xff]  ;;  %v1510_v27 = vld [vmem:[%s1686_s3 + $0x78] sm:$0xff]  ;;  %v1169_v32 = vpack.c.bf16 %v1466_v15, %v1461_v14  ;;  %v280_v34 = vld [vmem:[%s1478_s18 + $0x8] sm:$0xff]  ;;  %v1171_v37 = vpack.c.bf16 %v1493_v19, %v1488_v18 }
  0x1a   : > { %1130 = vmatpush3.bf16.msra.mxu0 %v1129_v4  ;;  %v1515_v28 = vld [vmem:[%s1686_s3 + $0x170] sm:$0xff]  ;;  %v430_v33 = vld [vmem:[%s1686_s3 + $0x178] sm:$0xff]  ;;  %v284_v35 = vld [vmem:[%s1478_s18 + $0x28] sm:$0xff]  ;;  %v1141_v38 = vpack.c.bf16 %v1510_v27, %v1505_v26 }
  0x1b   : > { %1162 = vmatpush3.bf16.msra.mxu1 %v1161_v8  ;;  %1132 = vmatprep.subr.bf16.mxu0 %v1131_v9  ;;  %v1173_v39 = vpack.c.bf16 %v430_v33, %v1515_v28  ;;  %v287_v40 = vld [vmem:[%s1684_s1] sm:$0xf]  ;;  %v282_v42 = vld [vmem:[%s1478_s18 + $0x18] sm:$0xff]  ;;  %v281_v52 = vld [vmem:[%s1478_s18 + $0x10] sm:$0xff] }
  0x1c   : > { %1164 = vmatprep.subr.bf16.mxu1 %v1163_v13  ;;  %v317_v41 = vld [vmem:[%s1685_s2] sm:$0xf]  ;;  %v296_v43 = vrot.slane %v287_v40, %v295_v21  ;;  %v286_v45 = vld [vmem:[%s1478_s18 + $0x38] sm:$0xff]  ;;  %v304_v46 = vrot.slane %v287_v40, %v303_v22  ;;  %v292_v50 = vrot.slane %v287_v40, %v1496_v20  ;;  %v285_v53 = vld [vmem:[%s1478_s18 + $0x30] sm:$0xff]  ;;  %v300_v54 = vrot.slane %v287_v40, %v299_v29 }
  0x1d   : > { %v326_v44 = vrot.slane %v317_v41, %v295_v21  ;;  %v334_v47 = vrot.slane %v317_v41, %v303_v22  ;;  %v279_v48 = vld [vmem:[%s1478_s18] sm:$0xff]  ;;  %v322_v51 = vrot.slane %v317_v41, %v1496_v20  ;;  %v330_v55 = vrot.slane %v317_v41, %v299_v29 }
  0x1e   : > { %v283_v49 = vld [vmem:[%s1478_s18 + $0x20] sm:$0xff]  ;;  %1134 = vmatpush3.bf16.msra.mxu0 %v1133_v23  ;;  %v310_v56 = vmul.f32 %v296_v43, %v280_v34  ;;  %v314_v57 = vmul.f32 %v296_v43, %v284_v35  ;;  %v312_v58 = vmul.f32 %v304_v46, %v282_v42  ;;  %v316_v59 = vmul.f32 %v304_v46, %v286_v45 }
  0x1f   : > { %1166 = vmatpush3.bf16.msra.mxu1 %v1165_v24  ;;  %1136 = vmatprep.subr.bf16.mxu0 %v1135_v25  ;;  %v309_v60 = vmul.f32 %v292_v50, %v279_v48  ;;  %v313_v61 = vmul.f32 %v292_v50, %v283_v49  ;;  %v311_v62 = vmul.f32 %v300_v54, %v281_v52  ;;  %v1220_v22 = vmov 0.0|0.0   ;;  %v589_v49 = vld [vmem:[%s1687_s4 + $0x10] sm:$0xff]  ;;  %v590_v50 = vld [vmem:[%s1687_s4 + $0x18] sm:$0xff] }
  0x20   : > { %1168 = vmatprep.subr.bf16.mxu1 %v1167_v30  ;;  %v1549_v63 = vadd.f32 %v326_v44, %v310_v56  ;;  %v1551_v0 = vadd.f32 %v326_v44, %v314_v57  ;;  %v1553_v1 = vadd.f32 %v334_v47, %v312_v58  ;;  %v315_v2 = vmul.f32 %v300_v54, %v285_v53  ;;  %v666_v53 = vld [vmem:[%s1688_s5] sm:$0x3] }
  0x21   : > { %v1555_v3 = vadd.f32 %v334_v47, %v316_v59  ;;  %v1557_v4 = vadd.f32 %v322_v51, %v309_v60  ;;  %v1559_v5 = vadd.f32 %v322_v51, %v313_v61  ;;  %v1561_v6 = vadd.f32 %v330_v55, %v311_v62 }
  0x22   : > { %1138 = vmatpush3.bf16.msra.mxu0 %v1137_v31  ;;  %v348_v7 = vmax.f32 %v1549_v63, 0.0  ;;  %v352_v8 = vmax.f32 %v1551_v0, 0.0  ;;  %v350_v9 = vmax.f32 %v1553_v1, 0.0  ;;  %v1566_v10 = vadd.f32 %v330_v55, %v315_v2 }
  0x23   : > { %1170 = vmatpush3.bf16.msra.mxu1 %v1169_v32  ;;  %1140 = vmatprep.subr.bf16.mxu0 %v1139_v36  ;;  %v354_v11 = vmax.f32 %v1555_v3, 0.0  ;;  %v347_v12 = vmax.f32 %v1557_v4, 0.0  ;;  %v351_v13 = vmax.f32 %v1559_v5, 0.0  ;;  %v349_v14 = vmax.f32 %v1561_v6, 0.0 }
  0x24   : > { %1172 = vmatprep.subr.bf16.mxu1 %v1171_v37  ;;  %v362_v15 = vadd.f32 %v352_v8, %v348_v7  ;;  %v353_v16 = vmax.f32 %v1566_v10, 0.0  ;;  %v587_v37 = vld [vmem:[%s1687_s4] sm:$0xff]  ;;  %v1179_v51 = vpack.c.bf16 %v590_v50, %v589_v49  ;;  %v1222_v52 = vmov 0.0  }
  0x25   : > { %v376_v17 = vadd.f32 %v354_v11, %v350_v9  ;;  %v355_v18 = vadd.f32 %v351_v13, %v347_v12 }
  0x26   : > { %1142 = vmatpush3.bf16.msra.mxu0 %v1141_v38  ;;  %v363_v19 = vrot.slane %v362_v15, 4  ;;  %v369_v21 = vadd.f32 %v353_v16, %v349_v14  ;;  %v588_v38 = vld [vmem:[%s1687_s4 + $0x8] sm:$0xff] }
  0x27   : > { %1174 = vmatpush3.bf16.msra.mxu1 %v1173_v39  ;;  %1175 = vmatprep.subr.bf16.mxu0 %v1220_v22  ;;  %v377_v23 = vrot.slane %v376_v17, 4  ;;  %v356_v24 = vrot.slane %v355_v18, 4  ;;  %v1176_v45 = vpack.c.bf16 %v588_v38, %v587_v37  ;;  %v761_v37 = vld [vmem:[%s1689_s6 + $0x50] sm:$0xff] }
  0x28   : > { %v364_v25 = vadd.f32 %v363_v19, %v362_v15  ;;  %v370_v26 = vrot.slane %v369_v21, 4  ;;  %1106 = vmatprep.subr.mxu1 %v1222_v52  ;;  %v752_v15 = vld [vmem:[%s1689_s6 + $0x8] sm:$0xff] }
  0x29   : > { %v378_v27 = vadd.f32 %v377_v23, %v376_v17  ;;  %v357_v28 = vadd.f32 %v356_v24, %v355_v18  ;;  %v756_v17 = vld [vmem:[%s1689_s6 + $0x28] sm:$0xff]  ;;  %v754_v18 = vld [vmem:[%s1689_s6 + $0x18] sm:$0xff]  ;;  %v755_v23 = vld [vmem:[%s1689_s6 + $0x20] sm:$0xff] }
  0x2a   : > { %v365_v29 = vrot.slane %v364_v25, 2  ;;  %v371_v30 = vadd.f32 %v370_v26, %v369_v21  ;;  %v1181_v19 = vpack.c.bf16 %v756_v17, %v752_v15  ;;  %v758_v21 = vld [vmem:[%s1689_s6 + $0x38] sm:$0xff]  ;;  %v753_v26 = vld [vmem:[%s1689_s6 + $0x10] sm:$0xff] }
  0x2b   : > { %v379_v31 = vrot.slane %v378_v27, 2  ;;  %v358_v32 = vrot.slane %v357_v28, 2  ;;  %v1189_v24 = vpack.c.bf16 %v758_v21, %v754_v18 }
  0x2c   : > { %v366_v33 = vadd.f32 %v365_v29, %v364_v25  ;;  %v372_v34 = vrot.slane %v371_v30, 2 }
  0x2d   : > { %v380_v35 = vadd.f32 %v379_v31, %v378_v27  ;;  %v359_v36 = vadd.f32 %v358_v32, %v357_v28  ;;  %v757_v27 = vld [vmem:[%s1689_s6 + $0x30] sm:$0xff]  ;;  %v760_v28 = vld [vmem:[%s1689_s6 + $0x48] sm:$0xff]  ;;  %v762_v31 = vld [vmem:[%s1689_s6 + $0x58] sm:$0xff] }
  0x2e   : > { %v367_v39 = vrot.slane %v366_v33, 1  ;;  %v373_v40 = vadd.f32 %v372_v34, %v371_v30  ;;  %v1191_v29 = vpack.c.bf16 %v757_v27, %v753_v26  ;;  %v764_v30 = vld [vmem:[%s1689_s6 + $0x68] sm:$0xff]  ;;  %v766_v32 = vld [vmem:[%s1689_s6 + $0x78] sm:$0xff] }
  0x2f   : > { %v381_v41 = vrot.slane %v380_v35, 1  ;;  %v360_v42 = vrot.slane %v359_v36, 1  ;;  %v1193_v34 = vpack.c.bf16 %v766_v32, %v762_v31 }
  0x30   : > { %v368_v43 = vadd.f32 %v367_v39, %v366_v33  ;;  %v374_v44 = vrot.slane %v373_v40, 1  ;;  %v1185_v33 = vpack.c.bf16 %v764_v30, %v760_v28  ;;  %v765_v39 = vld [vmem:[%s1689_s6 + $0x70] sm:$0xff] }
  0x31   : > { %v382_v46 = vadd.f32 %v381_v41, %v380_v35  ;;  %v361_v47 = vadd.f32 %v360_v42, %v359_v36  ;;  %v759_v35 = vld [vmem:[%s1689_s6 + $0x40] sm:$0xff] }
  0x32   : > { %511 = vmatprep.mubr.f32.mxu0 %v368_v43  ;;  %v375_v48 = vadd.f32 %v374_v44, %v373_v40  ;;  %v763_v36 = vld [vmem:[%s1689_s6 + $0x60] sm:$0xff]  ;;  %v1195_v40 = vpack.c.bf16 %v765_v39, %v761_v37 }
  0x33   : > { %581 = vmatprep.mubr.f32.mxu1 %v382_v46  ;;  %512 = vmatmul.mubr.f32.vlgmr.msra.gmra.mrb[0].mxu0 %v361_v47  ;;  %v1187_v38 = vpack.c.bf16 %v763_v36, %v759_v35 }
  0x34   : > { %582 = vmatmul.mubr.f32.vlgmr.msra.gmra.mrb[0].mxu1 %v375_v48  ;;  %1177 = vmatpush3.bf16.msra.mxu0 %v1176_v45 }
  0x35   : > { %1178 = vmatprep.subr.bf16.mxu0 %v1220_v22  ;;  %1103 = vmatprep.mubr.msk.f32.mxu0 %vm1221_vm0, %v1222_v52  ;;  %v751_v22 = vld [vmem:[%s1689_s6] sm:$0xff] }
  0x36   : > { %1108 = vmatprep.mubr.msk.f32.mxu1 %vm1221_vm0, %v1222_v52  ;;  %1107 = vmatpush3.msk.msra.mxu1 %vm671_vm1, %v666_v53  ;;  %v1183_v25 = vpack.c.bf16 %v755_v23, %v751_v22 }
  0x37   : > { %1182 = vmatprep.subr.bf16.mxu1 %v1181_v19 }
  0x38   : > { %1180 = vmatpush3.bf16.msra.mxu0 %v1179_v51 }
  0x39   : > { %1190 = vmatprep.subr.bf16.mxu0 %v1189_v24 }
 0x106   : > { %v1050_v54 = vpop.f32.mrb[0].mxu0 }
 0x107   : > { %v1085_v55 = vpop.f32.mrb[0].mxu1  ;;  %v1051_v56 = vpop.f32.mrb[1].mxu0 }
 0x108   : > { %v1052_v57 = vadd.f32 %v1051_v56, %v1050_v54  ;;  %v1086_v58 = vpop.f32.mrb[1].mxu1 }
 0x109   : > { %v1087_v59 = vadd.f32 %v1086_v58, %v1085_v55 }
 0x10b   : > { %v584_v60 = vadd.f32 %v1087_v59, %v1052_v57 }
 0x10d   : > { %1104 = vmatmul.mubr.msk.f32.vlgmr.msra.gmra.mrb[2].mxu0 %vm591_vm2, %v584_v60 }
 0x10e   : > { %905 = vmatprep.mubr.f32.mxu0 %v1222_v52  ;;  %1192 = vmatpush1.bf16.msra.mxu0 %v1191_v29 }
 0x10f   : > { %1194 = vmatprep.subr.bf16.mxu0 %v1193_v34 }
 0x112   : > { %1196 = vmatpush1.bf16.msra.mxu0 %v1195_v40 }
 0x1e0   : > { %v661_v61 = vpop.f32.mrb[2].mxu0 }
 0x1e1   : > { %v665_v62 = vmax.f32 %v661_v61, 0.0  ;;  %v1105_v2 = vpop.f32.mrb[3].mxu0 }
 0x1e3   : > { %1109 = vmatmul.mubr.msk.f32.vlgmr.msra.gmra.mrb[2].mxu1 %vm667_vm3, %v665_v62 }
 0x1e4   : > { %834 = vmatprep.mubr.f32.mxu1 %v1222_v52  ;;  %1184 = vmatpush1.bf16.msra.mxu1 %v1183_v25 }
 0x1e5   : > { %1186 = vmatprep.subr.bf16.mxu1 %v1185_v33 }
 0x1e8   : > { %1188 = vmatpush1.bf16.msra.mxu1 %v1187_v38 }
 0x2b6   : > { %v741_v41 = vpop.f32.mrb[2].mxu1 }
 0x2b7   : > { %v1011_v42 = vmul.f32 -1.442695, %v741_v41  ;;  %v1110_v43 = vpop.f32.mrb[3].mxu1 }
 0x2b9   : > { %1208 = vpow2.f32 %v1011_v42 }
 0x2c3   : > { %v1209_v44 = vpop.eup %1208 }
 0x2c4   : > { %v748_v45 = vadd.f32 1.0, %v1209_v44 }
 0x2c6   : > { %1210 = vrcp.f32 %v748_v45 }
 0x2d0   : > { %v1211_v46 = vpop.eup %1210 }
 0x2d1   : > { %1012 = vmatmul.mubr.msk.f32.vlgmr.msra.gmra.mrb[4].mxu1 %vm591_vm2, %v1211_v46  ;;  %1013 = vmatmul.mubr.msk.f32.vlgmr.msra.gmra.mrb[4].mxu0 %vm591_vm2, %v1211_v46 }
 0x3a4   : > { %v836_v47 = vpop.f32.mrb[4].mxu1  ;;  %v907_v48 = vpop.f32.mrb[4].mxu0 }
 0x3a5   : > { %v915_v49 = vrot.slane %v836_v47, %v1496_v20  ;;  %v923_v50 = vrot.slane %v907_v48, %v1496_v20  ;;  %v838_v51 = vpop.f32.mrb[5].mxu1  ;;  %v909_v52 = vpop.f32.mrb[5].mxu0 }
 0x3a6   : > { %v919_v53 = vrot.slane %v838_v51, %v1496_v20  ;;  %v927_v54 = vrot.slane %v909_v52, %v1496_v20 }
 0x3a7   : > { %v928_v55 = vmul.f32 %v915_v49, %v347_v12  ;;  %v932_v56 = vmul.f32 %v915_v49, %v351_v13  ;;  %v930_v57 = vmul.f32 %v923_v50, %v349_v14  ;;  %v934_v58 = vmul.f32 %v923_v50, %v353_v16 }
 0x3a8   : > { %v929_v59 = vmul.f32 %v919_v53, %v348_v7  ;;  %v933_v60 = vmul.f32 %v919_v53, %v352_v8  ;;  %v931_v20 = vmul.f32 %v927_v54, %v350_v9  ;;  %v935_v4 = vmul.f32 %v927_v54, %v354_v11 }
 0x3a9   : > { %936 = vst [vmem:[%s278_s20] sm:$0xff] %v928_v55  ;;  %940 = vst [vmem:[%s278_s20 + $0x20] sm:$0xff] %v932_v56 }
 0x3aa   : > { %938 = vst [vmem:[%s278_s20 + $0x10] sm:$0xff] %v930_v57  ;;  %942 = vst [vmem:[%s278_s20 + $0x30] sm:$0xff] %v934_v58 }
 0x3ab   : > { %937 = vst [vmem:[%s278_s20 + $0x8] sm:$0xff] %v929_v59  ;;  %941 = vst [vmem:[%s278_s20 + $0x28] sm:$0xff] %v933_v60 }
 0x3ac   : > { %939 = vst [vmem:[%s278_s20 + $0x18] sm:$0xff] %v931_v20  ;;  %943 = vst [vmem:[%s278_s20 + $0x38] sm:$0xff] %v935_v4 }
 0x3ad PF: > { %s17_s24 = sadd.s32 1, %s1218_s24  }
 0x3ae   : > { %p14_p4 = scmp.ge.s32.totalorder %s17_s24, 4  }
 0x3b0   :  { %16 = sbr.rel (!%p14_p4) target bundleno = 1 (0x1), region = 78 }

</bundles_post_ra>
